<compile_context>
chip_gen: v5e
topology: v5e:2x2
jax: 0.10.0
libtpu: 0.0.40
codegen_flags: <defaults>
</compile_context>

<pallas_src>
import functools

import jax
import jax.numpy as jnp
from jax import lax
from jax.experimental import pallas as pl
from jax.experimental.pallas import tpu as pltpu

_LANE = 128


def _round_up(n, m):
    return ((n + m - 1) // m) * m


# ----------------------------- in-kernel helpers -----------------------------

def _mish(x):
    # Mish(x) = x*tanh(softplus(x)) = x*((1+e^x)^2 - 1)/((1+e^x)^2 + 1).
    # One EUP exp + one EUP approx reciprocal; no tanh/log1p VALU chain.
    e = jnp.exp(jnp.minimum(x, 20.0))
    u = (1.0 + e) * (1.0 + e)
    return x * (u - 1.0) * pl.reciprocal(u + 1.0, approx=True)


def _conv1d_same(h2, w_ref, b, masks, *, K):
    """'same' conv over the time axis of a (Bb*T, Cin_p) f32 slab.

    w_ref: (K, Cin_p, Cout_p) bf16.  Each tap is a time-shifted copy of h2
    (pltpu.roll along sublanes + precomputed batch-boundary mask), cast to bf16
    and accumulated with its own MXU matmul -- no im2col concat buffer.
    """
    BbT = h2.shape[0]
    pad = K // 2
    acc = jnp.dot(h2.astype(jnp.bfloat16), w_ref[pad],
                  preferred_element_type=jnp.float32)
    for k in range(K):
        s = pad - k                        # tap_k[t] = h[t + k - pad]
        if s == 0:
            continue
        rolled = pltpu.roll(h2, shift=s % BbT, axis=0)
        tap = jnp.where(masks[k], rolled, 0.0).astype(jnp.bfloat16)
        acc += jnp.dot(tap, w_ref[k], preferred_element_type=jnp.float32)
    return acc + b


def _group_norm(h2, gamma, beta, gm, gmt, *, Bb, T, inv_n, eps=1e-5):
    """GroupNorm over (time, channels-in-group) per batch element.

    h2: (Bb*T, C) f32.  gm: (C, G) channel->group membership (zero rows for
    padded channels), gmt = gm.T.  Shifted two-pass variance (no E[x^2]-E[x]^2
    cancellation); all statistic sums/dots stay in f32.
    """
    BbT, C = h2.shape
    h3 = h2.reshape(Bb, T, C)
    mean_g = jnp.dot(jnp.sum(h3, axis=1), gm,
                     preferred_element_type=jnp.float32) * inv_n       # (Bb, G)
    mean_c = jnp.dot(mean_g, gmt, preferred_element_type=jnp.float32)  # (Bb, C)
    d = h3 - mean_c[:, None, :]
    var_g = jnp.dot(jnp.sum(d * d, axis=1), gm,
                    preferred_element_type=jnp.float32) * inv_n        # (Bb, G)
    var_c = jnp.dot(var_g, gmt, preferred_element_type=jnp.float32)    # (Bb, C)
    scale = lax.rsqrt(var_c + eps) * gamma                             # (Bb, C)
    out3 = d * scale[:, None, :] + beta
    return out3.reshape(BbT, C)


# --------------------------------- kernel ------------------------------------

def _resblock_kernel(*refs, Bb, T, K, n_groups, Cout, Cp, use_film,
                     project_residual):
    x_ref, cond_ref = refs[0], refs[1]
    (w1_ref, b1_ref, g1_ref, be1_ref,
     wc_ref, bc_ref,
     w2_ref, b2_ref, g2_ref, be2_ref,
     gm_ref, gmt_ref) = refs[2:14]
    if project_residual:
        wr_ref, br_ref = refs[14], refs[15]
        out_ref = refs[16]
    else:
        out_ref = refs[14]

    inv_n = 1.0 / float(T * (Cout // n_groups))
    x2 = x_ref[...]                                        # (Bb*T, Cin_p) f32
    gm, gmt = gm_ref[...], gmt_ref[...]

    # Hoisted conv boundary masks, shared by both convs (one iota/mod/compare).
    pad = K // 2
    masks = [None] * K
    if K > 1:
        t_in_b = lax.broadcasted_iota(jnp.int32, (Bb * T, 1), 0) % T
        for k in range(K):
            s = pad - k
            if s > 0:
                masks[k] = t_in_b >= s
            elif s < 0:
                masks[k] = t_in_b < T + s

    # conv1 block: Conv1d -> GroupNorm -> Mish
    h = _conv1d_same(x2, w1_ref, b1_ref[...], masks, K=K)
    h = _mish(_group_norm(h, g1_ref[...], be1_ref[...], gm, gmt,
                          Bb=Bb, T=T, inv_n=inv_n))

    # cond encoder: Mish -> Linear (bf16 MXU), then FiLM / additive.
    cond_blk = cond_ref[...].reshape(Bb, -1)               # (Bb, Dp) f32
    ce = jnp.dot(_mish(cond_blk).astype(jnp.bfloat16), wc_ref[...],
                 preferred_element_type=jnp.float32) + bc_ref[...]
    h3 = h.reshape(Bb, T, Cp)
    if use_film:
        h3 = ce[:, None, :Cp] * h3 + ce[:, None, Cp:]
    else:
        h3 = h3 + ce[:, None, :]
    h = h3.reshape(Bb * T, Cp)

    # conv2 block: Conv1d -> GroupNorm -> Mish
    h = _conv1d_same(h, w2_ref, b2_ref[...], masks, K=K)
    h = _mish(_group_norm(h, g2_ref[...], be2_ref[...], gm, gmt,
                          Bb=Bb, T=T, inv_n=inv_n))

    # residual path (1x1 conv == per-row matmul) and add
    if project_residual:
        res = jnp.dot(x2.astype(jnp.bfloat16), wr_ref[...],
                      preferred_element_type=jnp.float32) + br_ref[...]
    else:
        res = x2
    out_ref[...] = (h + res).astype(out_ref.dtype)


# -------------------------------- wrapper -------------------------------------

def diffusion_cond_res_block_1d(x, cond, params, *, kernel_size=3, n_groups=8,
                                use_film_scale_modulation=False,
                                batch_block=None):
    """x: (B, T, Cin), cond: (B, cond_dim) -> (B, T, Cout) (channels-last)."""
    B, T, Cin = x.shape
    _, cond_dim = cond.shape
    K, _, Cout = params["w1"].shape
    assert K == kernel_size and K % 2 == 1, "odd kernel_size required ('same')"
    assert Cout % n_groups == 0
    # TODO(synk): support T % 8 != 0 (pad T and mask the group-norm stats).
    assert T % 8 == 0, "time axis must be a multiple of the f32 sublane height"
    project_residual = (Cin != Cout)
    f32, bf16 = jnp.float32, jnp.bfloat16

    Cin_p = _round_up(Cin, _LANE)
    Cp = _round_up(Cout, _LANE)
    Dp = _round_up(cond_dim, _LANE)
    CC = 2 * Cp if use_film_scale_modulation else Cp

    def pad_f32(a, rows, cols):
        a = a.astype(f32)
        return jnp.pad(a, ((0, rows - a.shape[0]), (0, cols - a.shape[1])))

    # Conv weights (K, Cin, Cout) -> lane-padded (K, Cin_p, Cp) bf16 tap slices.
    w1 = jnp.pad(params["w1"].astype(f32),
                 ((0, 0), (0, Cin_p - Cin), (0, Cp - Cout))).astype(bf16)
    w2 = jnp.pad(params["w2"].astype(f32),
                 ((0, 0), (0, Cp - Cout), (0, Cp - Cout))).astype(bf16)
    b1, b2 = pad_f32(params["b1"], 1, Cp), pad_f32(params["b2"], 1, Cp)
    g1, be1 = pad_f32(params["g1"], 1, Cp), pad_f32(params["be1"], 1, Cp)
    g2, be2 = pad_f32(params["g2"], 1, Cp), pad_f32(params["be2"], 1, Cp)

    # Cond-encoder Linear; with FiLM the [scale | bias] halves are re-packed so
    # each half starts on a Cp lane boundary.
    wc_raw, bc_raw = params["wc"].astype(f32), params["bc"].astype(f32)
    if use_film_scale_modulation:
        wc = jnp.zeros((Dp, CC), f32)
        wc = wc.at[:cond_dim, :Cout].set(wc_raw[:, :Cout])
        wc = wc.at[:cond_dim, Cp:Cp + Cout].set(wc_raw[:, Cout:])
        bc = jnp.zeros((1, CC), f32)
        bc = bc.at[:, :Cout].set(bc_raw[:, :Cout])
        bc = bc.at[:, Cp:Cp + Cout].set(bc_raw[:, Cout:])
    else:
        wc, bc = pad_f32(wc_raw, Dp, Cp), pad_f32(bc_raw, 1, Cp)
    wc = wc.astype(bf16)

    # Channel -> group membership matrix (padded channels belong to no group).
    cpg = Cout // n_groups
    ch = jnp.arange(Cp)
    gm = (((ch[:, None] // cpg) == jnp.arange(n_groups)[None, :])
          & (ch[:, None] < Cout)).astype(f32)               # (Cp, G)
    gmt = gm.T                                               # (G, Cp)

    # Activations: fold batch into the row (sublane / matmul-M) dimension.
    x_p = jnp.pad(x.astype(f32),
                  ((0, 0), (0, 0), (0, Cin_p - Cin))).reshape(B * T, Cin_p)
    cond_p = jnp.pad(cond.astype(f32),
                     ((0, 0), (0, Dp - cond_dim))).reshape(B, 1, Dp)

    param_arrays = [w1, b1, g1, be1, wc, bc, w2, b2, g2, be2, gm, gmt]
    if project_residual:
        param_arrays += [pad_f32(params["wr"], Cin_p, Cp).astype(bf16),
                         pad_f32(params["br"], 1, Cp)]

    # ---- generation-aware VMEM budget & batch blocking -----------------------
    try:
        vmem_cap = int(pltpu.get_tpu_info().vmem_capacity_bytes)
    except Exception:
        vmem_cap = 64 << 20          # conservative: v7x per-TensorCore VMEM
    weight_bytes = sum(int(a.size) * a.dtype.itemsize for a in param_arrays)
    # Rough per-batch-element live bytes: f32 in/out (double-buffered) + bf16
    # casts + conv/GroupNorm temporaries.
    per_batch = 4 * T * (3 * Cin_p + 8 * Cp)
    budget = max(int(0.45 * vmem_cap) - 2 * weight_bytes, 1 << 20)

    if batch_block is None:
        divisors = [bb for bb in range(B, 0, -1) if B % bb == 0]
        # Prefer >= 2 grid steps so DMA pipelines with compute and both v7x
        # TensorCores get work.
        preferred = [bb for bb in divisors if B // bb >= 2] or divisors
        batch_block = next((bb for bb in preferred if bb * per_batch <= budget),
                           1)
    Bb = batch_block
    assert B % Bb == 0
    if per_batch > budget:
        # TODO(synk): add a T-tiling path for sequences too long for VMEM.
        raise ValueError("single-batch-element working set exceeds the VMEM "
                         "budget; T tiling is not implemented")
    grid = (B // Bb,)

    kernel = functools.partial(
        _resblock_kernel, Bb=Bb, T=T, K=K, n_groups=n_groups, Cout=Cout, Cp=Cp,
        use_film=use_film_scale_modulation, project_residual=project_residual)

    mm_flops = 2 * B * T * K * (Cin_p + Cp) * Cp + 2 * B * Dp * CC
    if project_residual:
        mm_flops += 2 * B * T * Cin_p * Cp
    cost = pl.CostEstimate(
        flops=int(mm_flops + 24 * B * T * Cp),
        transcendentals=int(3 * B * T * Cp + B * Dp),
        bytes_accessed=int(4 * (x_p.size + cond_p.size + B * T * Cp)
                           + weight_bytes))

    vmem_limit = int(min(0.85 * vmem_cap,
                         max(32 << 20, 2 * (weight_bytes + Bb * per_batch))))

    def run(single_buffer_consts):
        def const_spec(a):
            nd = a.ndim
            if single_buffer_consts:
                # Grid-invariant params: single buffer (halves their VMEM).
                return pl.BlockSpec(a.shape, lambda i, _nd=nd: (0,) * _nd,
                                    pipeline_mode=pl.Buffered(1))
            return pl.BlockSpec(a.shape, lambda i, _nd=nd: (0,) * _nd)

        in_specs = [pl.BlockSpec((Bb * T, Cin_p), lambda i: (i, 0)),
                    pl.BlockSpec((Bb, 1, Dp), lambda i: (i, 0, 0))]
        in_specs += [const_spec(a) for a in param_arrays]
        out_specs = pl.BlockSpec((Bb * T, Cp), lambda i: (i, 0))

        return pl.pallas_call(
            kernel,
            out_shape=jax.ShapeDtypeStruct((B * T, Cp), f32),
            grid=grid,
            in_specs=in_specs,
            out_specs=out_specs,
            compiler_params=pltpu.CompilerParams(
                dimension_semantics=("parallel",),   # batch blocks independent
                vmem_limit_bytes=vmem_limit),
            cost_estimate=cost,
        )(x_p, cond_p, *param_arrays)

    try:
        out2 = run(True)
    except Exception:
        # Fallback if pipeline_mode=pl.Buffered(1) is unsupported by this JAX.
        out2 = run(False)

    return out2.reshape(B, T, Cp)[:, :, :Cout]


# ----------------------------- pure-JAX reference -----------------------------

def _ref_forward(x, cond, params, *, kernel_size=3, n_groups=8, use_film=False):
    def mish(v):
        return v * jnp.tanh(jax.nn.softplus(v))

    def conv_block(h, w, b, gamma, beta):
        Bn, T, _ = h.shape
        pad = kernel_size // 2
        hp = jnp.pad(h, ((0, 0), (pad, pad), (0, 0)))
        out = sum(jnp.einsum("btc,cd->btd", hp[:, k:k + T], w[k])
                  for k in range(kernel_size)) + b
        C = out.shape[-1]
        g = out.reshape(Bn, T, n_groups, C // n_groups)
        mean = g.mean(axis=(1, 3), keepdims=True)
        var = g.var(axis=(1, 3), keepdims=True)
        g = (g - mean) / jnp.sqrt(var + 1e-5)
        out = g.reshape(Bn, T, C) * gamma + beta
        return mish(out)

    Cout = params["w1"].shape[-1]
    h = conv_block(x, params["w1"], params["b1"], params["g1"], params["be1"])
    ce = (jnp.dot(mish(cond), params["wc"]) + params["bc"])[:, None, :]
    if use_film:
        h = ce[..., :Cout] * h + ce[..., Cout:]
    else:
        h = h + ce
    h = conv_block(h, params["w2"], params["b2"], params["g2"], params["be2"])
    if x.shape[-1] != Cout:
        res = jnp.einsum("btc,cd->btd", x, params["wr"]) + params["br"]
    else:
        res = x
    return h + res


# ---------------------------------- main ---------------------------------------

if __name__ == "__main__":
    def make_params(key, Cin, Cout, cond_dim, K, film):
        cond_ch = 2 * Cout if film else Cout
        ks = jax.random.split(key, 12)
        f32 = jnp.float32
        return {
            "w1": 0.1 * jax.random.normal(ks[0], (K, Cin, Cout), f32),
            "b1": 0.1 * jax.random.normal(ks[1], (1, Cout), f32),
            "g1": 1.0 + 0.05 * jax.random.normal(ks[2], (1, Cout), f32),
            "be1": 0.05 * jax.random.normal(ks[3], (1, Cout), f32),
            "wc": 0.1 * jax.random.normal(ks[4], (cond_dim, cond_ch), f32),
            "bc": 0.1 * jax.random.normal(ks[5], (1, cond_ch), f32),
            "w2": 0.1 * jax.random.normal(ks[6], (K, Cout, Cout), f32),
            "b2": 0.1 * jax.random.normal(ks[7], (1, Cout), f32),
            "g2": 1.0 + 0.05 * jax.random.normal(ks[8], (1, Cout), f32),
            "be2": 0.05 * jax.random.normal(ks[9], (1, Cout), f32),
            "wr": 0.1 * jax.random.normal(ks[10], (Cin, Cout), f32),
            "br": 0.1 * jax.random.normal(ks[11], (1, Cout), f32),
        }

    def run_case(B, T, Cin, Cout, cond_dim, K, G, film):
        key = jax.random.PRNGKey(0)
        kp, kx, kc = jax.random.split(key, 3)
        params = make_params(kp, Cin, Cout, cond_dim, K, film)
        x = jax.random.normal(kx, (B, T, Cin), jnp.float32)
        cond = jax.random.normal(kc, (B, cond_dim), jnp.float32)
        out = diffusion_cond_res_block_1d(
            x, cond, params, kernel_size=K, n_groups=G,
            use_film_scale_modulation=film)
        out = jax.block_until_ready(out)
        ref = _ref_forward(x, cond, params, kernel_size=K, n_groups=G,
                           use_film=film)
        assert out.shape == (B, T, Cout)
        # Tolerances loosened deliberately: MXU operands are bf16 and Mish uses
        # the EUP approx reciprocal (expected precision loss, not a bug).
        max_err = float(jnp.max(jnp.abs(out - ref)))
        rel_err = float(jnp.linalg.norm(out - ref) / jnp.linalg.norm(ref))
        assert max_err < 0.15 and rel_err < 3e-2, (max_err, rel_err)

    # projection residual + additive conditioning (module defaults)
    run_case(B=2, T=16, Cin=8, Cout=16, cond_dim=32, K=3, G=8, film=False)
    # identity residual + FiLM scale modulation
    run_case(B=2, T=16, Cin=16, Cout=16, cond_dim=32, K=3, G=8, film=True)

    print("KERNEL_OK")
</pallas_src>

<mosaic_0001>
module attributes {stable_mosaic.version = 11 : i64} {
  func.func @_resblock_kernel(%arg0: i32, %arg1: memref<16x128xf32, #tpu.memory_space<vmem>>, %arg2: memref<1x1x128xf32, #tpu.memory_space<vmem>>, %arg3: memref<3x128x128xbf16, #tpu.memory_space<vmem>>, %arg4: memref<1x128xf32, #tpu.memory_space<vmem>>, %arg5: memref<1x128xf32, #tpu.memory_space<vmem>>, %arg6: memref<1x128xf32, #tpu.memory_space<vmem>>, %arg7: memref<128x128xbf16, #tpu.memory_space<vmem>>, %arg8: memref<1x128xf32, #tpu.memory_space<vmem>>, %arg9: memref<3x128x128xbf16, #tpu.memory_space<vmem>>, %arg10: memref<1x128xf32, #tpu.memory_space<vmem>>, %arg11: memref<1x128xf32, #tpu.memory_space<vmem>>, %arg12: memref<1x128xf32, #tpu.memory_space<vmem>>, %arg13: memref<128x8xf32, #tpu.memory_space<vmem>>, %arg14: memref<8x128xf32, #tpu.memory_space<vmem>>, %arg15: memref<128x128xbf16, #tpu.memory_space<vmem>>, %arg16: memref<1x128xf32, #tpu.memory_space<vmem>>, %arg17: memref<16x128xf32, #tpu.memory_space<vmem>>) attributes {dimension_semantics = [#tpu.dimension_semantics<parallel>], iteration_bounds = array<i64: 2>, scalar_prefetch = 0 : i64, scratch_operands = 0 : i64, tpu.core_type = #tpu.core_type<tc>, window_params = [{transform_indices = @transform_0, window_bounds = array<i64: 16, 128>}, {transform_indices = @transform_1, window_bounds = array<i64: 1, 1, 128>}, {pipeline_mode = #tpu.pipeline_mode<synchronous>, transform_indices = @transform_2, window_bounds = array<i64: 3, 128, 128>}, {pipeline_mode = #tpu.pipeline_mode<synchronous>, transform_indices = @transform_3, window_bounds = array<i64: 1, 128>}, {pipeline_mode = #tpu.pipeline_mode<synchronous>, transform_indices = @transform_4, window_bounds = array<i64: 1, 128>}, {pipeline_mode = #tpu.pipeline_mode<synchronous>, transform_indices = @transform_5, window_bounds = array<i64: 1, 128>}, {pipeline_mode = #tpu.pipeline_mode<synchronous>, transform_indices = @transform_6, window_bounds = array<i64: 128, 128>}, {pipeline_mode = #tpu.pipeline_mode<synchronous>, transform_indices = @transform_7, window_bounds = array<i64: 1, 128>}, {pipeline_mode = #tpu.pipeline_mode<synchronous>, transform_indices = @transform_8, window_bounds = array<i64: 3, 128, 128>}, {pipeline_mode = #tpu.pipeline_mode<synchronous>, transform_indices = @transform_9, window_bounds = array<i64: 1, 128>}, {pipeline_mode = #tpu.pipeline_mode<synchronous>, transform_indices = @transform_10, window_bounds = array<i64: 1, 128>}, {pipeline_mode = #tpu.pipeline_mode<synchronous>, transform_indices = @transform_11, window_bounds = array<i64: 1, 128>}, {pipeline_mode = #tpu.pipeline_mode<synchronous>, transform_indices = @transform_12, window_bounds = array<i64: 128, 8>}, {pipeline_mode = #tpu.pipeline_mode<synchronous>, transform_indices = @transform_13, window_bounds = array<i64: 8, 128>}, {pipeline_mode = #tpu.pipeline_mode<synchronous>, transform_indices = @transform_14, window_bounds = array<i64: 128, 128>}, {pipeline_mode = #tpu.pipeline_mode<synchronous>, transform_indices = @transform_15, window_bounds = array<i64: 1, 128>}, {transform_indices = @transform_16, window_bounds = array<i64: 16, 128>}]} {
    %c0 = arith.constant 0 : index
    %c0_0 = arith.constant 0 : index
    %0 = vector.load %arg1[%c0, %c0_0] : memref<16x128xf32, #tpu.memory_space<vmem>>, vector<16x128xf32>
    %c0_1 = arith.constant 0 : index
    %c0_2 = arith.constant 0 : index
    %1 = vector.load %arg13[%c0_1, %c0_2] : memref<128x8xf32, #tpu.memory_space<vmem>>, vector<128x8xf32>
    %c0_3 = arith.constant 0 : index
    %c0_4 = arith.constant 0 : index
    %2 = vector.load %arg14[%c0_3, %c0_4] : memref<8x128xf32, #tpu.memory_space<vmem>>, vector<8x128xf32>
    %3 = tpu.iota {dimensions = array<i32: 0>} : vector<16x1xi32>
    %c16_i32 = arith.constant 16 : i32
    %c0_i32 = arith.constant 0 : i32
    %4 = arith.cmpi eq, %c16_i32, %c0_i32 : i32
    %c1_i32 = arith.constant 1 : i32
    %5 = arith.select %4, %c1_i32, %c16_i32 : i32
    %6 = vector.broadcast %5 : i32 to vector<16x1xi32>
    %7 = arith.remsi %3, %6 : vector<16x1xi32>
    %c0_i32_5 = arith.constant 0 : i32
    %8 = vector.broadcast %c0_i32_5 : i32 to vector<16x1xi32>
    %9 = arith.cmpi ne, %7, %8 : vector<16x1xi32>
    %c0_i32_6 = arith.constant 0 : i32
    %10 = vector.broadcast %c0_i32_6 : i32 to vector<16x1xi32>
    %11 = arith.cmpi slt, %7, %10 : vector<16x1xi32>
    %c0_i32_7 = arith.constant 0 : i32
    %12 = arith.cmpi slt, %5, %c0_i32_7 : i32
    %13 = vector.broadcast %12 : i1 to vector<16x1xi1>
    %14 = vector.broadcast %13 : vector<16x1xi1> to vector<16x1xi1>
    %15 = arith.xori %11, %14 : vector<16x1xi1>
    %16 = arith.andi %15, %9 : vector<16x1xi1>
    %17 = vector.broadcast %5 : i32 to vector<16x1xi32>
    %18 = arith.addi %7, %17 : vector<16x1xi32>
    %19 = arith.select %16, %18, %7 : vector<16x1xi1>, vector<16x1xi32>
    %c1_i32_8 = arith.constant 1 : i32
    %20 = vector.broadcast %c1_i32_8 : i32 to vector<16x1xi32>
    %21 = arith.cmpi sge, %19, %20 : vector<16x1xi32>
    %c15_i32 = arith.constant 15 : i32
    %22 = vector.broadcast %c15_i32 : i32 to vector<16x1xi32>
    %23 = arith.cmpi slt, %19, %22 : vector<16x1xi32>
    %c0_9 = arith.constant 0 : index
    %c0_10 = arith.constant 0 : index
    %24 = vector.load %arg4[%c0_9, %c0_10] : memref<1x128xf32, #tpu.memory_space<vmem>>, vector<1x128xf32>
    %25 = arith.truncf %0 : vector<16x128xf32> to vector<16x128xbf16>
    %c1 = arith.constant 1 : index
    %c0_11 = arith.constant 0 : index
    %c0_12 = arith.constant 0 : index
    %26 = vector.load %arg3[%c1, %c0_11, %c0_12] : memref<3x128x128xbf16, #tpu.memory_space<vmem>>, vector<1x128x128xbf16>
    %27 = vector.shape_cast %26 : vector<1x128x128xbf16> to vector<128x128xbf16>
    %cst = arith.constant dense<0.000000e+00> : vector<16x128xf32>
    %28 = tpu.matmul %25, %27, %cst {dimension_numbers = #tpu.dot_dimension_numbers<[1], [0], [0], [1], [0, 0, 1, 1], [], []>} : vector<16x128xbf16>, vector<128x128xbf16>, vector<16x128xf32> -> vector<16x128xf32>
    %c1_i32_13 = arith.constant 1 : i32
    %29 = tpu.dynamic_rotate %0 by %c1_i32_13 dim 0 : vector<16x128xf32>, i32 -> vector<16x128xf32>
    %cst_14 = arith.constant 0.000000e+00 : f32
    %30 = vector.shape_cast %21 : vector<16x1xi1> to vector<16x1xi1>
    %31 = vector.broadcast %30 : vector<16x1xi1> to vector<16x128xi1>
    %32 = vector.broadcast %cst_14 : f32 to vector<16x128xf32>
    %33 = arith.select %31, %29, %32 : vector<16x128xi1>, vector<16x128xf32>
    %34 = arith.truncf %33 : vector<16x128xf32> to vector<16x128xbf16>
    %c0_15 = arith.constant 0 : index
    %c0_16 = arith.constant 0 : index
    %c0_17 = arith.constant 0 : index
    %35 = vector.load %arg3[%c0_15, %c0_16, %c0_17] : memref<3x128x128xbf16, #tpu.memory_space<vmem>>, vector<1x128x128xbf16>
    %36 = vector.shape_cast %35 : vector<1x128x128xbf16> to vector<128x128xbf16>
    %cst_18 = arith.constant dense<0.000000e+00> : vector<16x128xf32>
    %37 = tpu.matmul %34, %36, %cst_18 {dimension_numbers = #tpu.dot_dimension_numbers<[1], [0], [0], [1], [0, 0, 1, 1], [], []>} : vector<16x128xbf16>, vector<128x128xbf16>, vector<16x128xf32> -> vector<16x128xf32>
    %38 = arith.addf %28, %37 : vector<16x128xf32>
    %c15_i32_19 = arith.constant 15 : i32
    %39 = tpu.dynamic_rotate %0 by %c15_i32_19 dim 0 : vector<16x128xf32>, i32 -> vector<16x128xf32>
    %cst_20 = arith.constant 0.000000e+00 : f32
    %40 = vector.shape_cast %23 : vector<16x1xi1> to vector<16x1xi1>
    %41 = vector.broadcast %40 : vector<16x1xi1> to vector<16x128xi1>
    %42 = vector.broadcast %cst_20 : f32 to vector<16x128xf32>
    %43 = arith.select %41, %39, %42 : vector<16x128xi1>, vector<16x128xf32>
    %44 = arith.truncf %43 : vector<16x128xf32> to vector<16x128xbf16>
    %c2 = arith.constant 2 : index
    %c0_21 = arith.constant 0 : index
    %c0_22 = arith.constant 0 : index
    %45 = vector.load %arg3[%c2, %c0_21, %c0_22] : memref<3x128x128xbf16, #tpu.memory_space<vmem>>, vector<1x128x128xbf16>
    %46 = vector.shape_cast %45 : vector<1x128x128xbf16> to vector<128x128xbf16>
    %cst_23 = arith.constant dense<0.000000e+00> : vector<16x128xf32>
    %47 = tpu.matmul %44, %46, %cst_23 {dimension_numbers = #tpu.dot_dimension_numbers<[1], [0], [0], [1], [0, 0, 1, 1], [], []>} : vector<16x128xbf16>, vector<128x128xbf16>, vector<16x128xf32> -> vector<16x128xf32>
    %48 = arith.addf %38, %47 : vector<16x128xf32>
    %49 = vector.broadcast %24 : vector<1x128xf32> to vector<16x128xf32>
    %50 = arith.addf %48, %49 : vector<16x128xf32>
    %c0_24 = arith.constant 0 : index
    %c0_25 = arith.constant 0 : index
    %51 = vector.load %arg5[%c0_24, %c0_25] : memref<1x128xf32, #tpu.memory_space<vmem>>, vector<1x128xf32>
    %c0_26 = arith.constant 0 : index
    %c0_27 = arith.constant 0 : index
    %52 = vector.load %arg6[%c0_26, %c0_27] : memref<1x128xf32, #tpu.memory_space<vmem>>, vector<1x128xf32>
    %53 = vector.shape_cast %50 : vector<16x128xf32> to vector<1x16x128xf32>
    %cst_28 = arith.constant dense<0.000000e+00> : vector<1x128xf32>
    %54 = vector.multi_reduction <add>, %53, %cst_28 [1] : vector<1x16x128xf32> to vector<1x128xf32>
    %cst_29 = arith.constant dense<0.000000e+00> : vector<1x8xf32>
    %55 = tpu.matmul %54, %1, %cst_29 {dimension_numbers = #tpu.dot_dimension_numbers<[1], [0], [0], [1], [0, 0, 1, 1], [], []>} : vector<1x128xf32>, vector<128x8xf32>, vector<1x8xf32> -> vector<1x8xf32>
    %cst_30 = arith.constant 3.125000e-02 : f32
    %56 = vector.broadcast %cst_30 : f32 to vector<1x8xf32>
    %57 = arith.mulf %55, %56 : vector<1x8xf32>
    %cst_31 = arith.constant dense<0.000000e+00> : vector<1x128xf32>
    %58 = tpu.matmul %57, %2, %cst_31 {dimension_numbers = #tpu.dot_dimension_numbers<[1], [0], [0], [1], [0, 0, 1, 1], [], []>} : vector<1x8xf32>, vector<8x128xf32>, vector<1x128xf32> -> vector<1x128xf32>
    %59 = vector.shape_cast %58 : vector<1x128xf32> to vector<1x1x128xf32>
    %60 = vector.broadcast %59 : vector<1x1x128xf32> to vector<1x16x128xf32>
    %61 = arith.subf %53, %60 : vector<1x16x128xf32>
    %62 = arith.mulf %61, %61 : vector<1x16x128xf32>
    %cst_32 = arith.constant dense<0.000000e+00> : vector<1x128xf32>
    %63 = vector.multi_reduction <add>, %62, %cst_32 [1] : vector<1x16x128xf32> to vector<1x128xf32>
    %cst_33 = arith.constant dense<0.000000e+00> : vector<1x8xf32>
    %64 = tpu.matmul %63, %1, %cst_33 {dimension_numbers = #tpu.dot_dimension_numbers<[1], [0], [0], [1], [0, 0, 1, 1], [], []>} : vector<1x128xf32>, vector<128x8xf32>, vector<1x8xf32> -> vector<1x8xf32>
    %cst_34 = arith.constant 3.125000e-02 : f32
    %65 = vector.broadcast %cst_34 : f32 to vector<1x8xf32>
    %66 = arith.mulf %64, %65 : vector<1x8xf32>
    %cst_35 = arith.constant dense<0.000000e+00> : vector<1x128xf32>
    %67 = tpu.matmul %66, %2, %cst_35 {dimension_numbers = #tpu.dot_dimension_numbers<[1], [0], [0], [1], [0, 0, 1, 1], [], []>} : vector<1x8xf32>, vector<8x128xf32>, vector<1x128xf32> -> vector<1x128xf32>
    %cst_36 = arith.constant 9.99999974E-6 : f32
    %68 = vector.broadcast %cst_36 : f32 to vector<1x128xf32>
    %69 = arith.addf %67, %68 : vector<1x128xf32>
    %70 = math.rsqrt %69 : vector<1x128xf32>
    %71 = arith.mulf %70, %51 : vector<1x128xf32>
    %72 = vector.shape_cast %71 : vector<1x128xf32> to vector<1x1x128xf32>
    %73 = vector.broadcast %72 : vector<1x1x128xf32> to vector<1x16x128xf32>
    %74 = arith.mulf %61, %73 : vector<1x16x128xf32>
    %75 = vector.shape_cast %52 : vector<1x128xf32> to vector<1x1x128xf32>
    %76 = vector.broadcast %75 : vector<1x1x128xf32> to vector<1x16x128xf32>
    %77 = arith.addf %74, %76 : vector<1x16x128xf32>
    %78 = vector.shape_cast %77 : vector<1x16x128xf32> to vector<16x128xf32>
    %cst_37 = arith.constant 2.000000e+01 : f32
    %79 = vector.broadcast %cst_37 : f32 to vector<16x128xf32>
    %80 = arith.minimumf %78, %79 : vector<16x128xf32>
    %81 = math.exp %80 : vector<16x128xf32>
    %cst_38 = arith.constant 1.000000e+00 : f32
    %82 = vector.broadcast %cst_38 : f32 to vector<16x128xf32>
    %83 = arith.addf %82, %81 : vector<16x128xf32>
    %cst_39 = arith.constant 1.000000e+00 : f32
    %84 = vector.broadcast %cst_39 : f32 to vector<16x128xf32>
    %85 = arith.addf %84, %81 : vector<16x128xf32>
    %86 = arith.mulf %83, %85 : vector<16x128xf32>
    %cst_40 = arith.constant 1.000000e+00 : f32
    %87 = vector.broadcast %cst_40 : f32 to vector<16x128xf32>
    %88 = arith.subf %86, %87 : vector<16x128xf32>
    %89 = arith.mulf %78, %88 : vector<16x128xf32>
    %cst_41 = arith.constant 1.000000e+00 : f32
    %90 = vector.broadcast %cst_41 : f32 to vector<16x128xf32>
    %91 = arith.addf %86, %90 : vector<16x128xf32>
    %92 = tpu.reciprocal %91 {approx = true} : vector<16x128xf32> -> vector<16x128xf32>
    %93 = arith.mulf %89, %92 : vector<16x128xf32>
    %c0_42 = arith.constant 0 : index
    %c0_43 = arith.constant 0 : index
    %c0_44 = arith.constant 0 : index
    %94 = vector.load %arg2[%c0_42, %c0_43, %c0_44] : memref<1x1x128xf32, #tpu.memory_space<vmem>>, vector<1x1x128xf32>
    %95 = vector.shape_cast %94 : vector<1x1x128xf32> to vector<1x128xf32>
    %cst_45 = arith.constant 2.000000e+01 : f32
    %96 = vector.broadcast %cst_45 : f32 to vector<1x128xf32>
    %97 = arith.minimumf %95, %96 : vector<1x128xf32>
    %98 = math.exp %97 : vector<1x128xf32>
    %cst_46 = arith.constant 1.000000e+00 : f32
    %99 = vector.broadcast %cst_46 : f32 to vector<1x128xf32>
    %100 = arith.addf %99, %98 : vector<1x128xf32>
    %cst_47 = arith.constant 1.000000e+00 : f32
    %101 = vector.broadcast %cst_47 : f32 to vector<1x128xf32>
    %102 = arith.addf %101, %98 : vector<1x128xf32>
    %103 = arith.mulf %100, %102 : vector<1x128xf32>
    %cst_48 = arith.constant 1.000000e+00 : f32
    %104 = vector.broadcast %cst_48 : f32 to vector<1x128xf32>
    %105 = arith.subf %103, %104 : vector<1x128xf32>
    %106 = arith.mulf %95, %105 : vector<1x128xf32>
    %cst_49 = arith.constant 1.000000e+00 : f32
    %107 = vector.broadcast %cst_49 : f32 to vector<1x128xf32>
    %108 = arith.addf %103, %107 : vector<1x128xf32>
    %109 = tpu.reciprocal %108 {approx = true} : vector<1x128xf32> -> vector<1x128xf32>
    %110 = arith.mulf %106, %109 : vector<1x128xf32>
    %111 = arith.truncf %110 : vector<1x128xf32> to vector<1x128xbf16>
    %c0_50 = arith.constant 0 : index
    %c0_51 = arith.constant 0 : index
    %112 = vector.load %arg7[%c0_50, %c0_51] : memref<128x128xbf16, #tpu.memory_space<vmem>>, vector<128x128xbf16>
    %cst_52 = arith.constant dense<0.000000e+00> : vector<1x128xf32>
    %113 = tpu.matmul %111, %112, %cst_52 {dimension_numbers = #tpu.dot_dimension_numbers<[1], [0], [0], [1], [0, 0, 1, 1], [], []>} : vector<1x128xbf16>, vector<128x128xbf16>, vector<1x128xf32> -> vector<1x128xf32>
    %c0_53 = arith.constant 0 : index
    %c0_54 = arith.constant 0 : index
    %114 = vector.load %arg8[%c0_53, %c0_54] : memref<1x128xf32, #tpu.memory_space<vmem>>, vector<1x128xf32>
    %115 = arith.addf %113, %114 : vector<1x128xf32>
    %116 = vector.shape_cast %93 : vector<16x128xf32> to vector<1x16x128xf32>
    %117 = vector.shape_cast %115 : vector<1x128xf32> to vector<1x1x128xf32>
    %118 = vector.broadcast %117 : vector<1x1x128xf32> to vector<1x16x128xf32>
    %119 = arith.addf %116, %118 : vector<1x16x128xf32>
    %120 = vector.shape_cast %119 : vector<1x16x128xf32> to vector<16x128xf32>
    %c0_55 = arith.constant 0 : index
    %c0_56 = arith.constant 0 : index
    %121 = vector.load %arg10[%c0_55, %c0_56] : memref<1x128xf32, #tpu.memory_space<vmem>>, vector<1x128xf32>
    %122 = arith.truncf %120 : vector<16x128xf32> to vector<16x128xbf16>
    %c1_57 = arith.constant 1 : index
    %c0_58 = arith.constant 0 : index
    %c0_59 = arith.constant 0 : index
    %123 = vector.load %arg9[%c1_57, %c0_58, %c0_59] : memref<3x128x128xbf16, #tpu.memory_space<vmem>>, vector<1x128x128xbf16>
    %124 = vector.shape_cast %123 : vector<1x128x128xbf16> to vector<128x128xbf16>
    %cst_60 = arith.constant dense<0.000000e+00> : vector<16x128xf32>
    %125 = tpu.matmul %122, %124, %cst_60 {dimension_numbers = #tpu.dot_dimension_numbers<[1], [0], [0], [1], [0, 0, 1, 1], [], []>} : vector<16x128xbf16>, vector<128x128xbf16>, vector<16x128xf32> -> vector<16x128xf32>
    %c1_i32_61 = arith.constant 1 : i32
    %126 = tpu.dynamic_rotate %120 by %c1_i32_61 dim 0 : vector<16x128xf32>, i32 -> vector<16x128xf32>
    %cst_62 = arith.constant 0.000000e+00 : f32
    %127 = vector.shape_cast %21 : vector<16x1xi1> to vector<16x1xi1>
    %128 = vector.broadcast %127 : vector<16x1xi1> to vector<16x128xi1>
    %129 = vector.broadcast %cst_62 : f32 to vector<16x128xf32>
    %130 = arith.select %128, %126, %129 : vector<16x128xi1>, vector<16x128xf32>
    %131 = arith.truncf %130 : vector<16x128xf32> to vector<16x128xbf16>
    %c0_63 = arith.constant 0 : index
    %c0_64 = arith.constant 0 : index
    %c0_65 = arith.constant 0 : index
    %132 = vector.load %arg9[%c0_63, %c0_64, %c0_65] : memref<3x128x128xbf16, #tpu.memory_space<vmem>>, vector<1x128x128xbf16>
    %133 = vector.shape_cast %132 : vector<1x128x128xbf16> to vector<128x128xbf16>
    %cst_66 = arith.constant dense<0.000000e+00> : vector<16x128xf32>
    %134 = tpu.matmul %131, %133, %cst_66 {dimension_numbers = #tpu.dot_dimension_numbers<[1], [0], [0], [1], [0, 0, 1, 1], [], []>} : vector<16x128xbf16>, vector<128x128xbf16>, vector<16x128xf32> -> vector<16x128xf32>
    %135 = arith.addf %125, %134 : vector<16x128xf32>
    %c15_i32_67 = arith.constant 15 : i32
    %136 = tpu.dynamic_rotate %120 by %c15_i32_67 dim 0 : vector<16x128xf32>, i32 -> vector<16x128xf32>
    %cst_68 = arith.constant 0.000000e+00 : f32
    %137 = vector.shape_cast %23 : vector<16x1xi1> to vector<16x1xi1>
    %138 = vector.broadcast %137 : vector<16x1xi1> to vector<16x128xi1>
    %139 = vector.broadcast %cst_68 : f32 to vector<16x128xf32>
    %140 = arith.select %138, %136, %139 : vector<16x128xi1>, vector<16x128xf32>
    %141 = arith.truncf %140 : vector<16x128xf32> to vector<16x128xbf16>
    %c2_69 = arith.constant 2 : index
    %c0_70 = arith.constant 0 : index
    %c0_71 = arith.constant 0 : index
    %142 = vector.load %arg9[%c2_69, %c0_70, %c0_71] : memref<3x128x128xbf16, #tpu.memory_space<vmem>>, vector<1x128x128xbf16>
    %143 = vector.shape_cast %142 : vector<1x128x128xbf16> to vector<128x128xbf16>
    %cst_72 = arith.constant dense<0.000000e+00> : vector<16x128xf32>
    %144 = tpu.matmul %141, %143, %cst_72 {dimension_numbers = #tpu.dot_dimension_numbers<[1], [0], [0], [1], [0, 0, 1, 1], [], []>} : vector<16x128xbf16>, vector<128x128xbf16>, vector<16x128xf32> -> vector<16x128xf32>
    %145 = arith.addf %135, %144 : vector<16x128xf32>
    %146 = vector.broadcast %121 : vector<1x128xf32> to vector<16x128xf32>
    %147 = arith.addf %145, %146 : vector<16x128xf32>
    %c0_73 = arith.constant 0 : index
    %c0_74 = arith.constant 0 : index
    %148 = vector.load %arg11[%c0_73, %c0_74] : memref<1x128xf32, #tpu.memory_space<vmem>>, vector<1x128xf32>
    %c0_75 = arith.constant 0 : index
    %c0_76 = arith.constant 0 : index
    %149 = vector.load %arg12[%c0_75, %c0_76] : memref<1x128xf32, #tpu.memory_space<vmem>>, vector<1x128xf32>
    %150 = vector.shape_cast %147 : vector<16x128xf32> to vector<1x16x128xf32>
    %cst_77 = arith.constant dense<0.000000e+00> : vector<1x128xf32>
    %151 = vector.multi_reduction <add>, %150, %cst_77 [1] : vector<1x16x128xf32> to vector<1x128xf32>
    %cst_78 = arith.constant dense<0.000000e+00> : vector<1x8xf32>
    %152 = tpu.matmul %151, %1, %cst_78 {dimension_numbers = #tpu.dot_dimension_numbers<[1], [0], [0], [1], [0, 0, 1, 1], [], []>} : vector<1x128xf32>, vector<128x8xf32>, vector<1x8xf32> -> vector<1x8xf32>
    %cst_79 = arith.constant 3.125000e-02 : f32
    %153 = vector.broadcast %cst_79 : f32 to vector<1x8xf32>
    %154 = arith.mulf %152, %153 : vector<1x8xf32>
    %cst_80 = arith.constant dense<0.000000e+00> : vector<1x128xf32>
    %155 = tpu.matmul %154, %2, %cst_80 {dimension_numbers = #tpu.dot_dimension_numbers<[1], [0], [0], [1], [0, 0, 1, 1], [], []>} : vector<1x8xf32>, vector<8x128xf32>, vector<1x128xf32> -> vector<1x128xf32>
    %156 = vector.shape_cast %155 : vector<1x128xf32> to vector<1x1x128xf32>
    %157 = vector.broadcast %156 : vector<1x1x128xf32> to vector<1x16x128xf32>
    %158 = arith.subf %150, %157 : vector<1x16x128xf32>
    %159 = arith.mulf %158, %158 : vector<1x16x128xf32>
    %cst_81 = arith.constant dense<0.000000e+00> : vector<1x128xf32>
    %160 = vector.multi_reduction <add>, %159, %cst_81 [1] : vector<1x16x128xf32> to vector<1x128xf32>
    %cst_82 = arith.constant dense<0.000000e+00> : vector<1x8xf32>
    %161 = tpu.matmul %160, %1, %cst_82 {dimension_numbers = #tpu.dot_dimension_numbers<[1], [0], [0], [1], [0, 0, 1, 1], [], []>} : vector<1x128xf32>, vector<128x8xf32>, vector<1x8xf32> -> vector<1x8xf32>
    %cst_83 = arith.constant 3.125000e-02 : f32
    %162 = vector.broadcast %cst_83 : f32 to vector<1x8xf32>
    %163 = arith.mulf %161, %162 : vector<1x8xf32>
    %cst_84 = arith.constant dense<0.000000e+00> : vector<1x128xf32>
    %164 = tpu.matmul %163, %2, %cst_84 {dimension_numbers = #tpu.dot_dimension_numbers<[1], [0], [0], [1], [0, 0, 1, 1], [], []>} : vector<1x8xf32>, vector<8x128xf32>, vector<1x128xf32> -> vector<1x128xf32>
    %cst_85 = arith.constant 9.99999974E-6 : f32
    %165 = vector.broadcast %cst_85 : f32 to vector<1x128xf32>
    %166 = arith.addf %164, %165 : vector<1x128xf32>
    %167 = math.rsqrt %166 : vector<1x128xf32>
    %168 = arith.mulf %167, %148 : vector<1x128xf32>
    %169 = vector.shape_cast %168 : vector<1x128xf32> to vector<1x1x128xf32>
    %170 = vector.broadcast %169 : vector<1x1x128xf32> to vector<1x16x128xf32>
    %171 = arith.mulf %158, %170 : vector<1x16x128xf32>
    %172 = vector.shape_cast %149 : vector<1x128xf32> to vector<1x1x128xf32>
    %173 = vector.broadcast %172 : vector<1x1x128xf32> to vector<1x16x128xf32>
    %174 = arith.addf %171, %173 : vector<1x16x128xf32>
    %175 = vector.shape_cast %174 : vector<1x16x128xf32> to vector<16x128xf32>
    %cst_86 = arith.constant 2.000000e+01 : f32
    %176 = vector.broadcast %cst_86 : f32 to vector<16x128xf32>
    %177 = arith.minimumf %175, %176 : vector<16x128xf32>
    %178 = math.exp %177 : vector<16x128xf32>
    %cst_87 = arith.constant 1.000000e+00 : f32
    %179 = vector.broadcast %cst_87 : f32 to vector<16x128xf32>
    %180 = arith.addf %179, %178 : vector<16x128xf32>
    %cst_88 = arith.constant 1.000000e+00 : f32
    %181 = vector.broadcast %cst_88 : f32 to vector<16x128xf32>
    %182 = arith.addf %181, %178 : vector<16x128xf32>
    %183 = arith.mulf %180, %182 : vector<16x128xf32>
    %cst_89 = arith.constant 1.000000e+00 : f32
    %184 = vector.broadcast %cst_89 : f32 to vector<16x128xf32>
    %185 = arith.subf %183, %184 : vector<16x128xf32>
    %186 = arith.mulf %175, %185 : vector<16x128xf32>
    %cst_90 = arith.constant 1.000000e+00 : f32
    %187 = vector.broadcast %cst_90 : f32 to vector<16x128xf32>
    %188 = arith.addf %183, %187 : vector<16x128xf32>
    %189 = tpu.reciprocal %188 {approx = true} : vector<16x128xf32> -> vector<16x128xf32>
    %190 = arith.mulf %186, %189 : vector<16x128xf32>
    %191 = arith.truncf %0 : vector<16x128xf32> to vector<16x128xbf16>
    %c0_91 = arith.constant 0 : index
    %c0_92 = arith.constant 0 : index
    %192 = vector.load %arg15[%c0_91, %c0_92] : memref<128x128xbf16, #tpu.memory_space<vmem>>, vector<128x128xbf16>
    %cst_93 = arith.constant dense<0.000000e+00> : vector<16x128xf32>
    %193 = tpu.matmul %191, %192, %cst_93 {dimension_numbers = #tpu.dot_dimension_numbers<[1], [0], [0], [1], [0, 0, 1, 1], [], []>} : vector<16x128xbf16>, vector<128x128xbf16>, vector<16x128xf32> -> vector<16x128xf32>
    %c0_94 = arith.constant 0 : index
    %c0_95 = arith.constant 0 : index
    %194 = vector.load %arg16[%c0_94, %c0_95] : memref<1x128xf32, #tpu.memory_space<vmem>>, vector<1x128xf32>
    %195 = vector.broadcast %194 : vector<1x128xf32> to vector<16x128xf32>
    %196 = arith.addf %193, %195 : vector<16x128xf32>
    %197 = arith.addf %190, %196 : vector<16x128xf32>
    %c0_96 = arith.constant 0 : index
    %c0_97 = arith.constant 0 : index
    %198 = vector.load %arg17[%c0_96, %c0_97] : memref<16x128xf32, #tpu.memory_space<vmem>>, vector<16x128xf32>
    tpu.vector_store %arg17[%c0_96, %c0_97], %197 {strides = array<i32>} : memref<16x128xf32, #tpu.memory_space<vmem>>, vector<16x128xf32>,
    return
  }
  func.func @transform_0(%arg0: i32) -> (i32, i32) {
    %c0_i32 = arith.constant 0 : i32
    %c0_i32_0 = arith.constant 0 : i32
    return %arg0, %c0_i32 : i32, i32
  }
  func.func @transform_1(%arg0: i32) -> (i32, i32, i32) {
    %c0_i32 = arith.constant 0 : i32
    %c0_i32_0 = arith.constant 0 : i32
    %c0_i32_1 = arith.constant 0 : i32
    return %arg0, %c0_i32, %c0_i32_0 : i32, i32, i32
  }
  func.func @transform_2(%arg0: i32) -> (i32, i32, i32) {
    %c0_i32 = arith.constant 0 : i32
    %c0_i32_0 = arith.constant 0 : i32
    %c0_i32_1 = arith.constant 0 : i32
    %c0_i32_2 = arith.constant 0 : i32
    return %c0_i32, %c0_i32_0, %c0_i32_1 : i32, i32, i32
  }
  func.func @transform_3(%arg0: i32) -> (i32, i32) {
    %c0_i32 = arith.constant 0 : i32
    %c0_i32_0 = arith.constant 0 : i32
    %c0_i32_1 = arith.constant 0 : i32
    return %c0_i32, %c0_i32_0 : i32, i32
  }
  func.func @transform_4(%arg0: i32) -> (i32, i32) {
    %c0_i32 = arith.constant 0 : i32
    %c0_i32_0 = arith.constant 0 : i32
    %c0_i32_1 = arith.constant 0 : i32
    return %c0_i32, %c0_i32_0 : i32, i32
  }
  func.func @transform_5(%arg0: i32) -> (i32, i32) {
    %c0_i32 = arith.constant 0 : i32
    %c0_i32_0 = arith.constant 0 : i32
    %c0_i32_1 = arith.constant 0 : i32
    return %c0_i32, %c0_i32_0 : i32, i32
  }
  func.func @transform_6(%arg0: i32) -> (i32, i32) {
    %c0_i32 = arith.constant 0 : i32
    %c0_i32_0 = arith.constant 0 : i32
    %c0_i32_1 = arith.constant 0 : i32
    return %c0_i32, %c0_i32_0 : i32, i32
  }
  func.func @transform_7(%arg0: i32) -> (i32, i32) {
    %c0_i32 = arith.constant 0 : i32
    %c0_i32_0 = arith.constant 0 : i32
    %c0_i32_1 = arith.constant 0 : i32
    return %c0_i32, %c0_i32_0 : i32, i32
  }
  func.func @transform_8(%arg0: i32) -> (i32, i32, i32) {
    %c0_i32 = arith.constant 0 : i32
    %c0_i32_0 = arith.constant 0 : i32
    %c0_i32_1 = arith.constant 0 : i32
    %c0_i32_2 = arith.constant 0 : i32
    return %c0_i32, %c0_i32_0, %c0_i32_1 : i32, i32, i32
  }
  func.func @transform_9(%arg0: i32) -> (i32, i32) {
    %c0_i32 = arith.constant 0 : i32
    %c0_i32_0 = arith.constant 0 : i32
    %c0_i32_1 = arith.constant 0 : i32
    return %c0_i32, %c0_i32_0 : i32, i32
  }
  func.func @transform_10(%arg0: i32) -> (i32, i32) {
    %c0_i32 = arith.constant 0 : i32
    %c0_i32_0 = arith.constant 0 : i32
    %c0_i32_1 = arith.constant 0 : i32
    return %c0_i32, %c0_i32_0 : i32, i32
  }
  func.func @transform_11(%arg0: i32) -> (i32, i32) {
    %c0_i32 = arith.constant 0 : i32
    %c0_i32_0 = arith.constant 0 : i32
    %c0_i32_1 = arith.constant 0 : i32
    return %c0_i32, %c0_i32_0 : i32, i32
  }
  func.func @transform_12(%arg0: i32) -> (i32, i32) {
    %c0_i32 = arith.constant 0 : i32
    %c0_i32_0 = arith.constant 0 : i32
    %c0_i32_1 = arith.constant 0 : i32
    return %c0_i32, %c0_i32_0 : i32, i32
  }
  func.func @transform_13(%arg0: i32) -> (i32, i32) {
    %c0_i32 = arith.constant 0 : i32
    %c0_i32_0 = arith.constant 0 : i32
    %c0_i32_1 = arith.constant 0 : i32
    return %c0_i32, %c0_i32_0 : i32, i32
  }
  func.func @transform_14(%arg0: i32) -> (i32, i32) {
    %c0_i32 = arith.constant 0 : i32
    %c0_i32_0 = arith.constant 0 : i32
    %c0_i32_1 = arith.constant 0 : i32
    return %c0_i32, %c0_i32_0 : i32, i32
  }
  func.func @transform_15(%arg0: i32) -> (i32, i32) {
    %c0_i32 = arith.constant 0 : i32
    %c0_i32_0 = arith.constant 0 : i32
    %c0_i32_1 = arith.constant 0 : i32
    return %c0_i32, %c0_i32_0 : i32, i32
  }
  func.func @transform_16(%arg0: i32) -> (i32, i32) {
    %c0_i32 = arith.constant 0 : i32
    %c0_i32_0 = arith.constant 0 : i32
    return %arg0, %c0_i32 : i32, i32
  }
}

module attributes {stable_mosaic.version = 11 : i64} {
  func.func @_resblock_kernel(%arg0: i32, %arg1: memref<16x128xf32, #tpu.memory_space<vmem>>, %arg2: memref<1x1x128xf32, #tpu.memory_space<vmem>>, %arg3: memref<3x128x128xbf16, #tpu.memory_space<vmem>>, %arg4: memref<1x128xf32, #tpu.memory_space<vmem>>, %arg5: memref<1x128xf32, #tpu.memory_space<vmem>>, %arg6: memref<1x128xf32, #tpu.memory_space<vmem>>, %arg7: memref<128x128xbf16, #tpu.memory_space<vmem>>, %arg8: memref<1x128xf32, #tpu.memory_space<vmem>>, %arg9: memref<3x128x128xbf16, #tpu.memory_space<vmem>>, %arg10: memref<1x128xf32, #tpu.memory_space<vmem>>, %arg11: memref<1x128xf32, #tpu.memory_space<vmem>>, %arg12: memref<1x128xf32, #tpu.memory_space<vmem>>, %arg13: memref<128x8xf32, #tpu.memory_space<vmem>>, %arg14: memref<8x128xf32, #tpu.memory_space<vmem>>, %arg15: memref<128x128xbf16, #tpu.memory_space<vmem>>, %arg16: memref<1x128xf32, #tpu.memory_space<vmem>>, %arg17: memref<16x128xf32, #tpu.memory_space<vmem>>) attributes {dimension_semantics = [#tpu.dimension_semantics<parallel>], iteration_bounds = array<i64: 2>, scalar_prefetch = 0 : i64, scratch_operands = 0 : i64, tpu.core_type = #tpu.core_type<tc>, window_params = [{transform_indices = @transform_0, window_bounds = array<i64: 16, 128>}, {transform_indices = @transform_1, window_bounds = array<i64: 1, 1, 128>}, {pipeline_mode = #tpu.pipeline_mode<synchronous>, transform_indices = @transform_2, window_bounds = array<i64: 3, 128, 128>}, {pipeline_mode = #tpu.pipeline_mode<synchronous>, transform_indices = @transform_3, window_bounds = array<i64: 1, 128>}, {pipeline_mode = #tpu.pipeline_mode<synchronous>, transform_indices = @transform_4, window_bounds = array<i64: 1, 128>}, {pipeline_mode = #tpu.pipeline_mode<synchronous>, transform_indices = @transform_5, window_bounds = array<i64: 1, 128>}, {pipeline_mode = #tpu.pipeline_mode<synchronous>, transform_indices = @transform_6, window_bounds = array<i64: 128, 128>}, {pipeline_mode = #tpu.pipeline_mode<synchronous>, transform_indices = @transform_7, window_bounds = array<i64: 1, 128>}, {pipeline_mode = #tpu.pipeline_mode<synchronous>, transform_indices = @transform_8, window_bounds = array<i64: 3, 128, 128>}, {pipeline_mode = #tpu.pipeline_mode<synchronous>, transform_indices = @transform_9, window_bounds = array<i64: 1, 128>}, {pipeline_mode = #tpu.pipeline_mode<synchronous>, transform_indices = @transform_10, window_bounds = array<i64: 1, 128>}, {pipeline_mode = #tpu.pipeline_mode<synchronous>, transform_indices = @transform_11, window_bounds = array<i64: 1, 128>}, {pipeline_mode = #tpu.pipeline_mode<synchronous>, transform_indices = @transform_12, window_bounds = array<i64: 128, 8>}, {pipeline_mode = #tpu.pipeline_mode<synchronous>, transform_indices = @transform_13, window_bounds = array<i64: 8, 128>}, {pipeline_mode = #tpu.pipeline_mode<synchronous>, transform_indices = @transform_14, window_bounds = array<i64: 128, 128>}, {pipeline_mode = #tpu.pipeline_mode<synchronous>, transform_indices = @transform_15, window_bounds = array<i64: 1, 128>}, {transform_indices = @transform_16, window_bounds = array<i64: 16, 128>}]} {
    %c0 = arith.constant 0 : index
    %c0_0 = arith.constant 0 : index
    %0 = vector.load %arg1[%c0, %c0_0] : memref<16x128xf32, #tpu.memory_space<vmem>>, vector<16x128xf32>
    %c0_1 = arith.constant 0 : index
    %c0_2 = arith.constant 0 : index
    %1 = vector.load %arg13[%c0_1, %c0_2] : memref<128x8xf32, #tpu.memory_space<vmem>>, vector<128x8xf32>
    %c0_3 = arith.constant 0 : index
    %c0_4 = arith.constant 0 : index
    %2 = vector.load %arg14[%c0_3, %c0_4] : memref<8x128xf32, #tpu.memory_space<vmem>>, vector<8x128xf32>
    %3 = tpu.iota {dimensions = array<i32: 0>} : vector<16x1xi32>
    %c16_i32 = arith.constant 16 : i32
    %c0_i32 = arith.constant 0 : i32
    %4 = arith.cmpi eq, %c16_i32, %c0_i32 : i32
    %c1_i32 = arith.constant 1 : i32
    %5 = arith.select %4, %c1_i32, %c16_i32 : i32
    %6 = vector.broadcast %5 : i32 to vector<16x1xi32>
    %7 = arith.remsi %3, %6 : vector<16x1xi32>
    %c0_i32_5 = arith.constant 0 : i32
    %8 = vector.broadcast %c0_i32_5 : i32 to vector<16x1xi32>
    %9 = arith.cmpi ne, %7, %8 : vector<16x1xi32>
    %c0_i32_6 = arith.constant 0 : i32
    %10 = vector.broadcast %c0_i32_6 : i32 to vector<16x1xi32>
    %11 = arith.cmpi slt, %7, %10 : vector<16x1xi32>
    %c0_i32_7 = arith.constant 0 : i32
    %12 = arith.cmpi slt, %5, %c0_i32_7 : i32
    %13 = vector.broadcast %12 : i1 to vector<16x1xi1>
    %14 = vector.broadcast %13 : vector<16x1xi1> to vector<16x1xi1>
    %15 = arith.xori %11, %14 : vector<16x1xi1>
    %16 = arith.andi %15, %9 : vector<16x1xi1>
    %17 = vector.broadcast %5 : i32 to vector<16x1xi32>
    %18 = arith.addi %7, %17 : vector<16x1xi32>
    %19 = arith.select %16, %18, %7 : vector<16x1xi1>, vector<16x1xi32>
    %c1_i32_8 = arith.constant 1 : i32
    %20 = vector.broadcast %c1_i32_8 : i32 to vector<16x1xi32>
    %21 = arith.cmpi sge, %19, %20 : vector<16x1xi32>
    %c15_i32 = arith.constant 15 : i32
    %22 = vector.broadcast %c15_i32 : i32 to vector<16x1xi32>
    %23 = arith.cmpi slt, %19, %22 : vector<16x1xi32>
    %c0_9 = arith.constant 0 : index
    %c0_10 = arith.constant 0 : index
    %24 = vector.load %arg4[%c0_9, %c0_10] : memref<1x128xf32, #tpu.memory_space<vmem>>, vector<1x128xf32>
    %25 = arith.truncf %0 : vector<16x128xf32> to vector<16x128xbf16>
    %c1 = arith.constant 1 : index
    %c0_11 = arith.constant 0 : index
    %c0_12 = arith.constant 0 : index
    %26 = vector.load %arg3[%c1, %c0_11, %c0_12] : memref<3x128x128xbf16, #tpu.memory_space<vmem>>, vector<1x128x128xbf16>
    %27 = vector.shape_cast %26 : vector<1x128x128xbf16> to vector<128x128xbf16>
    %cst = arith.constant dense<0.000000e+00> : vector<16x128xf32>
    %28 = tpu.matmul %25, %27, %cst {dimension_numbers = #tpu.dot_dimension_numbers<[1], [0], [0], [1], [0, 0, 1, 1], [], []>} : vector<16x128xbf16>, vector<128x128xbf16>, vector<16x128xf32> -> vector<16x128xf32>
    %c1_i32_13 = arith.constant 1 : i32
    %29 = tpu.dynamic_rotate %0 by %c1_i32_13 dim 0 : vector<16x128xf32>, i32 -> vector<16x128xf32>
    %cst_14 = arith.constant 0.000000e+00 : f32
    %30 = vector.shape_cast %21 : vector<16x1xi1> to vector<16x1xi1>
    %31 = vector.broadcast %30 : vector<16x1xi1> to vector<16x128xi1>
    %32 = vector.broadcast %cst_14 : f32 to vector<16x128xf32>
    %33 = arith.select %31, %29, %32 : vector<16x128xi1>, vector<16x128xf32>
    %34 = arith.truncf %33 : vector<16x128xf32> to vector<16x128xbf16>
    %c0_15 = arith.constant 0 : index
    %c0_16 = arith.constant 0 : index
    %c0_17 = arith.constant 0 : index
    %35 = vector.load %arg3[%c0_15, %c0_16, %c0_17] : memref<3x128x128xbf16, #tpu.memory_space<vmem>>, vector<1x128x128xbf16>
    %36 = vector.shape_cast %35 : vector<1x128x128xbf16> to vector<128x128xbf16>
    %cst_18 = arith.constant dense<0.000000e+00> : vector<16x128xf32>
    %37 = tpu.matmul %34, %36, %cst_18 {dimension_numbers = #tpu.dot_dimension_numbers<[1], [0], [0], [1], [0, 0, 1, 1], [], []>} : vector<16x128xbf16>, vector<128x128xbf16>, vector<16x128xf32> -> vector<16x128xf32>
    %38 = arith.addf %28, %37 : vector<16x128xf32>
    %c15_i32_19 = arith.constant 15 : i32
    %39 = tpu.dynamic_rotate %0 by %c15_i32_19 dim 0 : vector<16x128xf32>, i32 -> vector<16x128xf32>
    %cst_20 = arith.constant 0.000000e+00 : f32
    %40 = vector.shape_cast %23 : vector<16x1xi1> to vector<16x1xi1>
    %41 = vector.broadcast %40 : vector<16x1xi1> to vector<16x128xi1>
    %42 = vector.broadcast %cst_20 : f32 to vector<16x128xf32>
    %43 = arith.select %41, %39, %42 : vector<16x128xi1>, vector<16x128xf32>
    %44 = arith.truncf %43 : vector<16x128xf32> to vector<16x128xbf16>
    %c2 = arith.constant 2 : index
    %c0_21 = arith.constant 0 : index
    %c0_22 = arith.constant 0 : index
    %45 = vector.load %arg3[%c2, %c0_21, %c0_22] : memref<3x128x128xbf16, #tpu.memory_space<vmem>>, vector<1x128x128xbf16>
    %46 = vector.shape_cast %45 : vector<1x128x128xbf16> to vector<128x128xbf16>
    %cst_23 = arith.constant dense<0.000000e+00> : vector<16x128xf32>
    %47 = tpu.matmul %44, %46, %cst_23 {dimension_numbers = #tpu.dot_dimension_numbers<[1], [0], [0], [1], [0, 0, 1, 1], [], []>} : vector<16x128xbf16>, vector<128x128xbf16>, vector<16x128xf32> -> vector<16x128xf32>
    %48 = arith.addf %38, %47 : vector<16x128xf32>
    %49 = vector.broadcast %24 : vector<1x128xf32> to vector<16x128xf32>
    %50 = arith.addf %48, %49 : vector<16x128xf32>
    %c0_24 = arith.constant 0 : index
    %c0_25 = arith.constant 0 : index
    %51 = vector.load %arg5[%c0_24, %c0_25] : memref<1x128xf32, #tpu.memory_space<vmem>>, vector<1x128xf32>
    %c0_26 = arith.constant 0 : index
    %c0_27 = arith.constant 0 : index
    %52 = vector.load %arg6[%c0_26, %c0_27] : memref<1x128xf32, #tpu.memory_space<vmem>>, vector<1x128xf32>
    %53 = vector.shape_cast %50 : vector<16x128xf32> to vector<1x16x128xf32>
    %cst_28 = arith.constant dense<0.000000e+00> : vector<1x128xf32>
    %54 = vector.multi_reduction <add>, %53, %cst_28 [1] : vector<1x16x128xf32> to vector<1x128xf32>
    %cst_29 = arith.constant dense<0.000000e+00> : vector<1x8xf32>
    %55 = tpu.matmul %54, %1, %cst_29 {dimension_numbers = #tpu.dot_dimension_numbers<[1], [0], [0], [1], [0, 0, 1, 1], [], []>} : vector<1x128xf32>, vector<128x8xf32>, vector<1x8xf32> -> vector<1x8xf32>
    %cst_30 = arith.constant 3.125000e-02 : f32
    %56 = vector.broadcast %cst_30 : f32 to vector<1x8xf32>
    %57 = arith.mulf %55, %56 : vector<1x8xf32>
    %cst_31 = arith.constant dense<0.000000e+00> : vector<1x128xf32>
    %58 = tpu.matmul %57, %2, %cst_31 {dimension_numbers = #tpu.dot_dimension_numbers<[1], [0], [0], [1], [0, 0, 1, 1], [], []>} : vector<1x8xf32>, vector<8x128xf32>, vector<1x128xf32> -> vector<1x128xf32>
    %59 = vector.shape_cast %58 : vector<1x128xf32> to vector<1x1x128xf32>
    %60 = vector.broadcast %59 : vector<1x1x128xf32> to vector<1x16x128xf32>
    %61 = arith.subf %53, %60 : vector<1x16x128xf32>
    %62 = arith.mulf %61, %61 : vector<1x16x128xf32>
    %cst_32 = arith.constant dense<0.000000e+00> : vector<1x128xf32>
    %63 = vector.multi_reduction <add>, %62, %cst_32 [1] : vector<1x16x128xf32> to vector<1x128xf32>
    %cst_33 = arith.constant dense<0.000000e+00> : vector<1x8xf32>
    %64 = tpu.matmul %63, %1, %cst_33 {dimension_numbers = #tpu.dot_dimension_numbers<[1], [0], [0], [1], [0, 0, 1, 1], [], []>} : vector<1x128xf32>, vector<128x8xf32>, vector<1x8xf32> -> vector<1x8xf32>
    %cst_34 = arith.constant 3.125000e-02 : f32
    %65 = vector.broadcast %cst_34 : f32 to vector<1x8xf32>
    %66 = arith.mulf %64, %65 : vector<1x8xf32>
    %cst_35 = arith.constant dense<0.000000e+00> : vector<1x128xf32>
    %67 = tpu.matmul %66, %2, %cst_35 {dimension_numbers = #tpu.dot_dimension_numbers<[1], [0], [0], [1], [0, 0, 1, 1], [], []>} : vector<1x8xf32>, vector<8x128xf32>, vector<1x128xf32> -> vector<1x128xf32>
    %cst_36 = arith.constant 9.99999974E-6 : f32
    %68 = vector.broadcast %cst_36 : f32 to vector<1x128xf32>
    %69 = arith.addf %67, %68 : vector<1x128xf32>
    %70 = math.rsqrt %69 : vector<1x128xf32>
    %71 = arith.mulf %70, %51 : vector<1x128xf32>
    %72 = vector.shape_cast %71 : vector<1x128xf32> to vector<1x1x128xf32>
    %73 = vector.broadcast %72 : vector<1x1x128xf32> to vector<1x16x128xf32>
    %74 = arith.mulf %61, %73 : vector<1x16x128xf32>
    %75 = vector.shape_cast %52 : vector<1x128xf32> to vector<1x1x128xf32>
    %76 = vector.broadcast %75 : vector<1x1x128xf32> to vector<1x16x128xf32>
    %77 = arith.addf %74, %76 : vector<1x16x128xf32>
    %78 = vector.shape_cast %77 : vector<1x16x128xf32> to vector<16x128xf32>
    %cst_37 = arith.constant 2.000000e+01 : f32
    %79 = vector.broadcast %cst_37 : f32 to vector<16x128xf32>
    %80 = arith.minimumf %78, %79 : vector<16x128xf32>
    %81 = math.exp %80 : vector<16x128xf32>
    %cst_38 = arith.constant 1.000000e+00 : f32
    %82 = vector.broadcast %cst_38 : f32 to vector<16x128xf32>
    %83 = arith.addf %82, %81 : vector<16x128xf32>
    %cst_39 = arith.constant 1.000000e+00 : f32
    %84 = vector.broadcast %cst_39 : f32 to vector<16x128xf32>
    %85 = arith.addf %84, %81 : vector<16x128xf32>
    %86 = arith.mulf %83, %85 : vector<16x128xf32>
    %cst_40 = arith.constant 1.000000e+00 : f32
    %87 = vector.broadcast %cst_40 : f32 to vector<16x128xf32>
    %88 = arith.subf %86, %87 : vector<16x128xf32>
    %89 = arith.mulf %78, %88 : vector<16x128xf32>
    %cst_41 = arith.constant 1.000000e+00 : f32
    %90 = vector.broadcast %cst_41 : f32 to vector<16x128xf32>
    %91 = arith.addf %86, %90 : vector<16x128xf32>
    %92 = tpu.reciprocal %91 {approx = true} : vector<16x128xf32> -> vector<16x128xf32>
    %93 = arith.mulf %89, %92 : vector<16x128xf32>
    %c0_42 = arith.constant 0 : index
    %c0_43 = arith.constant 0 : index
    %c0_44 = arith.constant 0 : index
    %94 = vector.load %arg2[%c0_42, %c0_43, %c0_44] : memref<1x1x128xf32, #tpu.memory_space<vmem>>, vector<1x1x128xf32>
    %95 = vector.shape_cast %94 : vector<1x1x128xf32> to vector<1x128xf32>
    %cst_45 = arith.constant 2.000000e+01 : f32
    %96 = vector.broadcast %cst_45 : f32 to vector<1x128xf32>
    %97 = arith.minimumf %95, %96 : vector<1x128xf32>
    %98 = math.exp %97 : vector<1x128xf32>
    %cst_46 = arith.constant 1.000000e+00 : f32
    %99 = vector.broadcast %cst_46 : f32 to vector<1x128xf32>
    %100 = arith.addf %99, %98 : vector<1x128xf32>
    %cst_47 = arith.constant 1.000000e+00 : f32
    %101 = vector.broadcast %cst_47 : f32 to vector<1x128xf32>
    %102 = arith.addf %101, %98 : vector<1x128xf32>
    %103 = arith.mulf %100, %102 : vector<1x128xf32>
    %cst_48 = arith.constant 1.000000e+00 : f32
    %104 = vector.broadcast %cst_48 : f32 to vector<1x128xf32>
    %105 = arith.subf %103, %104 : vector<1x128xf32>
    %106 = arith.mulf %95, %105 : vector<1x128xf32>
    %cst_49 = arith.constant 1.000000e+00 : f32
    %107 = vector.broadcast %cst_49 : f32 to vector<1x128xf32>
    %108 = arith.addf %103, %107 : vector<1x128xf32>
    %109 = tpu.reciprocal %108 {approx = true} : vector<1x128xf32> -> vector<1x128xf32>
    %110 = arith.mulf %106, %109 : vector<1x128xf32>
    %111 = arith.truncf %110 : vector<1x128xf32> to vector<1x128xbf16>
    %c0_50 = arith.constant 0 : index
    %c0_51 = arith.constant 0 : index
    %112 = vector.load %arg7[%c0_50, %c0_51] : memref<128x128xbf16, #tpu.memory_space<vmem>>, vector<128x128xbf16>
    %cst_52 = arith.constant dense<0.000000e+00> : vector<1x128xf32>
    %113 = tpu.matmul %111, %112, %cst_52 {dimension_numbers = #tpu.dot_dimension_numbers<[1], [0], [0], [1], [0, 0, 1, 1], [], []>} : vector<1x128xbf16>, vector<128x128xbf16>, vector<1x128xf32> -> vector<1x128xf32>
    %c0_53 = arith.constant 0 : index
    %c0_54 = arith.constant 0 : index
    %114 = vector.load %arg8[%c0_53, %c0_54] : memref<1x128xf32, #tpu.memory_space<vmem>>, vector<1x128xf32>
    %115 = arith.addf %113, %114 : vector<1x128xf32>
    %116 = vector.shape_cast %93 : vector<16x128xf32> to vector<1x16x128xf32>
    %117 = vector.shape_cast %115 : vector<1x128xf32> to vector<1x1x128xf32>
    %118 = vector.broadcast %117 : vector<1x1x128xf32> to vector<1x16x128xf32>
    %119 = arith.addf %116, %118 : vector<1x16x128xf32>
    %120 = vector.shape_cast %119 : vector<1x16x128xf32> to vector<16x128xf32>
    %c0_55 = arith.constant 0 : index
    %c0_56 = arith.constant 0 : index
    %121 = vector.load %arg10[%c0_55, %c0_56] : memref<1x128xf32, #tpu.memory_space<vmem>>, vector<1x128xf32>
    %122 = arith.truncf %120 : vector<16x128xf32> to vector<16x128xbf16>
    %c1_57 = arith.constant 1 : index
    %c0_58 = arith.constant 0 : index
    %c0_59 = arith.constant 0 : index
    %123 = vector.load %arg9[%c1_57, %c0_58, %c0_59] : memref<3x128x128xbf16, #tpu.memory_space<vmem>>, vector<1x128x128xbf16>
    %124 = vector.shape_cast %123 : vector<1x128x128xbf16> to vector<128x128xbf16>
    %cst_60 = arith.constant dense<0.000000e+00> : vector<16x128xf32>
    %125 = tpu.matmul %122, %124, %cst_60 {dimension_numbers = #tpu.dot_dimension_numbers<[1], [0], [0], [1], [0, 0, 1, 1], [], []>} : vector<16x128xbf16>, vector<128x128xbf16>, vector<16x128xf32> -> vector<16x128xf32>
    %c1_i32_61 = arith.constant 1 : i32
    %126 = tpu.dynamic_rotate %120 by %c1_i32_61 dim 0 : vector<16x128xf32>, i32 -> vector<16x128xf32>
    %cst_62 = arith.constant 0.000000e+00 : f32
    %127 = vector.shape_cast %21 : vector<16x1xi1> to vector<16x1xi1>
    %128 = vector.broadcast %127 : vector<16x1xi1> to vector<16x128xi1>
    %129 = vector.broadcast %cst_62 : f32 to vector<16x128xf32>
    %130 = arith.select %128, %126, %129 : vector<16x128xi1>, vector<16x128xf32>
    %131 = arith.truncf %130 : vector<16x128xf32> to vector<16x128xbf16>
    %c0_63 = arith.constant 0 : index
    %c0_64 = arith.constant 0 : index
    %c0_65 = arith.constant 0 : index
    %132 = vector.load %arg9[%c0_63, %c0_64, %c0_65] : memref<3x128x128xbf16, #tpu.memory_space<vmem>>, vector<1x128x128xbf16>
    %133 = vector.shape_cast %132 : vector<1x128x128xbf16> to vector<128x128xbf16>
    %cst_66 = arith.constant dense<0.000000e+00> : vector<16x128xf32>
    %134 = tpu.matmul %131, %133, %cst_66 {dimension_numbers = #tpu.dot_dimension_numbers<[1], [0], [0], [1], [0, 0, 1, 1], [], []>} : vector<16x128xbf16>, vector<128x128xbf16>, vector<16x128xf32> -> vector<16x128xf32>
    %135 = arith.addf %125, %134 : vector<16x128xf32>
    %c15_i32_67 = arith.constant 15 : i32
    %136 = tpu.dynamic_rotate %120 by %c15_i32_67 dim 0 : vector<16x128xf32>, i32 -> vector<16x128xf32>
    %cst_68 = arith.constant 0.000000e+00 : f32
    %137 = vector.shape_cast %23 : vector<16x1xi1> to vector<16x1xi1>
    %138 = vector.broadcast %137 : vector<16x1xi1> to vector<16x128xi1>
    %139 = vector.broadcast %cst_68 : f32 to vector<16x128xf32>
    %140 = arith.select %138, %136, %139 : vector<16x128xi1>, vector<16x128xf32>
    %141 = arith.truncf %140 : vector<16x128xf32> to vector<16x128xbf16>
    %c2_69 = arith.constant 2 : index
    %c0_70 = arith.constant 0 : index
    %c0_71 = arith.constant 0 : index
    %142 = vector.load %arg9[%c2_69, %c0_70, %c0_71] : memref<3x128x128xbf16, #tpu.memory_space<vmem>>, vector<1x128x128xbf16>
    %143 = vector.shape_cast %142 : vector<1x128x128xbf16> to vector<128x128xbf16>
    %cst_72 = arith.constant dense<0.000000e+00> : vector<16x128xf32>
    %144 = tpu.matmul %141, %143, %cst_72 {dimension_numbers = #tpu.dot_dimension_numbers<[1], [0], [0], [1], [0, 0, 1, 1], [], []>} : vector<16x128xbf16>, vector<128x128xbf16>, vector<16x128xf32> -> vector<16x128xf32>
    %145 = arith.addf %135, %144 : vector<16x128xf32>
    %146 = vector.broadcast %121 : vector<1x128xf32> to vector<16x128xf32>
    %147 = arith.addf %145, %146 : vector<16x128xf32>
    %c0_73 = arith.constant 0 : index
    %c0_74 = arith.constant 0 : index
    %148 = vector.load %arg11[%c0_73, %c0_74] : memref<1x128xf32, #tpu.memory_space<vmem>>, vector<1x128xf32>
    %c0_75 = arith.constant 0 : index
    %c0_76 = arith.constant 0 : index
    %149 = vector.load %arg12[%c0_75, %c0_76] : memref<1x128xf32, #tpu.memory_space<vmem>>, vector<1x128xf32>
    %150 = vector.shape_cast %147 : vector<16x128xf32> to vector<1x16x128xf32>
    %cst_77 = arith.constant dense<0.000000e+00> : vector<1x128xf32>
    %151 = vector.multi_reduction <add>, %150, %cst_77 [1] : vector<1x16x128xf32> to vector<1x128xf32>
    %cst_78 = arith.constant dense<0.000000e+00> : vector<1x8xf32>
    %152 = tpu.matmul %151, %1, %cst_78 {dimension_numbers = #tpu.dot_dimension_numbers<[1], [0], [0], [1], [0, 0, 1, 1], [], []>} : vector<1x128xf32>, vector<128x8xf32>, vector<1x8xf32> -> vector<1x8xf32>
    %cst_79 = arith.constant 3.125000e-02 : f32
    %153 = vector.broadcast %cst_79 : f32 to vector<1x8xf32>
    %154 = arith.mulf %152, %153 : vector<1x8xf32>
    %cst_80 = arith.constant dense<0.000000e+00> : vector<1x128xf32>
    %155 = tpu.matmul %154, %2, %cst_80 {dimension_numbers = #tpu.dot_dimension_numbers<[1], [0], [0], [1], [0, 0, 1, 1], [], []>} : vector<1x8xf32>, vector<8x128xf32>, vector<1x128xf32> -> vector<1x128xf32>
    %156 = vector.shape_cast %155 : vector<1x128xf32> to vector<1x1x128xf32>
    %157 = vector.broadcast %156 : vector<1x1x128xf32> to vector<1x16x128xf32>
    %158 = arith.subf %150, %157 : vector<1x16x128xf32>
    %159 = arith.mulf %158, %158 : vector<1x16x128xf32>
    %cst_81 = arith.constant dense<0.000000e+00> : vector<1x128xf32>
    %160 = vector.multi_reduction <add>, %159, %cst_81 [1] : vector<1x16x128xf32> to vector<1x128xf32>
    %cst_82 = arith.constant dense<0.000000e+00> : vector<1x8xf32>
    %161 = tpu.matmul %160, %1, %cst_82 {dimension_numbers = #tpu.dot_dimension_numbers<[1], [0], [0], [1], [0, 0, 1, 1], [], []>} : vector<1x128xf32>, vector<128x8xf32>, vector<1x8xf32> -> vector<1x8xf32>
    %cst_83 = arith.constant 3.125000e-02 : f32
    %162 = vector.broadcast %cst_83 : f32 to vector<1x8xf32>
    %163 = arith.mulf %161, %162 : vector<1x8xf32>
    %cst_84 = arith.constant dense<0.000000e+00> : vector<1x128xf32>
    %164 = tpu.matmul %163, %2, %cst_84 {dimension_numbers = #tpu.dot_dimension_numbers<[1], [0], [0], [1], [0, 0, 1, 1], [], []>} : vector<1x8xf32>, vector<8x128xf32>, vector<1x128xf32> -> vector<1x128xf32>
    %cst_85 = arith.constant 9.99999974E-6 : f32
    %165 = vector.broadcast %cst_85 : f32 to vector<1x128xf32>
    %166 = arith.addf %164, %165 : vector<1x128xf32>
    %167 = math.rsqrt %166 : vector<1x128xf32>
    %168 = arith.mulf %167, %148 : vector<1x128xf32>
    %169 = vector.shape_cast %168 : vector<1x128xf32> to vector<1x1x128xf32>
    %170 = vector.broadcast %169 : vector<1x1x128xf32> to vector<1x16x128xf32>
    %171 = arith.mulf %158, %170 : vector<1x16x128xf32>
    %172 = vector.shape_cast %149 : vector<1x128xf32> to vector<1x1x128xf32>
    %173 = vector.broadcast %172 : vector<1x1x128xf32> to vector<1x16x128xf32>
    %174 = arith.addf %171, %173 : vector<1x16x128xf32>
    %175 = vector.shape_cast %174 : vector<1x16x128xf32> to vector<16x128xf32>
    %cst_86 = arith.constant 2.000000e+01 : f32
    %176 = vector.broadcast %cst_86 : f32 to vector<16x128xf32>
    %177 = arith.minimumf %175, %176 : vector<16x128xf32>
    %178 = math.exp %177 : vector<16x128xf32>
    %cst_87 = arith.constant 1.000000e+00 : f32
    %179 = vector.broadcast %cst_87 : f32 to vector<16x128xf32>
    %180 = arith.addf %179, %178 : vector<16x128xf32>
    %cst_88 = arith.constant 1.000000e+00 : f32
    %181 = vector.broadcast %cst_88 : f32 to vector<16x128xf32>
    %182 = arith.addf %181, %178 : vector<16x128xf32>
    %183 = arith.mulf %180, %182 : vector<16x128xf32>
    %cst_89 = arith.constant 1.000000e+00 : f32
    %184 = vector.broadcast %cst_89 : f32 to vector<16x128xf32>
    %185 = arith.subf %183, %184 : vector<16x128xf32>
    %186 = arith.mulf %175, %185 : vector<16x128xf32>
    %cst_90 = arith.constant 1.000000e+00 : f32
    %187 = vector.broadcast %cst_90 : f32 to vector<16x128xf32>
    %188 = arith.addf %183, %187 : vector<16x128xf32>
    %189 = tpu.reciprocal %188 {approx = true} : vector<16x128xf32> -> vector<16x128xf32>
    %190 = arith.mulf %186, %189 : vector<16x128xf32>
    %191 = arith.truncf %0 : vector<16x128xf32> to vector<16x128xbf16>
    %c0_91 = arith.constant 0 : index
    %c0_92 = arith.constant 0 : index
    %192 = vector.load %arg15[%c0_91, %c0_92] : memref<128x128xbf16, #tpu.memory_space<vmem>>, vector<128x128xbf16>
    %cst_93 = arith.constant dense<0.000000e+00> : vector<16x128xf32>
    %193 = tpu.matmul %191, %192, %cst_93 {dimension_numbers = #tpu.dot_dimension_numbers<[1], [0], [0], [1], [0, 0, 1, 1], [], []>} : vector<16x128xbf16>, vector<128x128xbf16>, vector<16x128xf32> -> vector<16x128xf32>
    %c0_94 = arith.constant 0 : index
    %c0_95 = arith.constant 0 : index
    %194 = vector.load %arg16[%c0_94, %c0_95] : memref<1x128xf32, #tpu.memory_space<vmem>>, vector<1x128xf32>
    %195 = vector.broadcast %194 : vector<1x128xf32> to vector<16x128xf32>
    %196 = arith.addf %193, %195 : vector<16x128xf32>
    %197 = arith.addf %190, %196 : vector<16x128xf32>
    %c0_96 = arith.constant 0 : index
    %c0_97 = arith.constant 0 : index
    %198 = vector.load %arg17[%c0_96, %c0_97] : memref<16x128xf32, #tpu.memory_space<vmem>>, vector<16x128xf32>
    tpu.vector_store %arg17[%c0_96, %c0_97], %197 {strides = array<i32>} : memref<16x128xf32, #tpu.memory_space<vmem>>, vector<16x128xf32>,
    return
  }
  func.func @transform_0(%arg0: i32) -> (i32, i32) {
    %c0_i32 = arith.constant 0 : i32
    %c0_i32_0 = arith.constant 0 : i32
    return %arg0, %c0_i32 : i32, i32
  }
  func.func @transform_1(%arg0: i32) -> (i32, i32, i32) {
    %c0_i32 = arith.constant 0 : i32
    %c0_i32_0 = arith.constant 0 : i32
    %c0_i32_1 = arith.constant 0 : i32
    return %arg0, %c0_i32, %c0_i32_0 : i32, i32, i32
  }
  func.func @transform_2(%arg0: i32) -> (i32, i32, i32) {
    %c0_i32 = arith.constant 0 : i32
    %c0_i32_0 = arith.constant 0 : i32
    %c0_i32_1 = arith.constant 0 : i32
    %c0_i32_2 = arith.constant 0 : i32
    return %c0_i32, %c0_i32_0, %c0_i32_1 : i32, i32, i32
  }
  func.func @transform_3(%arg0: i32) -> (i32, i32) {
    %c0_i32 = arith.constant 0 : i32
    %c0_i32_0 = arith.constant 0 : i32
    %c0_i32_1 = arith.constant 0 : i32
    return %c0_i32, %c0_i32_0 : i32, i32
  }
  func.func @transform_4(%arg0: i32) -> (i32, i32) {
    %c0_i32 = arith.constant 0 : i32
    %c0_i32_0 = arith.constant 0 : i32
    %c0_i32_1 = arith.constant 0 : i32
    return %c0_i32, %c0_i32_0 : i32, i32
  }
  func.func @transform_5(%arg0: i32) -> (i32, i32) {
    %c0_i32 = arith.constant 0 : i32
    %c0_i32_0 = arith.constant 0 : i32
    %c0_i32_1 = arith.constant 0 : i32
    return %c0_i32, %c0_i32_0 : i32, i32
  }
  func.func @transform_6(%arg0: i32) -> (i32, i32) {
    %c0_i32 = arith.constant 0 : i32
    %c0_i32_0 = arith.constant 0 : i32
    %c0_i32_1 = arith.constant 0 : i32
    return %c0_i32, %c0_i32_0 : i32, i32
  }
  func.func @transform_7(%arg0: i32) -> (i32, i32) {
    %c0_i32 = arith.constant 0 : i32
    %c0_i32_0 = arith.constant 0 : i32
    %c0_i32_1 = arith.constant 0 : i32
    return %c0_i32, %c0_i32_0 : i32, i32
  }
  func.func @transform_8(%arg0: i32) -> (i32, i32, i32) {
    %c0_i32 = arith.constant 0 : i32
    %c0_i32_0 = arith.constant 0 : i32
    %c0_i32_1 = arith.constant 0 : i32
    %c0_i32_2 = arith.constant 0 : i32
    return %c0_i32, %c0_i32_0, %c0_i32_1 : i32, i32, i32
  }
  func.func @transform_9(%arg0: i32) -> (i32, i32) {
    %c0_i32 = arith.constant 0 : i32
    %c0_i32_0 = arith.constant 0 : i32
    %c0_i32_1 = arith.constant 0 : i32
    return %c0_i32, %c0_i32_0 : i32, i32
  }
  func.func @transform_10(%arg0: i32) -> (i32, i32) {
    %c0_i32 = arith.constant 0 : i32
    %c0_i32_0 = arith.constant 0 : i32
    %c0_i32_1 = arith.constant 0 : i32
    return %c0_i32, %c0_i32_0 : i32, i32
  }
  func.func @transform_11(%arg0: i32) -> (i32, i32) {
    %c0_i32 = arith.constant 0 : i32
    %c0_i32_0 = arith.constant 0 : i32
    %c0_i32_1 = arith.constant 0 : i32
    return %c0_i32, %c0_i32_0 : i32, i32
  }
  func.func @transform_12(%arg0: i32) -> (i32, i32) {
    %c0_i32 = arith.constant 0 : i32
    %c0_i32_0 = arith.constant 0 : i32
    %c0_i32_1 = arith.constant 0 : i32
    return %c0_i32, %c0_i32_0 : i32, i32
  }
  func.func @transform_13(%arg0: i32) -> (i32, i32) {
    %c0_i32 = arith.constant 0 : i32
    %c0_i32_0 = arith.constant 0 : i32
    %c0_i32_1 = arith.constant 0 : i32
    return %c0_i32, %c0_i32_0 : i32, i32
  }
  func.func @transform_14(%arg0: i32) -> (i32, i32) {
    %c0_i32 = arith.constant 0 : i32
    %c0_i32_0 = arith.constant 0 : i32
    %c0_i32_1 = arith.constant 0 : i32
    return %c0_i32, %c0_i32_0 : i32, i32
  }
  func.func @transform_15(%arg0: i32) -> (i32, i32) {
    %c0_i32 = arith.constant 0 : i32
    %c0_i32_0 = arith.constant 0 : i32
    %c0_i32_1 = arith.constant 0 : i32
    return %c0_i32, %c0_i32_0 : i32, i32
  }
  func.func @transform_16(%arg0: i32) -> (i32, i32) {
    %c0_i32 = arith.constant 0 : i32
    %c0_i32_0 = arith.constant 0 : i32
    return %arg0, %c0_i32 : i32, i32
  }
}

</mosaic_0001>

<bundles_post_ra>
// kernel: tpu_custom_call.1
= control target key start
LH: loop header
LB: loop body
LE: loop exit
PB: predicated region body
PF: predicated region fallthrough
CT: control target
= control target key end

     0   :  { %s3331_s0 = inlined_call_operand.hbm [shape: f32[32,128], index: 0, kind: input, shape index: {}]   ;;  %s3332_s1 = inlined_call_operand.hbm [shape: f32[2,1,128], index: 1, kind: input, shape index: {}]   ;;  %s3333_s2 = inlined_call_operand.hbm [shape: bf16[3,128,128], index: 2, kind: input, shape index: {}]   ;;  %s3334_s3 = inlined_call_operand.vmem [shape: f32[1,128], index: 3, kind: input, shape index: {}]   ;;  %s3335_s4 = inlined_call_operand.vmem [shape: f32[1,128], index: 4, kind: input, shape index: {}]   ;;  %s3336_s5 = inlined_call_operand.vmem [shape: f32[1,128], index: 5, kind: input, shape index: {}]   ;;  %s3337_s6 = inlined_call_operand.vmem [shape: bf16[128,128], index: 6, kind: input, shape index: {}]   ;;  %s3338_s7 = inlined_call_operand.hbm [shape: f32[1,128], index: 7, kind: input, shape index: {}]   ;;  %s3339_s8 = inlined_call_operand.hbm [shape: bf16[3,128,128], index: 8, kind: input, shape index: {}]   ;;  %s3340_s9 = inlined_call_operand.hbm [shape: f32[1,128], index: 9, kind: input, shape index: {}]   ;;  %s3341_s10 = inlined_call_operand.hbm [shape: f32[1,128], index: 10, kind: input, shape index: {}]   ;;  %s3342_s11 = inlined_call_operand.hbm [shape: f32[1,128], index: 11, kind: input, shape index: {}]   ;;  %s3343_s12 = inlined_call_operand.vmem [shape: f32[128,8], index: 12, kind: input, shape index: {}]   ;;  %s3344_s13 = inlined_call_operand.vmem [shape: f32[8,128], index: 13, kind: input, shape index: {}]   ;;  %s3345_s14 = inlined_call_operand.vmem [shape: bf16[128,128], index: 14, kind: input, shape index: {}]   ;;  %s3346_s15 = inlined_call_operand.vmem [shape: f32[1,128], index: 15, kind: input, shape index: {}]   ;;  %s3347_s16 = inlined_call_operand.hbm [shape: f32[32,128], index: 16, kind: output, shape index: {}]  }
   0x1   :  { %3355 = sst [smem:[#allocation28_spill]] %s3331_s0 }
   0x2   :  { %3356 = sst [smem:[#allocation29_spill]] %s3333_s2 }
   0x3   :  { %3357 = sst [smem:[#allocation30_spill]] %s3335_s4 }
   0x4   :  { %3358 = sst [smem:[#allocation31_spill]] %s3336_s5 }
   0x5   :  { %3359 = sst [smem:[#allocation32_spill]] %s3338_s7 }
   0x6   :  { %3360 = sst [smem:[#allocation33_spill]] %s3339_s8 }
   0x7   :  { %3361 = sst [smem:[#allocation34_spill]] %s3340_s9 }
   0x8   :  { %3362 = sst [smem:[#allocation35_spill]] %s3341_s10 }
   0x9   :  { %3363 = sst [smem:[#allocation36_spill]] %s3342_s11 }
   0xa   :  { %3364 = sst [smem:[#allocation37_spill]] %s3345_s14 }
   0xb   :  { %3365 = sst [smem:[#allocation38_spill]] %s3346_s15 }
   0xc   :  { %3366 = sst [smem:[#allocation39_spill]] %s3347_s16 }
   0xd   :  { %21 = vsyncpa [#allocation3], 0 }
   0xe   :  { %23 = vsyncpa [#allocation3 + $0x1], 0 }
   0xf   :  { %24 = vsyncpa [#allocation6], 0 }
  0x10   :  { %26 = vsyncpa [#allocation6 + $0x1], 0 }
  0x11   :  { %27 = vsyncpa [#allocation9], 0 }
  0x12   :  { %28 = vsyncpa [#allocation12], 0 }
  0x13   :  { %29 = vsyncpa [#allocation15], 0 }
  0x14   :  { %30 = vsyncpa [#allocation4], 0 }
  0x15   :  { %32 = vsyncpa [#allocation4 + $0x1], 0  ;;  %s2832_s21 = smov 0   ;;  %s2834_s22 = smov 0  }
  0x16   :  { %s2836_s23 = smov 0   ;;  %s2838_s24 = smov 0  }
  0x17 LB: > { %3367 = sst [smem:[#allocation24_spill]] %s2728_s23  ;;  %s2856_s28 = sadd.s32 4294967295, %s2732_s24   ;;  %s2732_s24 = sphi %s2838_s24, %s3396_s24   ;;  %s2728_s23 = sphi %s2836_s23, %s3398_s23   ;;  %s2724_s22 = sphi %s2834_s22, %s3400_s22   ;;  %s2720_s21 = sphi %s2832_s21, %s3399_s21  }
  0x18   : > { %s3368_s2 = sld [smem:[#allocation29_spill]]  ;;  %p1890_p0 = scmp.ge.s32.totalorder %s2732_s24, 1 }
  0x19   : > { %p59_p1 = scmp.eq.s32.totalorder %s2856_s28, 0  ;;  %p415_p2 = scmp.lt.s32.totalorder %s2732_s24, 3 }
  0x1a   : > { %s2734_s30 = smov [#allocation7]   ;;  %s3370_s7 = sld [smem:[#allocation32_spill]] }
  0x1b   : > { %p2861_p3 = pnand %p1890_p0, %p415_p2  ;;  %s428_s0 = sshll.u32 %s2734_s30, 4  ;;  %s429_s0 = int_to_ptr.vmem [resolvable:$true] %s428_s0 }
  0x1c   : > { %s3372_s9 = sld [smem:[#allocation34_spill]]  ;;  %s2736_s15 = smov 64  }
  0x1d   : > { %p2288_p4 = pneg %p2861_p3  ;;  %s2737_s14 = smov 4  }
  0x1e   : > { %s426_s27 = sshll.u32 %s3368_s2, 4  ;;  %s2735_s2 = smov [#allocation8]   ;;  %s427_s27 = int_to_ptr.hbm [resolvable:$true] %s426_s27 }
  0x1f   : > { %p2873_p6 = pnand %p2288_p4, %p59_p1  ;;  %s455_s16 = sshll.u32 %s2735_s2, 4  ;;  %s456_s16 = int_to_ptr.vmem [resolvable:$true] %s455_s16 }
  0x20   : > { %s453_s19 = sshll.u32 %s3370_s7, 4  ;;  %s3373_s8 = sld [smem:[#allocation33_spill]]  ;;  %s454_s19 = int_to_ptr.hbm [resolvable:$true] %s453_s19 }
  0x21   : > { %2291 = dma.hbm_to_vmem [thread:$0]  (!%p2873_p6), %s427_s27, 3072, %s429_s0, [#allocation6], %s2736_s15, %s2736_s15, %s2737_s14  }
  0x22   : > { %s479_s30 = sshll.u32 %s3372_s9, 4  ;;  %s2738_s5 = smov [#allocation11]   ;;  %s480_s30 = int_to_ptr.hbm [resolvable:$true] %s479_s30 }
  0x23   : > { %2294 = dma.hbm_to_vmem [thread:$0]  (!%p2873_p6), %s454_s19, 16, %s456_s16, [#allocation9]  }
  0x24   : > { %s481_s4 = sshll.u32 %s2738_s5, 4  ;;  %s2739_s2 = smov [#allocation10]   ;;  %s482_s4 = int_to_ptr.vmem [resolvable:$true] %s481_s4 }
  0x25   : > { %2300 = dma.hbm_to_vmem [thread:$0]  (!%p2873_p6), %s480_s30, 16, %s482_s4, [#allocation12]  }
  0x26   : > { %s464_s7 = sshll.u32 %s3373_s8, 4  ;;  %s466_s25 = sshll.u32 %s2739_s2, 4  ;;  %s465_s7 = int_to_ptr.hbm [resolvable:$true] %s464_s7  ;;  %s467_s25 = int_to_ptr.vmem [resolvable:$true] %s466_s25 }
  0x27   : > { %s3374_s10 = sld [smem:[#allocation35_spill]]  ;;  %s2740_s26 = smov [#allocation13]  }
  0x28   : > { %2297 = dma.hbm_to_vmem [thread:$0]  (!%p2873_p6), %s465_s7, 3072, %s467_s25, [#allocation9], %s2736_s15, %s2736_s15, %s2737_s14  }
  0x29   : > { %s3375_s11 = sld [smem:[#allocation36_spill]]  ;;  %s493_s30 = sshll.u32 %s2740_s26, 4  ;;  %s494_s30 = int_to_ptr.vmem [resolvable:$true] %s493_s30 }
  0x2a   : > { %s2741_s17 = smov [#allocation14]   ;;  %s1889_s14 = sadd.s32 4294967294, %s2732_s24  }
  0x2b   : > { %s505_s7 = sshll.u32 %s2741_s17, 4  ;;  %s2903_s15 = sadd.s32 1, %s2732_s24   ;;  %s506_s7 = int_to_ptr.vmem [resolvable:$true] %s505_s7 }
  0x2c   : > { %3376 = sst [smem:[#allocation25_spill]] %s2903_s15  ;;  %s42_s18 = ssub.s32 %s2732_s24, %s2903_s15 }
  0x2d   : > { %s491_s16 = sshll.u32 %s3374_s10, 4  ;;  %s45_s2 = sadd.s32 1, %s2728_s23  ;;  %s492_s16 = int_to_ptr.hbm [resolvable:$true] %s491_s16 }
  0x2e   : > { %2303 = dma.hbm_to_vmem [thread:$0]  (!%p2873_p6), %s492_s16, 16, %s494_s30, [#allocation12]  }
  0x2f   : > { %s503_s4 = sshll.u32 %s3375_s11, 4  ;;  %p43_p7 = scmp.eq.s32.totalorder %s42_s18, 0  ;;  %s504_s4 = int_to_ptr.hbm [resolvable:$true] %s503_s4 }
  0x30   : > { %2306 = dma.hbm_to_vmem [thread:$0]  (!%p2873_p6), %s504_s4, 16, %s506_s7, [#allocation15]  }
  0x31   : > { %p52_p8 = scmp.ne.s32.totalorder %s2728_s23, %s2724_s22  ;;  %p53_p9 = scmp.eq.s32.totalorder %s2732_s24, 0 }
  0x32   : > { %p58_p10 = scmp.ne.s32.totalorder %s2724_s22, %s2720_s21  ;;  %p402_p13 = scmp.eq.s32.totalorder %s2856_s28, 1 }
  0x33   : > { %s2914_s25 = scalar_select %p43_p7, %s2728_s23, %s45_s2  }
  0x34   : > { %p2916_p11 = por %p53_p9, %p52_p8  ;;  %p2922_p12 = por %p59_p1, %p58_p10 }
  0x35   : > { %3377 = sst [smem:[#allocation26_spill]] %s2914_s25  ;;  %p408_p0 = scmp.eq.s32.totalorder %s1889_s14, 1 }
  0x36   : > { %p2324_p2 = scmp.lt.s32.totalorder %s2732_s24, 2  ;;  %s2929_s0 = sand.u32 1, %s2728_s23  }
  0x37   : > { %p2931_p4 = por %p402_p13, %p52_p8  ;;  %p2935_p6 = por %p408_p0, %p58_p10 }
  0x38   : > { %s1898_s19 = sshll.u32 %s2929_s0, 4  ;;  %s2192_s4 = sshll.u32 %s2732_s24, 4 }
  0x39   : > { %s3381_s5 = scalar_select %p2935_p6, 1, 0 }
  0x3a   : > { %s3383_s17 = sld [smem:[#allocation28_spill]]  ;;  %s532_s14 = scalar_lea.vmem [#allocation2], %s1898_s19 }
  0x3b   : > { %3382 = sst [smem:[#allocation27_spill]] %s3381_s5  ;;  %s540_s18 = sshll.u32 %s532_s14, 4  ;;  %s541_s18 = int_to_ptr.vmem [resolvable:$true] %s540_s18 }
  0x3c   : > { %p2946_p7 = pnand %p2324_p2, %p2916_p11  ;;  %s550_s9 = sand.u32 1, %s2732_s24  }
  0x3d   : > { %s529_s10 = scalar_lea.sflag [#allocation3], %s2929_s0 }
  0x3e   : > { %p2590_p9 = pneg %p2946_p7 }
  0x40   : > { %s537_s7 = scalar_lea.hbm %s3383_s17, %s2192_s4  ;;  %s2593_s4 = scalar_lea.hbm %s3383_s17, 32 }
  0x41   : > { %s538_s2 = sshll.u32 %s537_s7, 4  ;;  %s539_s2 = int_to_ptr.hbm [resolvable:$true] %s538_s2 }
  0x42   : > { %s2586_s11 = sshra.s32 %s539_s2, 4  ;;  %s2587_s11 = int_to_ptr.hbm [resolvable:$true] %s2586_s11 }
  0x43   : > { %s2588_s25 = scalar_lea.hbm %s2587_s11, 16  ;;  %p2594_p11 = scmp.lt.s32.totalorder %s2587_s11, %s3383_s17 }
  0x44   : > { %p2589_p8 = scmp.ne.s32.totalorder %s2587_s11, %s2588_s25  ;;  %p2595_p0 = scmp.lt.s32.totalorder %s2593_s4, %s2588_s25 }
  0x46   : > { %p2591_p10 = pnand %p2590_p9, %p2589_p8  ;;  %p2596_p2 = por %p2595_p0, %p2594_p11 }
  0x48   : > { %p2592_p13 = pneg %p2591_p10 }
  0x4a   : > { %p2597_p5 = pnand %p2596_p2, %p2592_p13 }
  0x4c   : > { %2600 = shalt.err (!%p2597_p5)
}
  0x4d   : > { %s2742_s7 = smov 128   ;;  %s2743_s14 = smov 8  }
  0x4e   : > { %2310 = dma.hbm_to_vmem [thread:$0]  (!%p2946_p7), %s539_s2, 256, %s541_s18, %s529_s10, %s2742_s7, %s2742_s7, %s2743_s14  }
  0x4f   : > { %s556_s19 = scalar_lea.hbm %s3332_s1, %s2732_s24  ;;  %s553_s27 = scalar_lea.vmem [#allocation5], %s2929_s0 }
  0x50   : > { %s560_s5 = sshll.u32 %s553_s27, 4  ;;  %s558_s26 = sshll.u32 %s556_s19, 4  ;;  %s561_s5 = int_to_ptr.vmem [resolvable:$true] %s560_s5  ;;  %s559_s26 = int_to_ptr.hbm [resolvable:$true] %s558_s26 }
  0x51   : > { %s551_s11 = scalar_lea.sflag [#allocation6], %s550_s9  ;;  %s2616_s25 = sshra.s32 %s559_s26, 4  ;;  %s2617_s25 = int_to_ptr.hbm [resolvable:$true] %s2616_s25 }
  0x52   : > { %s2618_s4 = scalar_lea.hbm %s2617_s25, 1  ;;  %s2623_s18 = scalar_lea.hbm %s3332_s1, 2 }
  0x53   : > { %p2619_p5 = scmp.ne.s32.totalorder %s2617_s25, %s2618_s4  ;;  %p2624_p13 = scmp.lt.s32.totalorder %s2617_s25, %s3332_s1 }
  0x54   : > { %p2625_p11 = scmp.lt.s32.totalorder %s2623_s18, %s2618_s4 }
  0x55   : > { %p2621_p8 = pnand %p2619_p5, %p2590_p9 }
  0x56   : > { %p2626_p0 = por %p2625_p11, %p2624_p13 }
  0x57   : > { %p2622_p10 = pneg %p2621_p8 }
  0x59   : > { %p2627_p2 = pnand %p2626_p0, %p2622_p10 }
  0x5b   : > { %2630 = shalt.err (!%p2627_p2)
}
  0x5c   : > { %2313 = dma.hbm_to_vmem [thread:$0]  (!%p2946_p7), %s559_s26, 16, %s561_s5, %s551_s11  }
  0x5d   : > { %569 = sbr.rel (%p2861_p3) target bundleno = 1695 (0x69f), region = 84  ;;  %s2984_s9 = sand.u32 (!%p2861_p3), 1, %s2724_s22  }
  0x5e   : > { %s1902_s0 = sshll.u32 (!%p2861_p3), %s2984_s9, 4  ;;  %s572_s2 = scalar_lea.sflag (!%p2861_p3), [#allocation3], %s2984_s9 }
  0x5f   : > { %s2990_s7 = scalar_lea.vmem (!%p2861_p3), [#allocation2], %s1902_s0 }
  0x62   : > { %2691 = dma.done.wait (%p2922_p12), %s572_s2, 256  }
  0x63   : > { %2693 = vsyncadd (%p2922_p12), %s572_s2, 4294967040  ;;  %s581_s8 = sand.u32 1, %s2856_s28   ;;  %s584_s5 = scalar_lea.vmem [#allocation5], %s2984_s9 }
  0x64   : > { %s582_s29 = scalar_lea.sflag [#allocation6], %s581_s8 }
  0x65   : > { %2695 = dma.done.wait (%p2922_p12), %s582_s29, 16  }
  0x66   : > { %2697 = vsyncadd (%p2922_p12), %s582_s29, 4294967280 }
  0x67   : > { %2699 = dma.done.wait (%p59_p1), [#allocation6], 3072  }
  0x68   : > { %2701 = vsyncadd (%p59_p1), [#allocation6], 4294964224 }
  0x69   : > { %2703 = dma.done.wait (%p59_p1), [#allocation9], 3088  }
  0x6a   : > { %2705 = vsyncadd (%p59_p1), [#allocation9], 4294964208 }
  0x6b   : > { %2707 = dma.done.wait (%p59_p1), [#allocation12], 32  }
  0x6c   : > { %2709 = vsyncadd (%p59_p1), [#allocation12], 4294967264 }
  0x6d   : > { %2711 = dma.done.wait (%p59_p1), [#allocation15], 16  }
  0x6e   : > { %2713 = vsyncadd (%p59_p1), [#allocation15], 4294967280  ;;  %v2208_v0 = vld [vmem:[#allocation7 + $0x38] sm:$0xff]  ;;  %v2207_v2 = vld [vmem:[#allocation7 + $0x30] sm:$0xff]  ;;  %v689_v10 = vlaneseq  ;;  %vm2744_vm2 = vmmov 1   ;;  %vm1019_vm7 = vcmask 64512  }
  0x6f   : > { %v2200_v1 = vld [vmem:[#allocation7 + $0x78] sm:$0xff]  ;;  %815 = vmatpush.bf16.msra.mxu2 %v2208_v0  ;;  %v2199_v3 = vld [vmem:[#allocation7 + $0x70] sm:$0xff]  ;;  %v2206_v4 = vld [vmem:[#allocation7 + $0x28] sm:$0xff]  ;;  %s3389_s19 = sld [smem:[#allocation30_spill]]  ;;  %s667_s2 = scalar_lea.vmem [#allocation16], %s1902_s0 }
  0x70   : > { %877 = vmatpush.bf16.msra.mxu1 %v2200_v1  ;;  %v2198_v5 = vld [vmem:[#allocation7 + $0x68] sm:$0xff]  ;;  %v2205_v6 = vld [vmem:[#allocation7 + $0x20] sm:$0xff]  ;;  %v2204_v8 = vld [vmem:[#allocation7 + $0x18] sm:$0xff]  ;;  %v3020_v15 = vshrl.u32 %v689_v10, 7  ;;  %s3390_s11 = sld [smem:[#allocation31_spill]]  ;;  %s1725_s8 = scalar_lea.sflag [#allocation4], %s2984_s9 }
  0x71   : > { %v2197_v7 = vld [vmem:[#allocation7 + $0x60] sm:$0xff]  ;;  %v2196_v9 = vld [vmem:[#allocation7 + $0x58] sm:$0xff]  ;;  %v2203_v11 = vld [vmem:[#allocation7 + $0x10] sm:$0xff]  ;;  %s3391_s30 = sld [smem:[#allocation37_spill]] }
  0x72   : > { %v2195_v12 = vld [vmem:[#allocation7 + $0x50] sm:$0xff]  ;;  %v2202_v16 = vld [vmem:[#allocation7 + $0x8] sm:$0xff]  ;;  %v696_v20 = vand.u32 15, %v3020_v15  ;;  %vm741_vm0 = vcmp.lt.s32.totalorder %v3020_v15, 1  ;;  %v2201_v21 = vld [vmem:[#allocation7] sm:$0xff]  ;;  %v691_v34 = vadd.s32 8, %v3020_v15 }
  0x73   : > { %816 = vmatpush.bf16.msra.mxu2 %v2207_v2  ;;  %v670_v13 = vld [vmem:[%s2990_s7] sm:$0xff]  ;;  %v671_v14 = vld [vmem:[%s2990_s7 + $0x8] sm:$0xff]  ;;  %vm893_vm4 = vcmp.lt.s32.totalorder %v3020_v15, 7  ;;  %s3392_s10 = sld [smem:[#allocation38_spill]]  ;;  %s1737_s7 = sshll.u32 %s667_s2, 4  ;;  %s1738_s7 = int_to_ptr.vmem [resolvable:$true] %s1737_s7 }
  0x74   : > { %878 = vmatpush.bf16.msra.mxu1 %v2199_v3  ;;  %v739_v17 = vrot.slane %v670_v13, 7  ;;  %v740_v18 = vrot.slane %v671_v14, 7  ;;  %v2194_v19 = vld [vmem:[#allocation7 + $0x48] sm:$0xff]  ;;  %v2216_v24 = vld [vmem:[#allocation7 + $0xb8] sm:$0xff]  ;;  %vm716_vm1 = vcmp.ge.s32.totalorder %v696_v20, 1  ;;  %v2193_v25 = vld [vmem:[#allocation7 + $0x40] sm:$0xff]  ;;  %v3033_v28 = vpack.c.bf16 %v671_v14, %v670_v13 }
  0x75   : > { %vm3029_vm3 = vmpackc.low %vm2744_vm2, %vm716_vm1  ;;  %v2215_v29 = vld [vmem:[#allocation7 + $0xb0] sm:$0xff]  ;;  %v2214_v30 = vld [vmem:[#allocation7 + $0xa8] sm:$0xff]  ;;  %v891_v36 = vrot.slane %v670_v13, 1  ;;  %v892_v37 = vrot.slane %v671_v14, 1  ;;  %v703_v38 = vand.u32 15, %v691_v34 }
  0x76   : > { %v742_v22 = vsel %vm741_vm0, %v739_v17, %v740_v18  ;;  %v743_v23 = vsel %vm741_vm0, %v740_v18, %v739_v17  ;;  %v2213_v31 = vld [vmem:[#allocation7 + $0xa0] sm:$0xff]  ;;  %v2212_v32 = vld [vmem:[#allocation7 + $0x98] sm:$0xff]  ;;  %v2211_v33 = vld [vmem:[#allocation7 + $0x90] sm:$0xff] }
  0x77   : > { %817 = vmatpush.bf16.msra.mxu2 %v2206_v4  ;;  %v1943_v26 = vpack.c.bf16 %v742_v22, %v743_v23  ;;  %v2210_v35 = vld [vmem:[#allocation7 + $0x88] sm:$0xff]  ;;  %v2209_v39 = vld [vmem:[#allocation7 + $0x80] sm:$0xff]  ;;  %v894_v40 = vsel %vm893_vm4, %v891_v36, %v892_v37  ;;  %v895_v41 = vsel %vm893_vm4, %v892_v37, %v891_v36  ;;  %vm719_vm5 = vcmp.lt.s32.totalorder %v703_v38, 15  ;;  %v3054_v44 = vld [vmem:[%s3343_s12 + $0x78] sm:$0xff] }
  0x78   : > { %879 = vmatpush.bf16.msra.mxu1 %v2198_v5  ;;  %v2010_v42 = vpack.c.bf16 %v895_v41, %v894_v40  ;;  %vm3045_vm6 = vmpackc.low %vm719_vm5, %vm2744_vm2  ;;  %v3059_v45 = vld [vmem:[%s3343_s12 + $0x70] sm:$0xff]  ;;  %998 = vmatpush.msra.mxu3 %v3054_v44  ;;  %v3066_v46 = vld [vmem:[%s3343_s12 + $0x68] sm:$0xff] }
  0x79   : > { %v3072_v47 = vld [vmem:[%s3343_s12 + $0x60] sm:$0xff]  ;;  %v3078_v48 = vld [vmem:[%s3343_s12 + $0x58] sm:$0xff]  ;;  %v3083_v49 = vld [vmem:[%s3343_s12 + $0x50] sm:$0xff] }
  0x7a   : > { %999 = vmatpush.msra.mxu3 %v3059_v45  ;;  %v3090_v50 = vld [vmem:[%s3343_s12 + $0x48] sm:$0xff]  ;;  %v3096_v51 = vld [vmem:[%s3343_s12 + $0x40] sm:$0xff]  ;;  %v3102_v52 = vld [vmem:[%s3343_s12 + $0x38] sm:$0xff] }
  0x7b   : > { %818 = vmatpush.bf16.msra.mxu2 %v2205_v6  ;;  %v3108_v53 = vld [vmem:[%s3343_s12 + $0x30] sm:$0xff]  ;;  %v3114_v55 = vld [vmem:[%s3343_s12 + $0x28] sm:$0xff]  ;;  %v3119_v56 = vld [vmem:[%s3343_s12 + $0x20] sm:$0xff] }
  0x7c   : > { %880 = vmatpush.bf16.msra.mxu1 %v2197_v7  ;;  %1000 = vmatpush.msra.mxu3 %v3066_v46  ;;  %v3125_v57 = vld [vmem:[%s3343_s12 + $0x18] sm:$0xff]  ;;  %v3131_v58 = vld [vmem:[%s3343_s12 + $0x10] sm:$0xff]  ;;  %v3137_v59 = vld [vmem:[%s3343_s12 + $0x8] sm:$0xff] }
  0x7d   : > { %v3143_v60 = vld [vmem:[%s3343_s12] sm:$0xff]  ;;  %v2223_v36 = vld [vmem:[%s3337_s6 + $0x30] sm:$0xff]  ;;  %v2222_v40 = vld [vmem:[%s3337_s6 + $0x28] sm:$0xff] }
  0x7e   : > { %1001 = vmatpush.msra.mxu3 %v3072_v47  ;;  %v2377_v4 = vld [vmem:[%s3334_s3] ss:$0 sm:$0xff] }
  0x7f   : > { %819 = vmatpush.bf16.msra.mxu2 %v2204_v8  ;;  %v3153_v17 = vld [vmem:[%s3344_s13] sm:$0xff] }
  0x80   : > { %881 = vmatpush.bf16.msra.mxu1 %v2196_v9  ;;  %1002 = vmatpush.msra.mxu3 %v3078_v48  ;;  %v1138_v37 = vld [vmem:[%s584_s5] sm:$0x1]  ;;  %s3393_s5 = sld [smem:[#allocation39_spill]] }
  0x81   : > { %1038 = vmatpush.msra.mxu0 %v3153_v17  ;;  %v1139_v38 = vmin.f32 %v1138_v37, 20.0  ;;  %v2221_v41 = vld [vmem:[%s3337_s6 + $0x20] sm:$0xff] }
  0x82   : > { %1003 = vmatpush.msra.mxu3 %v3083_v49 }
  0x83   : > { %820 = vmatpush.bf16.msra.mxu2 %v2203_v11  ;;  %1055 = vmatpush.msrb.mxu0 %v3054_v44 }
  0x84   : > { %882 = vmatpush.bf16.msra.mxu1 %v2195_v12  ;;  %1004 = vmatpush.msra.mxu3 %v3090_v50 }
  0x85   : > { %1056 = vmatpush.msrb.mxu0 %v3059_v45 }
  0x86   : > { %1005 = vmatpush.msra.mxu3 %v3096_v51 }
  0x87   : > { %821 = vmatpush.bf16.msra.mxu2 %v2202_v16  ;;  %1057 = vmatpush.msrb.mxu0 %v3066_v46 }
  0x88   : > { %883 = vmatpush.bf16.msra.mxu1 %v2194_v19  ;;  %1006 = vmatpush.msra.mxu3 %v3102_v52 }
  0x89   : > { %1058 = vmatpush.msrb.mxu0 %v3072_v47 }
  0x8a   : > { %1007 = vmatpush.msra.mxu3 %v3108_v53 }
  0x8b   : > { %822 = vmatpush.bf16.msra.mxu2 %v2201_v21  ;;  %1059 = vmatpush.msrb.mxu0 %v3078_v48 }
  0x8c   : > { %884 = vmatpush.bf16.msra.mxu1 %v2193_v25  ;;  %1008 = vmatpush.msra.mxu3 %v3114_v55 }
  0x8d   : > { %1060 = vmatpush.msrb.mxu0 %v3083_v49 }
  0x8e   : > { %1944 = vmatmul.msk.bf16.vlgmr.msra.gmra.mxu2 %vm3029_vm3, %v1943_v26  ;;  %1009 = vmatpush.msra.mxu3 %v3119_v56 }
  0x8f   : > { %968 = vmatpush.bf16.msrb.mxu2 %v2216_v24  ;;  %885 = vmatmul.bf16.vlgmr.msra.gmra.mxu1 %v3033_v28 }
  0x90   : > { %1010 = vmatpush.msra.mxu3 %v3125_v57  ;;  %1094 = vmatpush.msrb.mxu1 %v3153_v17 }
  0x91   : > { %1061 = vmatpush.msrb.mxu0 %v3090_v50 }
  0x92   : > { %1011 = vmatpush.msra.mxu3 %v3131_v58 }
  0x93   : > { %969 = vmatpush.bf16.msrb.mxu2 %v2215_v29  ;;  %1062 = vmatpush.msrb.mxu0 %v3096_v51 }
  0x94   : > { %1012 = vmatpush.msra.mxu3 %v3137_v59 }
  0x95   : > { %1063 = vmatpush.msrb.mxu0 %v3102_v52 }
  0x96   : > { %1013 = vmatpush.msra.mxu3 %v3143_v60 }
  0x97   : > { %970 = vmatpush.bf16.msrb.mxu2 %v2214_v30  ;;  %1064 = vmatpush.msrb.mxu0 %v3108_v53 }
  0x99   : > { %1065 = vmatpush.msrb.mxu0 %v3114_v55 }
  0x9b   : > { %971 = vmatpush.bf16.msrb.mxu2 %v2213_v31  ;;  %1066 = vmatpush.msrb.mxu0 %v3119_v56 }
  0x9d   : > { %1067 = vmatpush.msrb.mxu0 %v3125_v57 }
  0x9f   : > { %972 = vmatpush.bf16.msrb.mxu2 %v2212_v32  ;;  %1068 = vmatpush.msrb.mxu0 %v3131_v58 }
  0xa1   : > { %1069 = vmatpush.msrb.mxu0 %v3137_v59 }
  0xa3   : > { %973 = vmatpush.bf16.msrb.mxu2 %v2211_v33  ;;  %1070 = vmatpush.msrb.mxu0 %v3143_v60 }
  0xa7   : > { %974 = vmatpush.bf16.msrb.mxu2 %v2210_v35  ;;  %v2224_v35 = vld [vmem:[%s3337_s6 + $0x38] sm:$0xff] }
  0xab   : > { %975 = vmatpush.bf16.msrb.mxu2 %v2209_v39  ;;  %v1140_v39 = vmul.f32 1.442695, %v1139_v38  ;;  %v2227_v38 = vld [vmem:[#allocation10 + $0x50] sm:$0xff] }
  0xad   : > { %2382 = vpow2.f32 %v1140_v39 }
  0xae   : > { %2011 = vmatmul.msk.bf16.vlgmr.msrb.gmra.mxu2 %vm3045_vm6, %v2010_v42 }
  0xaf   : > { %1215 = vmatpush.bf16.msra.mxu2 %v2224_v35 }
  0xb3   : > { %1216 = vmatpush.bf16.msra.mxu2 %v2223_v36  ;;  %v2383_v42 = vpop.eup %2382  ;;  %v2236_v36 = vld [vmem:[#allocation10 + $0x18] sm:$0xff] }
  0xb7   : > { %1217 = vmatpush.bf16.msra.mxu2 %v2222_v40  ;;  %v989_v40 = vld [vmem:[%s3389_s19] sm:$0x1]  ;;  %s2666_s19 = scalar_lea.hbm %s3393_s5, 32 }
  0xbb   : > { %1218 = vmatpush.bf16.msra.mxu2 %v2221_v41 }
 0x10c   : > { %v886_v62 = vpop.f32.mrf.mxu1 }
 0x111   : > { %v824_v54 = vpop.f32.mrf.mxu2 }
 0x112   : > { %v887_v1 = vadd.f32 %v886_v62, %v824_v54  ;;  %v2220_v54 = vld [vmem:[%s3337_s6 + $0x18] sm:$0xff] }
 0x113   : > { %1219 = vmatpush.bf16.msra.mxu2 %v2220_v54  ;;  %v2243_v54 = vld [vmem:[#allocation10 + $0x90] sm:$0xff] }
 0x114   : > { %v888_v0 = vpop.f32.mrf.mxu1 }
 0x119   : > { %v826_v61 = vpop.f32.mrf.mxu2 }
 0x11a   : > { %v889_v2 = vadd.f32 %v888_v0, %v826_v61  ;;  %v1142_v61 = vadd.f32 1.0, %v2383_v42  ;;  %v2235_v42 = vld [vmem:[#allocation10 + $0x10] sm:$0xff] }
 0x11c   : > { %v1143_v62 = vmul.f32 %v1142_v61, %v1142_v61 }
 0x11e   : > { %v1146_v0 = vadd.f32 1.0, %v1143_v62 }
 0x120   : > { %2384 = vrcp.f32 %v1146_v0 }
 0x131   : > { %v977_v63 = vpop.f32.mrf.mxu2 }
 0x132   : > { %v982_v3 = vadd.f32 %v977_v63, %v887_v1  ;;  %v2219_v63 = vld [vmem:[%s3337_s6 + $0x10] sm:$0xff]  ;;  %v2016_v1 = vadd.f32 -1.0, %v1143_v62 }
 0x133   : > { %1220 = vmatpush.bf16.msra.mxu2 %v2219_v63  ;;  %v2226_v62 = vld [vmem:[#allocation10 + $0x48] sm:$0xff] }
 0x134   : > { %v987_v7 = vadd.f32 %v2377_v4, %v982_v3  ;;  %v1145_v3 = vmul.f32 %v2016_v1, %v1138_v37  ;;  %v2244_v37 = vld [vmem:[#allocation10 + $0x98] sm:$0xff]  ;;  %v2234_v1 = vld [vmem:[#allocation10 + $0x8] sm:$0xff] }
 0x139   : > { %v979_v5 = vpop.f32.mrf.mxu2 }
 0x13a   : > { %v983_v6 = vadd.f32 %v979_v5, %v889_v2  ;;  %v2218_v2 = vld [vmem:[%s3337_s6 + $0x8] sm:$0xff]  ;;  %v2217_v5 = vld [vmem:[%s3337_s6] sm:$0xff] }
 0x13b   : > { %1221 = vmatpush.bf16.msra.mxu2 %v2218_v2  ;;  %v2242_v2 = vld [vmem:[#allocation10 + $0x88] sm:$0xff] }
 0x13c   : > { %v988_v8 = vadd.f32 %v2377_v4, %v983_v6  ;;  %v2385_v4 = vpop.eup %2384 }
 0x13d   : > { %v1148_v6 = vmul.f32 %v2385_v4, %v1145_v3  ;;  %v2378_v4 = vld [vmem:[%s3390_s11] ss:$0 sm:$0xff]  ;;  %s2257_s11 = sshll.u32 %s2856_s28, 4 }
 0x13e   : > { %v991_v9 = vadd.f32 %v988_v8, %v987_v7  ;;  %s1736_s15 = scalar_lea.hbm %s3393_s5, %s2257_s11 }
 0x13f   : > { %1222 = vmatpush.bf16.msra.mxu2 %v2217_v5  ;;  %v2225_v5 = vld [vmem:[#allocation10 + $0x40] sm:$0xff]  ;;  %s1739_s28 = sshll.u32 %s1736_s15, 4  ;;  %s1740_s28 = int_to_ptr.hbm [resolvable:$true] %s1739_s28 }
 0x140   : > { %v992_v10 = vrot.slane %v991_v9, 4  ;;  %s2660_s0 = sshra.s32 %s1740_s28, 4  ;;  %s2661_s0 = int_to_ptr.hbm [resolvable:$true] %s2660_s0 }
 0x141   : > { %s2662_s29 = scalar_lea.hbm %s2661_s0, 16  ;;  %p2667_p7 = scmp.lt.s32.totalorder %s2661_s0, %s3393_s5 }
 0x142   : > { %v993_v11 = vadd.f32 %v992_v10, %v991_v9  ;;  %v2232_v10 = vld [vmem:[#allocation10 + $0x78] sm:$0xff]  ;;  %p2663_p1 = scmp.ne.s32.totalorder %s2661_s0, %s2662_s29  ;;  %p2668_p9 = scmp.lt.s32.totalorder %s2666_s19, %s2662_s29 }
 0x143   : > { %1383 = vmatpush.bf16.msra.mxu1 %v2232_v10 }
 0x144   : > { %v994_v12 = vrot.slane %v993_v11, 2  ;;  %p2664_p3 = pnand %p2663_p1, %p2931_p4  ;;  %p2669_p5 = por %p2668_p9, %p2667_p7 }
 0x146   : > { %v995_v13 = vadd.f32 %v994_v12, %v993_v11  ;;  %v2240_v11 = vld [vmem:[#allocation10 + $0x38] sm:$0xff]  ;;  %p2665_p12 = pneg %p2664_p3 }
 0x147   : > { %v2248_v12 = vld [vmem:[#allocation10 + $0xb8] sm:$0xff]  ;;  %1321 = vmatpush.bf16.msrb.mxu3 %v2240_v11 }
 0x148   : > { %v996_v14 = vrot.slane %v995_v13, 1  ;;  %p2670_p8 = pnand %p2669_p5, %p2665_p12 }
 0x14a   : > { %v997_v16 = vadd.f32 %v996_v14, %v995_v13  ;;  %v2231_v13 = vld [vmem:[#allocation10 + $0x70] sm:$0xff] }
 0x14b   : > { %v2239_v14 = vld [vmem:[#allocation10 + $0x30] sm:$0xff]  ;;  %1384 = vmatpush.bf16.msra.mxu1 %v2231_v13 }
 0x14c   : > { %1014 = vmatmul.f32.vlgmr.msra.gmra.mxu3 %v997_v16  ;;  %v2247_v16 = vld [vmem:[#allocation10 + $0xb0] sm:$0xff] }
 0x14d   : > { %1322 = vmatpush.bf16.msrb.mxu3 %v2239_v14 }
 0x1cf   : > { %v1015_v18 = vpop.f32.mrf.mxu3 }
 0x1d0   : > { %v1018_v19 = vmul.f32 0.03125, %v1015_v18  ;;  %v2230_v18 = vld [vmem:[#allocation10 + $0x68] sm:$0xff] }
 0x1d1   : > { %1385 = vmatpush.bf16.msra.mxu1 %v2230_v18  ;;  %v1166_v18 = vld [vmem:[#allocation8] sm:$0x1] }
 0x1d2   : > { %2012 = vmatmul.msk.f32.vlgmr.msra.gmra.mxu0 %vm1019_vm7, %v1018_v19  ;;  %v2238_v19 = vld [vmem:[#allocation10 + $0x28] sm:$0xff] }
 0x1d3   : > { %1469 = vmatpush.bf16.msra.mxu0 %v2248_v12  ;;  %1323 = vmatpush.bf16.msrb.mxu3 %v2238_v19 }
 0x1d7   : > { %1470 = vmatpush.bf16.msra.mxu0 %v2247_v16 }
 0x24f   : > { %v1040_v20 = vpop.f32.mrf.mxu0 }
 0x250   : > { %v1043_v21 = vperm.slane %v1040_v20, 0  ;;  %v2246_v20 = vld [vmem:[#allocation10 + $0xa8] sm:$0xff] }
 0x251   : > { %1471 = vmatpush.bf16.msra.mxu0 %v2246_v20 }
 0x252   : > { %v3174_v22 = vsub.f32 %v987_v7, %v1043_v21  ;;  %v3176_v23 = vsub.f32 %v988_v8, %v1043_v21  ;;  %v1149_v8 = vpack.c.bf16 %v1148_v6, %v1148_v6 }
 0x254   : > { %v1046_v24 = vmul.f32 %v3174_v22, %v3174_v22  ;;  %v1047_v25 = vmul.f32 %v3176_v23, %v3176_v23  ;;  %1223 = vmatmul.bf16.vlgmr.msra.gmra.mxu2 %v1149_v8  ;;  %v2233_v8 = vld [vmem:[#allocation10] sm:$0xff] }
 0x256   : > { %v1048_v26 = vadd.f32 %v1047_v25, %v1046_v24  ;;  %v2229_v25 = vld [vmem:[#allocation10 + $0x60] sm:$0xff] }
 0x257   : > { %1386 = vmatpush.bf16.msra.mxu1 %v2229_v25 }
 0x258   : > { %v1049_v29 = vrot.slane %v1048_v26, 4 }
 0x25a   : > { %v1050_v30 = vadd.f32 %v1049_v29, %v1048_v26 }
 0x25c   : > { %v1051_v31 = vrot.slane %v1050_v30, 2 }
 0x25e   : > { %v1052_v32 = vadd.f32 %v1051_v31, %v1050_v30  ;;  %v2237_v30 = vld [vmem:[#allocation10 + $0x20] sm:$0xff] }
 0x25f   : > { %v2245_v31 = vld [vmem:[#allocation10 + $0xa0] sm:$0xff]  ;;  %1324 = vmatpush.bf16.msrb.mxu3 %v2237_v30 }
 0x260   : > { %v1053_v33 = vrot.slane %v1052_v32, 1  ;;  %1472 = vmatpush.bf16.msra.mxu0 %v2245_v31 }
 0x262   : > { %v1054_v34 = vadd.f32 %v1053_v33, %v1052_v32  ;;  %v2228_v33 = vld [vmem:[#allocation10 + $0x58] sm:$0xff] }
 0x263   : > { %1387 = vmatpush.bf16.msra.mxu1 %v2228_v33  ;;  %1325 = vmatpush.bf16.msrb.mxu3 %v2236_v36 }
 0x264   : > { %1071 = vmatmul.f32.vlgmr.msrb.gmra.mxu0 %v1054_v34 }
 0x265   : > { %1473 = vmatpush.bf16.msra.mxu0 %v2244_v37 }
 0x267   : > { %1388 = vmatpush.bf16.msra.mxu1 %v2227_v38  ;;  %1326 = vmatpush.bf16.msrb.mxu3 %v2235_v42 }
 0x269   : > { %1474 = vmatpush.bf16.msra.mxu0 %v2243_v54  ;;  %v2379_v54 = vld [vmem:[#allocation11] ss:$0 sm:$0xff] }
 0x26b   : > { %1389 = vmatpush.bf16.msra.mxu1 %v2226_v62  ;;  %1327 = vmatpush.bf16.msrb.mxu3 %v2234_v1 }
 0x26d   : > { %1475 = vmatpush.bf16.msra.mxu0 %v2242_v2 }
 0x26f   : > { %1390 = vmatpush.bf16.msra.mxu1 %v2225_v5  ;;  %1328 = vmatpush.bf16.msrb.mxu3 %v2233_v8 }
 0x273   : > { %1499 = vmatpush.msra.mxu3 %v3054_v44 }
 0x275   : > { %1500 = vmatpush.msra.mxu3 %v3059_v45 }
 0x277   : > { %1501 = vmatpush.msra.mxu3 %v3066_v46 }
 0x279   : > { %1502 = vmatpush.msra.mxu3 %v3072_v47 }
 0x27b   : > { %1503 = vmatpush.msra.mxu3 %v3078_v48 }
 0x27d   : > { %1504 = vmatpush.msra.mxu3 %v3083_v49 }
 0x27f   : > { %1505 = vmatpush.msra.mxu3 %v3090_v50 }
 0x281   : > { %1506 = vmatpush.msra.mxu3 %v3096_v51 }
 0x283   : > { %1507 = vmatpush.msra.mxu3 %v3102_v52 }
 0x285   : > { %1508 = vmatpush.msra.mxu3 %v3108_v53 }
 0x287   : > { %1509 = vmatpush.msra.mxu3 %v3114_v55 }
 0x289   : > { %1510 = vmatpush.msra.mxu3 %v3119_v56 }
 0x28b   : > { %1511 = vmatpush.msra.mxu3 %v3125_v57 }
 0x28d   : > { %1512 = vmatpush.msra.mxu3 %v3131_v58 }
 0x28f   : > { %1513 = vmatpush.msra.mxu3 %v3137_v59 }
 0x291   : > { %1514 = vmatpush.msra.mxu3 %v3143_v60 }
 0x2d7   : > { %v3209_v32 = vpop.f32.mrf.mxu2 }
 0x2df   : > { %v1226_v61 = vpop.f32.mrf.mxu2 }
 0x2e1   : > { %v1072_v7 = vpop.f32.mrf.mxu0 }
 0x2e2   : > { %v1075_v9 = vmul.f32 0.03125, %v1072_v7 }
 0x2e4   : > { %2013 = vmatmul.msk.f32.vlgmr.msrb.gmra.mxu1 %vm1019_vm7, %v1075_v9  ;;  %v2241_v9 = vld [vmem:[#allocation10 + $0x80] sm:$0xff] }
 0x2e5   : > { %1555 = vmatpush.msrb.mxu1 %v3054_v44  ;;  %1476 = vmatpush.bf16.msra.mxu0 %v2241_v9 }
 0x2e7   : > { %1556 = vmatpush.msrb.mxu1 %v3059_v45 }
 0x2e9   : > { %1557 = vmatpush.msrb.mxu1 %v3066_v46 }
 0x2eb   : > { %1558 = vmatpush.msrb.mxu1 %v3072_v47 }
 0x2ed   : > { %1559 = vmatpush.msrb.mxu1 %v3078_v48 }
 0x2ef   : > { %1560 = vmatpush.msrb.mxu1 %v3083_v49 }
 0x2f1   : > { %1561 = vmatpush.msrb.mxu1 %v3090_v50  ;;  %v1225_v50 = vadd.f32 %v3209_v32, %v1166_v18  ;;  %v2253_v18 = vld [vmem:[%s3391_s30 + $0x20] sm:$0xff] }
 0x2f3   : > { %1562 = vmatpush.msrb.mxu1 %v3096_v51 }
 0x2f5   : > { %1563 = vmatpush.msrb.mxu1 %v3102_v52 }
 0x2f7   : > { %1564 = vmatpush.msrb.mxu1 %v3108_v53 }
 0x2f9   : > { %1565 = vmatpush.msrb.mxu1 %v3114_v55 }
 0x2fb   : > { %1566 = vmatpush.msrb.mxu1 %v3119_v56 }
 0x2fd   : > { %1567 = vmatpush.msrb.mxu1 %v3125_v57 }
 0x2ff   : > { %1568 = vmatpush.msrb.mxu1 %v3131_v58 }
 0x301   : > { %1569 = vmatpush.msrb.mxu1 %v3137_v59 }
 0x303   : > { %1570 = vmatpush.msrb.mxu1 %v3143_v60 }
 0x361   : > { %v1096_v21 = vpop.f32.mrf.mxu1 }
 0x362   : > { %v1097_v24 = vadd.f32 1e-05, %v1096_v21  ;;  %v1228_v21 = vperm.slane %v1225_v50, 0  ;;  %v2250_v50 = vld [vmem:[%s3391_s30 + $0x8] sm:$0xff] }
 0x364   : > { %2386 = vrsqrt.f32 %v1097_v24  ;;  %vm1105_vm9 = vweird.f32 %v1097_v24 }
 0x36a   : > { %v2387_v26 = vpop.eup %2386 }
 0x36b   : > { %v1100_v29 = vmul.f32 %v2387_v26, %v1097_v24  ;;  %vm1106_vm8 = vweird.f32 %v2387_v26 }
 0x36c   : > { %vm1107_vm10 = vmor %vm1105_vm9, %vm1106_vm8 }
 0x36d   : > { %v1101_v34 = vmul.f32 %v2387_v26, %v1100_v29 }
 0x36f   : > { %v1102_v35 = vmul.f32 0.5, %v1101_v34 }
 0x371   : > { %v1103_v39 = vsub.f32 1.5, %v1102_v35 }
 0x373   : > { %v1104_v41 = vmul.f32 %v2387_v26, %v1103_v39 }
 0x375   : > { %v1108_v63 = vsel %vm1107_vm10, %v2387_v26, %v1104_v41 }
 0x376   : > { %v1109_v0 = vmul.f32 %v1108_v63, %v989_v40 }
 0x378   : > { %v1110_v3 = vperm.slane %v1109_v0, 0 }
 0x37a   : > { %v1111_v6 = vmul.f32 %v1110_v3, %v3174_v22  ;;  %v1112_v7 = vmul.f32 %v1110_v3, %v3176_v23 }
 0x37c   : > { %v1116_v10 = vadd.f32 %v2378_v4, %v1111_v6  ;;  %v1117_v11 = vadd.f32 %v2378_v4, %v1112_v7 }
 0x37e   : > { %v1118_v12 = vmin.f32 %v1116_v10, 20.0  ;;  %v1119_v13 = vmin.f32 %v1117_v11, 20.0 }
 0x380   : > { %v1120_v14 = vmul.f32 1.442695, %v1118_v12  ;;  %v1122_v16 = vmul.f32 1.442695, %v1119_v13 }
 0x382   : > { %2388 = vpow2.f32 %v1120_v14 }
 0x383   : > { %2390 = vpow2.f32 %v1122_v16 }
 0x388   : > { %v2389_v44 = vpop.eup %2388 }
 0x389   : > { %v2391_v45 = vpop.eup %2390  ;;  %v1124_v22 = vadd.f32 1.0, %v2389_v44 }
 0x38a   : > { %v1125_v23 = vadd.f32 1.0, %v2391_v45 }
 0x38b   : > { %v1126_v46 = vmul.f32 %v1124_v22, %v1124_v22 }
 0x38c   : > { %v1127_v47 = vmul.f32 %v1125_v23, %v1125_v23 }
 0x38d   : > { %v1132_v48 = vadd.f32 1.0, %v1126_v46  ;;  %v2014_v49 = vadd.f32 -1.0, %v1126_v46 }
 0x38e   : > { %v1133_v19 = vadd.f32 1.0, %v1127_v47  ;;  %v2015_v20 = vadd.f32 -1.0, %v1127_v47  ;;  %v2255_v47 = vld [vmem:[%s3391_s30 + $0x30] sm:$0xff] }
 0x38f   : > { %2392 = vrcp.f32 %v1132_v48  ;;  %v1130_v51 = vmul.f32 %v2014_v49, %v1116_v10  ;;  %v2254_v48 = vld [vmem:[%s3391_s30 + $0x28] sm:$0xff]  ;;  %v2251_v49 = vld [vmem:[%s3391_s30 + $0x10] sm:$0xff] }
 0x390   : > { %2394 = vrcp.f32 %v1133_v19  ;;  %v1131_v24 = vmul.f32 %v2015_v20, %v1117_v11  ;;  %v2252_v19 = vld [vmem:[%s3391_s30 + $0x18] sm:$0xff]  ;;  %v2249_v20 = vld [vmem:[%s3391_s30] sm:$0xff] }
 0x395   : > { %v2393_v52 = vpop.eup %2392 }
 0x396   : > { %v2395_v25 = vpop.eup %2394  ;;  %v1136_v26 = vmul.f32 %v2393_v52, %v1130_v51 }
 0x397   : > { %v1137_v53 = vmul.f32 %v2395_v25, %v1131_v24 }
 0x398   : > { %v1229_v29 = vadd.f32 %v1228_v21, %v1136_v26 }
 0x399   : > { %v1230_v55 = vadd.f32 %v1228_v21, %v1137_v53 }
 0x39a   : > { %v1250_v30 = vrot.slane %v1229_v29, 7  ;;  %v1397_v31 = vrot.slane %v1229_v29, 1 }
 0x39b   : > { %v1251_v56 = vrot.slane %v1230_v55, 7  ;;  %v1398_v32 = vrot.slane %v1230_v55, 1  ;;  %v1232_v33 = vpack.c.bf16 %v1230_v55, %v1229_v29 }
 0x39d   : > { %v1399_v57 = vsel %vm893_vm4, %v1397_v31, %v1398_v32  ;;  %v1400_v58 = vsel %vm893_vm4, %v1398_v32, %v1397_v31  ;;  %1391 = vmatmul.bf16.vlgmr.msra.gmra.mxu1 %v1232_v33  ;;  %v1252_v34 = vsel %vm741_vm0, %v1250_v30, %v1251_v56  ;;  %v1253_v59 = vsel %vm741_vm0, %v1251_v56, %v1250_v30  ;;  %v1490_v30 = vld [vmem:[#allocation13] sm:$0x1] }
 0x39e   : > { %v2082_v35 = vpack.c.bf16 %v1252_v34, %v1253_v59  ;;  %v2149_v36 = vpack.c.bf16 %v1400_v58, %v1399_v57  ;;  %v2380_v57 = vld [vmem:[#allocation14] ss:$0 sm:$0xff] }
 0x3a0   : > { %2083 = vmatmul.msk.bf16.vlgmr.msrb.gmra.mxu3 %vm3029_vm3, %v2082_v35  ;;  %2150 = vmatmul.msk.bf16.vlgmr.msra.gmra.mxu0 %vm3045_vm6, %v2149_v36 }
 0x3a1   : > { %1538 = vmatpush.msrb.mxu3 %v3153_v17 }
 0x41a   : > { %v1392_v60 = vpop.f32.mrf.mxu1 }
 0x41d   : > { %v1478_v37 = vpop.f32.mrf.mxu0 }
 0x422   : > { %v1394_v40 = vpop.f32.mrf.mxu1 }
 0x423   : > { %v1330_v38 = vpop.f32.mrf.mxu3 }
 0x424   : > { %v1393_v39 = vadd.f32 %v1392_v60, %v1330_v38 }
 0x425   : > { %v1480_v61 = vpop.f32.mrf.mxu0 }
 0x426   : > { %v1483_v42 = vadd.f32 %v1478_v37, %v1393_v39 }
 0x428   : > { %v1488_v63 = vadd.f32 %v2379_v54, %v1483_v42 }
 0x42b   : > { %v1332_v41 = vpop.f32.mrf.mxu3 }
 0x42c   : > { %v1395_v15 = vadd.f32 %v1394_v40, %v1332_v41 }
 0x42e   : > { %v1484_v62 = vadd.f32 %v1480_v61, %v1395_v15 }
 0x430   : > { %v1489_v0 = vadd.f32 %v2379_v54, %v1484_v62 }
 0x432   : > { %v1492_v27 = vadd.f32 %v1489_v0, %v1488_v63 }
 0x434   : > { %v1493_v1 = vrot.slane %v1492_v27, 4 }
 0x436   : > { %v1494_v2 = vadd.f32 %v1493_v1, %v1492_v27  ;;  %v2381_v27 = vld [vmem:[%s3392_s10] ss:$0 sm:$0xff] }
 0x438   : > { %v1495_v43 = vrot.slane %v1494_v2, 2 }
 0x43a   : > { %v1496_v3 = vadd.f32 %v1495_v43, %v1494_v2 }
 0x43c   : > { %v1497_v4 = vrot.slane %v1496_v3, 1 }
 0x43e   : > { %v1498_v5 = vadd.f32 %v1497_v4, %v1496_v3 }
 0x440   : > { %1515 = vmatmul.f32.vlgmr.msra.gmra.mxu3 %v1498_v5 }
 0x441   : > { %1594 = vmatpush.msra.mxu3 %v3153_v17  ;;  %v2256_v17 = vld [vmem:[%s3391_s30 + $0x38] sm:$0xff] }
 0x442   : > { %1706 = vmatpush.bf16.msrb.mxu0 %v2256_v17 }
 0x446   : > { %1707 = vmatpush.bf16.msrb.mxu0 %v2255_v47 }
 0x44a   : > { %1708 = vmatpush.bf16.msrb.mxu0 %v2254_v48 }
 0x44e   : > { %1709 = vmatpush.bf16.msrb.mxu0 %v2253_v18 }
 0x452   : > { %1710 = vmatpush.bf16.msrb.mxu0 %v2252_v19 }
 0x456   : > { %1711 = vmatpush.bf16.msrb.mxu0 %v2251_v49 }
 0x45a   : > { %1712 = vmatpush.bf16.msrb.mxu0 %v2250_v50 }
 0x45e   : > { %1713 = vmatpush.bf16.msrb.mxu0 %v2249_v20 }
 0x461   : > { %1714 = vmatmul.bf16.vlgmr.msrb.gmra.mxu0 %v3033_v28 }
 0x4c3   : > { %v1516_v6 = vpop.f32.mrf.mxu3 }
 0x4c4   : > { %v1519_v7 = vmul.f32 0.03125, %v1516_v6 }
 0x4c6   : > { %2151 = vmatmul.msk.f32.vlgmr.msrb.gmra.mxu3 %vm1019_vm7, %v1519_v7 }
 0x4de   : > { %v1715_v41 = vpop.f32.mrf.mxu0 }
 0x4df   : > { %v1716_v6 = vadd.f32 %v2381_v27, %v1715_v41 }
 0x4e6   : > { %v1717_v2 = vpop.f32.mrf.mxu0 }
 0x549   : > { %v1540_v8 = vpop.f32.mrf.mxu3 }
 0x54a   : > { %v1543_v9 = vperm.slane %v1540_v8, 0  ;;  %v1718_v8 = vadd.f32 %v2381_v27, %v1717_v2 }
 0x54c   : > { %v1544_v10 = vsub.f32 %v1488_v63, %v1543_v9  ;;  %v1545_v11 = vsub.f32 %v1489_v0, %v1543_v9 }
 0x54e   : > { %v1546_v12 = vmul.f32 %v1544_v10, %v1544_v10  ;;  %v1547_v13 = vmul.f32 %v1545_v11, %v1545_v11 }
 0x550   : > { %v1548_v14 = vadd.f32 %v1547_v13, %v1546_v12 }
 0x552   : > { %v1549_v16 = vrot.slane %v1548_v14, 4 }
 0x554   : > { %v1550_v44 = vadd.f32 %v1549_v16, %v1548_v14 }
 0x556   : > { %v1551_v45 = vrot.slane %v1550_v44, 2 }
 0x558   : > { %v1552_v22 = vadd.f32 %v1551_v45, %v1550_v44 }
 0x55a   : > { %v1553_v23 = vrot.slane %v1552_v22, 1 }
 0x55c   : > { %v1554_v46 = vadd.f32 %v1553_v23, %v1552_v22 }
 0x55e   : > { %1571 = vmatmul.f32.vlgmr.msrb.gmra.mxu1 %v1554_v46 }
 0x5db   : > { %v1572_v51 = vpop.f32.mrf.mxu1 }
 0x5dc   : > { %v1575_v21 = vmul.f32 0.03125, %v1572_v51 }
 0x5de   : > { %2152 = vmatmul.msk.f32.vlgmr.msra.gmra.mxu3 %vm1019_vm7, %v1575_v21 }
 0x661   : > { %v1596_v52 = vpop.f32.mrf.mxu3 }
 0x662   : > { %v1597_v24 = vadd.f32 1e-05, %v1596_v52 }
 0x664   : > { %2396 = vrsqrt.f32 %v1597_v24  ;;  %vm1605_vm12 = vweird.f32 %v1597_v24 }
 0x66a   : > { %v2397_v25 = vpop.eup %2396 }
 0x66b   : > { %v1600_v26 = vmul.f32 %v2397_v25, %v1597_v24  ;;  %vm1606_vm11 = vweird.f32 %v2397_v25 }
 0x66c   : > { %vm1607_vm13 = vmor %vm1605_vm12, %vm1606_vm11 }
 0x66d   : > { %v1601_v53 = vmul.f32 %v2397_v25, %v1600_v26 }
 0x66f   : > { %v1602_v29 = vmul.f32 0.5, %v1601_v53 }
 0x671   : > { %v1603_v55 = vsub.f32 1.5, %v1602_v29 }
 0x673   : > { %v1604_v31 = vmul.f32 %v2397_v25, %v1603_v55 }
 0x675   : > { %v1608_v56 = vsel %vm1607_vm13, %v2397_v25, %v1604_v31 }
 0x676   : > { %v1609_v32 = vmul.f32 %v1608_v56, %v1490_v30 }
 0x678   : > { %v1610_v33 = vperm.slane %v1609_v32, 0 }
 0x67a   : > { %v1611_v58 = vmul.f32 %v1610_v33, %v1544_v10  ;;  %v1612_v34 = vmul.f32 %v1610_v33, %v1545_v11 }
 0x67c   : > { %v1616_v28 = vadd.f32 %v2380_v57, %v1611_v58  ;;  %v1617_v59 = vadd.f32 %v2380_v57, %v1612_v34 }
 0x67e   : > { %v1618_v35 = vmin.f32 %v1616_v28, 20.0  ;;  %v1619_v36 = vmin.f32 %v1617_v59, 20.0 }
 0x680   : > { %v1620_v60 = vmul.f32 1.442695, %v1618_v35  ;;  %v1622_v37 = vmul.f32 1.442695, %v1619_v36 }
 0x682   : > { %2398 = vpow2.f32 %v1620_v60 }
 0x683   : > { %2400 = vpow2.f32 %v1622_v37 }
 0x688   : > { %v2399_v38 = vpop.eup %2398 }
 0x689   : > { %v2401_v39 = vpop.eup %2400  ;;  %v1624_v40 = vadd.f32 1.0, %v2399_v38 }
 0x68a   : > { %v1625_v42 = vadd.f32 1.0, %v2401_v39 }
 0x68b   : > { %v1626_v54 = vmul.f32 %v1624_v40, %v1624_v40 }
 0x68c   : > { %v1627_v15 = vmul.f32 %v1625_v42, %v1625_v42 }
 0x68d   : > { %v1632_v61 = vadd.f32 1.0, %v1626_v54  ;;  %v2153_v63 = vadd.f32 -1.0, %v1626_v54 }
 0x68e   : > { %v1633_v62 = vadd.f32 1.0, %v1627_v15  ;;  %v2154_v0 = vadd.f32 -1.0, %v1627_v15 }
 0x68f   : > { %2402 = vrcp.f32 %v1632_v61  ;;  %v1630_v1 = vmul.f32 %v2153_v63, %v1616_v28 }
 0x690   : > { %2404 = vrcp.f32 %v1633_v62  ;;  %v1631_v3 = vmul.f32 %v2154_v0, %v1617_v59 }
 0x695   : > { %v2403_v43 = vpop.eup %2402 }
 0x696   : > { %v2405_v4 = vpop.eup %2404  ;;  %v1636_v5 = vmul.f32 %v2403_v43, %v1630_v1 }
 0x697   : > { %v1637_v7 = vmul.f32 %v2405_v4, %v1631_v3 }
 0x698   : > { %v1720_v9 = vadd.f32 %v1716_v6, %v1636_v5 }
 0x699   : > { %v1721_v10 = vadd.f32 %v1718_v8, %v1637_v7 }
 0x69a   : > { %1722 = vst [vmem:[%s667_s2] sm:$0xff] %v1720_v9 }
 0x69b   : > { %1723 = vst [vmem:[%s667_s2 + $0x8] sm:$0xff] %v1721_v10 }
 0x69c   : > { %2673 = shalt.err (!%p2670_p8)
}
 0x69d   : > { %s2745_s9 = smov 128   ;;  %s2746_s11 = smov 8  }
 0x69e   : > { %2286 = dma.vmem_to_hbm [thread:$0]  (%p2931_p4), %s1738_s7, 256, %s1740_s28, %s1725_s8, %s2745_s9, %s2745_s9, %s2746_s11  }
 0x69f PF: > { %s1754_s4 = sand.u32 1, %s2720_s21   ;;  %p3395_p10 = scmp.ge.s32.totalorder %s2732_s24, 2 }
 0x6a0   : > { %s1755_s10 = scalar_lea.sflag [#allocation4], %s1754_s4 }
 0x6a1   : > { %p2315_p13 = pnand %p3395_p10, %p2935_p6 }
 0x6a3   : > { %p2316_p11 = pneg %p2315_p13 }
 0x6a5   : > { %2715 = dma.done.wait (%p2316_p11), %s1755_s10, 256  }
 0x6a6   : > { %2717 = vsyncadd (%p2316_p11), %s1755_s10, 4294967040  ;;  %s3396_s24 = sld [smem:[#allocation25_spill]]  ;;  %s3399_s21 = smov %s2724_s22 }
 0x6a7   : > { %s3397_s18 = sld [smem:[#allocation24_spill]] }
 0x6a8   : > { %s3398_s23 = sld [smem:[#allocation26_spill]] }
 0x6ac   : > { %p35_p0 = scmp.ge.s32.totalorder %s3396_s24, 4  }
 0x6ad   : > { %s3400_s22 = smov %s3397_s18 }
 0x6ae   :  { %37 = sbr.rel (!%p35_p0) target bundleno = 23 (0x17), region = 170 }
 0x6b3   :  { %1761 = vsyncpa [#allocation3], 1 }
 0x6b4   :  { %1763 = vsyncpa [#allocation3 + $0x1], 1 }
 0x6b5   :  { %1764 = vsyncpa [#allocation6], 1 }
 0x6b6   :  { %1766 = vsyncpa [#allocation6 + $0x1], 1 }
 0x6b7   :  { %1767 = vsyncpa [#allocation9], 1 }
 0x6b8   :  { %1768 = vsyncpa [#allocation12], 1 }
 0x6b9   :  { %1769 = vsyncpa [#allocation15], 1 }
 0x6ba   :  { %1770 = vsyncpa [#allocation4], 1 }
 0x6bb   :  { %1772 = vsyncpa [#allocation4 + $0x1], 1 }

// kernel: tpu_custom_call.1
= control target key start
LH: loop header
LB: loop body
LE: loop exit
PB: predicated region body
PF: predicated region fallthrough
CT: control target
= control target key end

     0   :  { %s3331_s0 = inlined_call_operand.hbm [shape: f32[32,128], index: 0, kind: input, shape index: {}]   ;;  %s3332_s1 = inlined_call_operand.hbm [shape: f32[2,1,128], index: 1, kind: input, shape index: {}]   ;;  %s3333_s2 = inlined_call_operand.hbm [shape: bf16[3,128,128], index: 2, kind: input, shape index: {}]   ;;  %s3334_s3 = inlined_call_operand.vmem [shape: f32[1,128], index: 3, kind: input, shape index: {}]   ;;  %s3335_s4 = inlined_call_operand.vmem [shape: f32[1,128], index: 4, kind: input, shape index: {}]   ;;  %s3336_s5 = inlined_call_operand.vmem [shape: f32[1,128], index: 5, kind: input, shape index: {}]   ;;  %s3337_s6 = inlined_call_operand.vmem [shape: bf16[128,128], index: 6, kind: input, shape index: {}]   ;;  %s3338_s7 = inlined_call_operand.hbm [shape: f32[1,128], index: 7, kind: input, shape index: {}]   ;;  %s3339_s8 = inlined_call_operand.hbm [shape: bf16[3,128,128], index: 8, kind: input, shape index: {}]   ;;  %s3340_s9 = inlined_call_operand.hbm [shape: f32[1,128], index: 9, kind: input, shape index: {}]   ;;  %s3341_s10 = inlined_call_operand.hbm [shape: f32[1,128], index: 10, kind: input, shape index: {}]   ;;  %s3342_s11 = inlined_call_operand.hbm [shape: f32[1,128], index: 11, kind: input, shape index: {}]   ;;  %s3343_s12 = inlined_call_operand.vmem [shape: f32[128,8], index: 12, kind: input, shape index: {}]   ;;  %s3344_s13 = inlined_call_operand.vmem [shape: f32[8,128], index: 13, kind: input, shape index: {}]   ;;  %s3345_s14 = inlined_call_operand.vmem [shape: bf16[128,128], index: 14, kind: input, shape index: {}]   ;;  %s3346_s15 = inlined_call_operand.vmem [shape: f32[1,128], index: 15, kind: input, shape index: {}]   ;;  %s3347_s16 = inlined_call_operand.hbm [shape: f32[32,128], index: 16, kind: output, shape index: {}]  }
   0x1   :  { %3355 = sst [smem:[#allocation28_spill]] %s3331_s0 }
   0x2   :  { %3356 = sst [smem:[#allocation29_spill]] %s3333_s2 }
   0x3   :  { %3357 = sst [smem:[#allocation30_spill]] %s3335_s4 }
   0x4   :  { %3358 = sst [smem:[#allocation31_spill]] %s3336_s5 }
   0x5   :  { %3359 = sst [smem:[#allocation32_spill]] %s3338_s7 }
   0x6   :  { %3360 = sst [smem:[#allocation33_spill]] %s3339_s8 }
   0x7   :  { %3361 = sst [smem:[#allocation34_spill]] %s3340_s9 }
   0x8   :  { %3362 = sst [smem:[#allocation35_spill]] %s3341_s10 }
   0x9   :  { %3363 = sst [smem:[#allocation36_spill]] %s3342_s11 }
   0xa   :  { %3364 = sst [smem:[#allocation37_spill]] %s3345_s14 }
   0xb   :  { %3365 = sst [smem:[#allocation38_spill]] %s3346_s15 }
   0xc   :  { %3366 = sst [smem:[#allocation39_spill]] %s3347_s16 }
   0xd   :  { %21 = vsyncpa [#allocation3], 0 }
   0xe   :  { %23 = vsyncpa [#allocation3 + $0x1], 0 }
   0xf   :  { %24 = vsyncpa [#allocation6], 0 }
  0x10   :  { %26 = vsyncpa [#allocation6 + $0x1], 0 }
  0x11   :  { %27 = vsyncpa [#allocation9], 0 }
  0x12   :  { %28 = vsyncpa [#allocation12], 0 }
  0x13   :  { %29 = vsyncpa [#allocation15], 0 }
  0x14   :  { %30 = vsyncpa [#allocation4], 0 }
  0x15   :  { %32 = vsyncpa [#allocation4 + $0x1], 0  ;;  %s2832_s21 = smov 0   ;;  %s2834_s22 = smov 0  }
  0x16   :  { %s2836_s23 = smov 0   ;;  %s2838_s24 = smov 0  }
  0x17 LB: > { %3367 = sst [smem:[#allocation24_spill]] %s2728_s23  ;;  %s2856_s28 = sadd.s32 4294967295, %s2732_s24   ;;  %s2732_s24 = sphi %s2838_s24, %s3396_s24   ;;  %s2728_s23 = sphi %s2836_s23, %s3398_s23   ;;  %s2724_s22 = sphi %s2834_s22, %s3400_s22   ;;  %s2720_s21 = sphi %s2832_s21, %s3399_s21  }
  0x18   : > { %s3368_s2 = sld [smem:[#allocation29_spill]]  ;;  %p1890_p0 = scmp.ge.s32.totalorder %s2732_s24, 1 }
  0x19   : > { %p59_p1 = scmp.eq.s32.totalorder %s2856_s28, 0  ;;  %p415_p2 = scmp.lt.s32.totalorder %s2732_s24, 3 }
  0x1a   : > { %s2734_s30 = smov [#allocation7]   ;;  %s3370_s7 = sld [smem:[#allocation32_spill]] }
  0x1b   : > { %p2861_p3 = pnand %p1890_p0, %p415_p2  ;;  %s428_s0 = sshll.u32 %s2734_s30, 4  ;;  %s429_s0 = int_to_ptr.vmem [resolvable:$true] %s428_s0 }
  0x1c   : > { %s3372_s9 = sld [smem:[#allocation34_spill]]  ;;  %s2736_s15 = smov 64  }
  0x1d   : > { %p2288_p4 = pneg %p2861_p3  ;;  %s2737_s14 = smov 4  }
  0x1e   : > { %s426_s27 = sshll.u32 %s3368_s2, 4  ;;  %s2735_s2 = smov [#allocation8]   ;;  %s427_s27 = int_to_ptr.hbm [resolvable:$true] %s426_s27 }
  0x1f   : > { %p2873_p6 = pnand %p2288_p4, %p59_p1  ;;  %s455_s16 = sshll.u32 %s2735_s2, 4  ;;  %s456_s16 = int_to_ptr.vmem [resolvable:$true] %s455_s16 }
  0x20   : > { %s453_s19 = sshll.u32 %s3370_s7, 4  ;;  %s3373_s8 = sld [smem:[#allocation33_spill]]  ;;  %s454_s19 = int_to_ptr.hbm [resolvable:$true] %s453_s19 }
  0x21   : > { %2291 = dma.hbm_to_vmem [thread:$0]  (!%p2873_p6), %s427_s27, 3072, %s429_s0, [#allocation6], %s2736_s15, %s2736_s15, %s2737_s14  }
  0x22   : > { %s479_s30 = sshll.u32 %s3372_s9, 4  ;;  %s2738_s5 = smov [#allocation11]   ;;  %s480_s30 = int_to_ptr.hbm [resolvable:$true] %s479_s30 }
  0x23   : > { %2294 = dma.hbm_to_vmem [thread:$0]  (!%p2873_p6), %s454_s19, 16, %s456_s16, [#allocation9]  }
  0x24   : > { %s481_s4 = sshll.u32 %s2738_s5, 4  ;;  %s2739_s2 = smov [#allocation10]   ;;  %s482_s4 = int_to_ptr.vmem [resolvable:$true] %s481_s4 }
  0x25   : > { %2300 = dma.hbm_to_vmem [thread:$0]  (!%p2873_p6), %s480_s30, 16, %s482_s4, [#allocation12]  }
  0x26   : > { %s464_s7 = sshll.u32 %s3373_s8, 4  ;;  %s466_s25 = sshll.u32 %s2739_s2, 4  ;;  %s465_s7 = int_to_ptr.hbm [resolvable:$true] %s464_s7  ;;  %s467_s25 = int_to_ptr.vmem [resolvable:$true] %s466_s25 }
  0x27   : > { %s3374_s10 = sld [smem:[#allocation35_spill]]  ;;  %s2740_s26 = smov [#allocation13]  }
  0x28   : > { %2297 = dma.hbm_to_vmem [thread:$0]  (!%p2873_p6), %s465_s7, 3072, %s467_s25, [#allocation9], %s2736_s15, %s2736_s15, %s2737_s14  }
  0x29   : > { %s3375_s11 = sld [smem:[#allocation36_spill]]  ;;  %s493_s30 = sshll.u32 %s2740_s26, 4  ;;  %s494_s30 = int_to_ptr.vmem [resolvable:$true] %s493_s30 }
  0x2a   : > { %s2741_s17 = smov [#allocation14]   ;;  %s1889_s14 = sadd.s32 4294967294, %s2732_s24  }
  0x2b   : > { %s505_s7 = sshll.u32 %s2741_s17, 4  ;;  %s2903_s15 = sadd.s32 1, %s2732_s24   ;;  %s506_s7 = int_to_ptr.vmem [resolvable:$true] %s505_s7 }
  0x2c   : > { %3376 = sst [smem:[#allocation25_spill]] %s2903_s15  ;;  %s42_s18 = ssub.s32 %s2732_s24, %s2903_s15 }
  0x2d   : > { %s491_s16 = sshll.u32 %s3374_s10, 4  ;;  %s45_s2 = sadd.s32 1, %s2728_s23  ;;  %s492_s16 = int_to_ptr.hbm [resolvable:$true] %s491_s16 }
  0x2e   : > { %2303 = dma.hbm_to_vmem [thread:$0]  (!%p2873_p6), %s492_s16, 16, %s494_s30, [#allocation12]  }
  0x2f   : > { %s503_s4 = sshll.u32 %s3375_s11, 4  ;;  %p43_p7 = scmp.eq.s32.totalorder %s42_s18, 0  ;;  %s504_s4 = int_to_ptr.hbm [resolvable:$true] %s503_s4 }
  0x30   : > { %2306 = dma.hbm_to_vmem [thread:$0]  (!%p2873_p6), %s504_s4, 16, %s506_s7, [#allocation15]  }
  0x31   : > { %p52_p8 = scmp.ne.s32.totalorder %s2728_s23, %s2724_s22  ;;  %p53_p9 = scmp.eq.s32.totalorder %s2732_s24, 0 }
  0x32   : > { %p58_p10 = scmp.ne.s32.totalorder %s2724_s22, %s2720_s21  ;;  %p402_p13 = scmp.eq.s32.totalorder %s2856_s28, 1 }
  0x33   : > { %s2914_s25 = scalar_select %p43_p7, %s2728_s23, %s45_s2  }
  0x34   : > { %p2916_p11 = por %p53_p9, %p52_p8  ;;  %p2922_p12 = por %p59_p1, %p58_p10 }
  0x35   : > { %3377 = sst [smem:[#allocation26_spill]] %s2914_s25  ;;  %p408_p0 = scmp.eq.s32.totalorder %s1889_s14, 1 }
  0x36   : > { %p2324_p2 = scmp.lt.s32.totalorder %s2732_s24, 2  ;;  %s2929_s0 = sand.u32 1, %s2728_s23  }
  0x37   : > { %p2931_p4 = por %p402_p13, %p52_p8  ;;  %p2935_p6 = por %p408_p0, %p58_p10 }
  0x38   : > { %s1898_s19 = sshll.u32 %s2929_s0, 4  ;;  %s2192_s4 = sshll.u32 %s2732_s24, 4 }
  0x39   : > { %s3381_s5 = scalar_select %p2935_p6, 1, 0 }
  0x3a   : > { %s3383_s17 = sld [smem:[#allocation28_spill]]  ;;  %s532_s14 = scalar_lea.vmem [#allocation2], %s1898_s19 }
  0x3b   : > { %3382 = sst [smem:[#allocation27_spill]] %s3381_s5  ;;  %s540_s18 = sshll.u32 %s532_s14, 4  ;;  %s541_s18 = int_to_ptr.vmem [resolvable:$true] %s540_s18 }
  0x3c   : > { %p2946_p7 = pnand %p2324_p2, %p2916_p11  ;;  %s550_s9 = sand.u32 1, %s2732_s24  }
  0x3d   : > { %s529_s10 = scalar_lea.sflag [#allocation3], %s2929_s0 }
  0x3e   : > { %p2590_p9 = pneg %p2946_p7 }
  0x40   : > { %s537_s7 = scalar_lea.hbm %s3383_s17, %s2192_s4  ;;  %s2593_s4 = scalar_lea.hbm %s3383_s17, 32 }
  0x41   : > { %s538_s2 = sshll.u32 %s537_s7, 4  ;;  %s539_s2 = int_to_ptr.hbm [resolvable:$true] %s538_s2 }
  0x42   : > { %s2586_s11 = sshra.s32 %s539_s2, 4  ;;  %s2587_s11 = int_to_ptr.hbm [resolvable:$true] %s2586_s11 }
  0x43   : > { %s2588_s25 = scalar_lea.hbm %s2587_s11, 16  ;;  %p2594_p11 = scmp.lt.s32.totalorder %s2587_s11, %s3383_s17 }
  0x44   : > { %p2589_p8 = scmp.ne.s32.totalorder %s2587_s11, %s2588_s25  ;;  %p2595_p0 = scmp.lt.s32.totalorder %s2593_s4, %s2588_s25 }
  0x46   : > { %p2591_p10 = pnand %p2590_p9, %p2589_p8  ;;  %p2596_p2 = por %p2595_p0, %p2594_p11 }
  0x48   : > { %p2592_p13 = pneg %p2591_p10 }
  0x4a   : > { %p2597_p5 = pnand %p2596_p2, %p2592_p13 }
  0x4c   : > { %2600 = shalt.err (!%p2597_p5)
}
  0x4d   : > { %s2742_s7 = smov 128   ;;  %s2743_s14 = smov 8  }
  0x4e   : > { %2310 = dma.hbm_to_vmem [thread:$0]  (!%p2946_p7), %s539_s2, 256, %s541_s18, %s529_s10, %s2742_s7, %s2742_s7, %s2743_s14  }
  0x4f   : > { %s556_s19 = scalar_lea.hbm %s3332_s1, %s2732_s24  ;;  %s553_s27 = scalar_lea.vmem [#allocation5], %s2929_s0 }
  0x50   : > { %s560_s5 = sshll.u32 %s553_s27, 4  ;;  %s558_s26 = sshll.u32 %s556_s19, 4  ;;  %s561_s5 = int_to_ptr.vmem [resolvable:$true] %s560_s5  ;;  %s559_s26 = int_to_ptr.hbm [resolvable:$true] %s558_s26 }
  0x51   : > { %s551_s11 = scalar_lea.sflag [#allocation6], %s550_s9  ;;  %s2616_s25 = sshra.s32 %s559_s26, 4  ;;  %s2617_s25 = int_to_ptr.hbm [resolvable:$true] %s2616_s25 }
  0x52   : > { %s2618_s4 = scalar_lea.hbm %s2617_s25, 1  ;;  %s2623_s18 = scalar_lea.hbm %s3332_s1, 2 }
  0x53   : > { %p2619_p5 = scmp.ne.s32.totalorder %s2617_s25, %s2618_s4  ;;  %p2624_p13 = scmp.lt.s32.totalorder %s2617_s25, %s3332_s1 }
  0x54   : > { %p2625_p11 = scmp.lt.s32.totalorder %s2623_s18, %s2618_s4 }
  0x55   : > { %p2621_p8 = pnand %p2619_p5, %p2590_p9 }
  0x56   : > { %p2626_p0 = por %p2625_p11, %p2624_p13 }
  0x57   : > { %p2622_p10 = pneg %p2621_p8 }
  0x59   : > { %p2627_p2 = pnand %p2626_p0, %p2622_p10 }
  0x5b   : > { %2630 = shalt.err (!%p2627_p2)
}
  0x5c   : > { %2313 = dma.hbm_to_vmem [thread:$0]  (!%p2946_p7), %s559_s26, 16, %s561_s5, %s551_s11  }
  0x5d   : > { %569 = sbr.rel (%p2861_p3) target bundleno = 1695 (0x69f), region = 84  ;;  %s2984_s9 = sand.u32 (!%p2861_p3), 1, %s2724_s22  }
  0x5e   : > { %s1902_s0 = sshll.u32 (!%p2861_p3), %s2984_s9, 4  ;;  %s572_s2 = scalar_lea.sflag (!%p2861_p3), [#allocation3], %s2984_s9 }
  0x5f   : > { %s2990_s7 = scalar_lea.vmem (!%p2861_p3), [#allocation2], %s1902_s0 }
  0x62   : > { %2691 = dma.done.wait (%p2922_p12), %s572_s2, 256  }
  0x63   : > { %2693 = vsyncadd (%p2922_p12), %s572_s2, 4294967040  ;;  %s581_s8 = sand.u32 1, %s2856_s28   ;;  %s584_s5 = scalar_lea.vmem [#allocation5], %s2984_s9 }
  0x64   : > { %s582_s29 = scalar_lea.sflag [#allocation6], %s581_s8 }
  0x65   : > { %2695 = dma.done.wait (%p2922_p12), %s582_s29, 16  }
  0x66   : > { %2697 = vsyncadd (%p2922_p12), %s582_s29, 4294967280 }
  0x67   : > { %2699 = dma.done.wait (%p59_p1), [#allocation6], 3072  }
  0x68   : > { %2701 = vsyncadd (%p59_p1), [#allocation6], 4294964224 }
  0x69   : > { %2703 = dma.done.wait (%p59_p1), [#allocation9], 3088  }
  0x6a   : > { %2705 = vsyncadd (%p59_p1), [#allocation9], 4294964208 }
  0x6b   : > { %2707 = dma.done.wait (%p59_p1), [#allocation12], 32  }
  0x6c   : > { %2709 = vsyncadd (%p59_p1), [#allocation12], 4294967264 }
  0x6d   : > { %2711 = dma.done.wait (%p59_p1), [#allocation15], 16  }
  0x6e   : > { %2713 = vsyncadd (%p59_p1), [#allocation15], 4294967280  ;;  %v2208_v0 = vld [vmem:[#allocation7 + $0x38] sm:$0xff]  ;;  %v2207_v2 = vld [vmem:[#allocation7 + $0x30] sm:$0xff]  ;;  %v689_v10 = vlaneseq  ;;  %vm2744_vm2 = vmmov 1   ;;  %vm1019_vm7 = vcmask 64512  }
  0x6f   : > { %v2200_v1 = vld [vmem:[#allocation7 + $0x78] sm:$0xff]  ;;  %815 = vmatpush.bf16.msra.mxu2 %v2208_v0  ;;  %v2199_v3 = vld [vmem:[#allocation7 + $0x70] sm:$0xff]  ;;  %v2206_v4 = vld [vmem:[#allocation7 + $0x28] sm:$0xff]  ;;  %s3389_s19 = sld [smem:[#allocation30_spill]]  ;;  %s667_s2 = scalar_lea.vmem [#allocation16], %s1902_s0 }
  0x70   : > { %877 = vmatpush.bf16.msra.mxu1 %v2200_v1  ;;  %v2198_v5 = vld [vmem:[#allocation7 + $0x68] sm:$0xff]  ;;  %v2205_v6 = vld [vmem:[#allocation7 + $0x20] sm:$0xff]  ;;  %v2204_v8 = vld [vmem:[#allocation7 + $0x18] sm:$0xff]  ;;  %v3020_v15 = vshrl.u32 %v689_v10, 7  ;;  %s3390_s11 = sld [smem:[#allocation31_spill]]  ;;  %s1725_s8 = scalar_lea.sflag [#allocation4], %s2984_s9 }
  0x71   : > { %v2197_v7 = vld [vmem:[#allocation7 + $0x60] sm:$0xff]  ;;  %v2196_v9 = vld [vmem:[#allocation7 + $0x58] sm:$0xff]  ;;  %v2203_v11 = vld [vmem:[#allocation7 + $0x10] sm:$0xff]  ;;  %s3391_s30 = sld [smem:[#allocation37_spill]] }
  0x72   : > { %v2195_v12 = vld [vmem:[#allocation7 + $0x50] sm:$0xff]  ;;  %v2202_v16 = vld [vmem:[#allocation7 + $0x8] sm:$0xff]  ;;  %v696_v20 = vand.u32 15, %v3020_v15  ;;  %vm741_vm0 = vcmp.lt.s32.totalorder %v3020_v15, 1  ;;  %v2201_v21 = vld [vmem:[#allocation7] sm:$0xff]  ;;  %v691_v34 = vadd.s32 8, %v3020_v15 }
  0x73   : > { %816 = vmatpush.bf16.msra.mxu2 %v2207_v2  ;;  %v670_v13 = vld [vmem:[%s2990_s7] sm:$0xff]  ;;  %v671_v14 = vld [vmem:[%s2990_s7 + $0x8] sm:$0xff]  ;;  %vm893_vm4 = vcmp.lt.s32.totalorder %v3020_v15, 7  ;;  %s3392_s10 = sld [smem:[#allocation38_spill]]  ;;  %s1737_s7 = sshll.u32 %s667_s2, 4  ;;  %s1738_s7 = int_to_ptr.vmem [resolvable:$true] %s1737_s7 }
  0x74   : > { %878 = vmatpush.bf16.msra.mxu1 %v2199_v3  ;;  %v739_v17 = vrot.slane %v670_v13, 7  ;;  %v740_v18 = vrot.slane %v671_v14, 7  ;;  %v2194_v19 = vld [vmem:[#allocation7 + $0x48] sm:$0xff]  ;;  %v2216_v24 = vld [vmem:[#allocation7 + $0xb8] sm:$0xff]  ;;  %vm716_vm1 = vcmp.ge.s32.totalorder %v696_v20, 1  ;;  %v2193_v25 = vld [vmem:[#allocation7 + $0x40] sm:$0xff]  ;;  %v3033_v28 = vpack.c.bf16 %v671_v14, %v670_v13 }
  0x75   : > { %vm3029_vm3 = vmpackc.low %vm2744_vm2, %vm716_vm1  ;;  %v2215_v29 = vld [vmem:[#allocation7 + $0xb0] sm:$0xff]  ;;  %v2214_v30 = vld [vmem:[#allocation7 + $0xa8] sm:$0xff]  ;;  %v891_v36 = vrot.slane %v670_v13, 1  ;;  %v892_v37 = vrot.slane %v671_v14, 1  ;;  %v703_v38 = vand.u32 15, %v691_v34 }
  0x76   : > { %v742_v22 = vsel %vm741_vm0, %v739_v17, %v740_v18  ;;  %v743_v23 = vsel %vm741_vm0, %v740_v18, %v739_v17  ;;  %v2213_v31 = vld [vmem:[#allocation7 + $0xa0] sm:$0xff]  ;;  %v2212_v32 = vld [vmem:[#allocation7 + $0x98] sm:$0xff]  ;;  %v2211_v33 = vld [vmem:[#allocation7 + $0x90] sm:$0xff] }
  0x77   : > { %817 = vmatpush.bf16.msra.mxu2 %v2206_v4  ;;  %v1943_v26 = vpack.c.bf16 %v742_v22, %v743_v23  ;;  %v2210_v35 = vld [vmem:[#allocation7 + $0x88] sm:$0xff]  ;;  %v2209_v39 = vld [vmem:[#allocation7 + $0x80] sm:$0xff]  ;;  %v894_v40 = vsel %vm893_vm4, %v891_v36, %v892_v37  ;;  %v895_v41 = vsel %vm893_vm4, %v892_v37, %v891_v36  ;;  %vm719_vm5 = vcmp.lt.s32.totalorder %v703_v38, 15  ;;  %v3054_v44 = vld [vmem:[%s3343_s12 + $0x78] sm:$0xff] }
  0x78   : > { %879 = vmatpush.bf16.msra.mxu1 %v2198_v5  ;;  %v2010_v42 = vpack.c.bf16 %v895_v41, %v894_v40  ;;  %vm3045_vm6 = vmpackc.low %vm719_vm5, %vm2744_vm2  ;;  %v3059_v45 = vld [vmem:[%s3343_s12 + $0x70] sm:$0xff]  ;;  %998 = vmatpush.msra.mxu3 %v3054_v44  ;;  %v3066_v46 = vld [vmem:[%s3343_s12 + $0x68] sm:$0xff] }
  0x79   : > { %v3072_v47 = vld [vmem:[%s3343_s12 + $0x60] sm:$0xff]  ;;  %v3078_v48 = vld [vmem:[%s3343_s12 + $0x58] sm:$0xff]  ;;  %v3083_v49 = vld [vmem:[%s3343_s12 + $0x50] sm:$0xff] }
  0x7a   : > { %999 = vmatpush.msra.mxu3 %v3059_v45  ;;  %v3090_v50 = vld [vmem:[%s3343_s12 + $0x48] sm:$0xff]  ;;  %v3096_v51 = vld [vmem:[%s3343_s12 + $0x40] sm:$0xff]  ;;  %v3102_v52 = vld [vmem:[%s3343_s12 + $0x38] sm:$0xff] }
  0x7b   : > { %818 = vmatpush.bf16.msra.mxu2 %v2205_v6  ;;  %v3108_v53 = vld [vmem:[%s3343_s12 + $0x30] sm:$0xff]  ;;  %v3114_v55 = vld [vmem:[%s3343_s12 + $0x28] sm:$0xff]  ;;  %v3119_v56 = vld [vmem:[%s3343_s12 + $0x20] sm:$0xff] }
  0x7c   : > { %880 = vmatpush.bf16.msra.mxu1 %v2197_v7  ;;  %1000 = vmatpush.msra.mxu3 %v3066_v46  ;;  %v3125_v57 = vld [vmem:[%s3343_s12 + $0x18] sm:$0xff]  ;;  %v3131_v58 = vld [vmem:[%s3343_s12 + $0x10] sm:$0xff]  ;;  %v3137_v59 = vld [vmem:[%s3343_s12 + $0x8] sm:$0xff] }
  0x7d   : > { %v3143_v60 = vld [vmem:[%s3343_s12] sm:$0xff]  ;;  %v2223_v36 = vld [vmem:[%s3337_s6 + $0x30] sm:$0xff]  ;;  %v2222_v40 = vld [vmem:[%s3337_s6 + $0x28] sm:$0xff] }
  0x7e   : > { %1001 = vmatpush.msra.mxu3 %v3072_v47  ;;  %v2377_v4 = vld [vmem:[%s3334_s3] ss:$0 sm:$0xff] }
  0x7f   : > { %819 = vmatpush.bf16.msra.mxu2 %v2204_v8  ;;  %v3153_v17 = vld [vmem:[%s3344_s13] sm:$0xff] }
  0x80   : > { %881 = vmatpush.bf16.msra.mxu1 %v2196_v9  ;;  %1002 = vmatpush.msra.mxu3 %v3078_v48  ;;  %v1138_v37 = vld [vmem:[%s584_s5] sm:$0x1]  ;;  %s3393_s5 = sld [smem:[#allocation39_spill]] }
  0x81   : > { %1038 = vmatpush.msra.mxu0 %v3153_v17  ;;  %v1139_v38 = vmin.f32 %v1138_v37, 20.0  ;;  %v2221_v41 = vld [vmem:[%s3337_s6 + $0x20] sm:$0xff] }
  0x82   : > { %1003 = vmatpush.msra.mxu3 %v3083_v49 }
  0x83   : > { %820 = vmatpush.bf16.msra.mxu2 %v2203_v11  ;;  %1055 = vmatpush.msrb.mxu0 %v3054_v44 }
  0x84   : > { %882 = vmatpush.bf16.msra.mxu1 %v2195_v12  ;;  %1004 = vmatpush.msra.mxu3 %v3090_v50 }
  0x85   : > { %1056 = vmatpush.msrb.mxu0 %v3059_v45 }
  0x86   : > { %1005 = vmatpush.msra.mxu3 %v3096_v51 }
  0x87   : > { %821 = vmatpush.bf16.msra.mxu2 %v2202_v16  ;;  %1057 = vmatpush.msrb.mxu0 %v3066_v46 }
  0x88   : > { %883 = vmatpush.bf16.msra.mxu1 %v2194_v19  ;;  %1006 = vmatpush.msra.mxu3 %v3102_v52 }
  0x89   : > { %1058 = vmatpush.msrb.mxu0 %v3072_v47 }
  0x8a   : > { %1007 = vmatpush.msra.mxu3 %v3108_v53 }
  0x8b   : > { %822 = vmatpush.bf16.msra.mxu2 %v2201_v21  ;;  %1059 = vmatpush.msrb.mxu0 %v3078_v48 }
  0x8c   : > { %884 = vmatpush.bf16.msra.mxu1 %v2193_v25  ;;  %1008 = vmatpush.msra.mxu3 %v3114_v55 }
  0x8d   : > { %1060 = vmatpush.msrb.mxu0 %v3083_v49 }
  0x8e   : > { %1944 = vmatmul.msk.bf16.vlgmr.msra.gmra.mxu2 %vm3029_vm3, %v1943_v26  ;;  %1009 = vmatpush.msra.mxu3 %v3119_v56 }
  0x8f   : > { %968 = vmatpush.bf16.msrb.mxu2 %v2216_v24  ;;  %885 = vmatmul.bf16.vlgmr.msra.gmra.mxu1 %v3033_v28 }
  0x90   : > { %1010 = vmatpush.msra.mxu3 %v3125_v57  ;;  %1094 = vmatpush.msrb.mxu1 %v3153_v17 }
  0x91   : > { %1061 = vmatpush.msrb.mxu0 %v3090_v50 }
  0x92   : > { %1011 = vmatpush.msra.mxu3 %v3131_v58 }
  0x93   : > { %969 = vmatpush.bf16.msrb.mxu2 %v2215_v29  ;;  %1062 = vmatpush.msrb.mxu0 %v3096_v51 }
  0x94   : > { %1012 = vmatpush.msra.mxu3 %v3137_v59 }
  0x95   : > { %1063 = vmatpush.msrb.mxu0 %v3102_v52 }
  0x96   : > { %1013 = vmatpush.msra.mxu3 %v3143_v60 }
  0x97   : > { %970 = vmatpush.bf16.msrb.mxu2 %v2214_v30  ;;  %1064 = vmatpush.msrb.mxu0 %v3108_v53 }
  0x99   : > { %1065 = vmatpush.msrb.mxu0 %v3114_v55 }
  0x9b   : > { %971 = vmatpush.bf16.msrb.mxu2 %v2213_v31  ;;  %1066 = vmatpush.msrb.mxu0 %v3119_v56 }
  0x9d   : > { %1067 = vmatpush.msrb.mxu0 %v3125_v57 }
  0x9f   : > { %972 = vmatpush.bf16.msrb.mxu2 %v2212_v32  ;;  %1068 = vmatpush.msrb.mxu0 %v3131_v58 }
  0xa1   : > { %1069 = vmatpush.msrb.mxu0 %v3137_v59 }
  0xa3   : > { %973 = vmatpush.bf16.msrb.mxu2 %v2211_v33  ;;  %1070 = vmatpush.msrb.mxu0 %v3143_v60 }
  0xa7   : > { %974 = vmatpush.bf16.msrb.mxu2 %v2210_v35  ;;  %v2224_v35 = vld [vmem:[%s3337_s6 + $0x38] sm:$0xff] }
  0xab   : > { %975 = vmatpush.bf16.msrb.mxu2 %v2209_v39  ;;  %v1140_v39 = vmul.f32 1.442695, %v1139_v38  ;;  %v2227_v38 = vld [vmem:[#allocation10 + $0x50] sm:$0xff] }
  0xad   : > { %2382 = vpow2.f32 %v1140_v39 }
  0xae   : > { %2011 = vmatmul.msk.bf16.vlgmr.msrb.gmra.mxu2 %vm3045_vm6, %v2010_v42 }
  0xaf   : > { %1215 = vmatpush.bf16.msra.mxu2 %v2224_v35 }
  0xb3   : > { %1216 = vmatpush.bf16.msra.mxu2 %v2223_v36  ;;  %v2383_v42 = vpop.eup %2382  ;;  %v2236_v36 = vld [vmem:[#allocation10 + $0x18] sm:$0xff] }
  0xb7   : > { %1217 = vmatpush.bf16.msra.mxu2 %v2222_v40  ;;  %v989_v40 = vld [vmem:[%s3389_s19] sm:$0x1]  ;;  %s2666_s19 = scalar_lea.hbm %s3393_s5, 32 }
  0xbb   : > { %1218 = vmatpush.bf16.msra.mxu2 %v2221_v41 }
 0x10c   : > { %v886_v62 = vpop.f32.mrf.mxu1 }
 0x111   : > { %v824_v54 = vpop.f32.mrf.mxu2 }
 0x112   : > { %v887_v1 = vadd.f32 %v886_v62, %v824_v54  ;;  %v2220_v54 = vld [vmem:[%s3337_s6 + $0x18] sm:$0xff] }
 0x113   : > { %1219 = vmatpush.bf16.msra.mxu2 %v2220_v54  ;;  %v2243_v54 = vld [vmem:[#allocation10 + $0x90] sm:$0xff] }
 0x114   : > { %v888_v0 = vpop.f32.mrf.mxu1 }
 0x119   : > { %v826_v61 = vpop.f32.mrf.mxu2 }
 0x11a   : > { %v889_v2 = vadd.f32 %v888_v0, %v826_v61  ;;  %v1142_v61 = vadd.f32 1.0, %v2383_v42  ;;  %v2235_v42 = vld [vmem:[#allocation10 + $0x10] sm:$0xff] }
 0x11c   : > { %v1143_v62 = vmul.f32 %v1142_v61, %v1142_v61 }
 0x11e   : > { %v1146_v0 = vadd.f32 1.0, %v1143_v62 }
 0x120   : > { %2384 = vrcp.f32 %v1146_v0 }
 0x131   : > { %v977_v63 = vpop.f32.mrf.mxu2 }
 0x132   : > { %v982_v3 = vadd.f32 %v977_v63, %v887_v1  ;;  %v2219_v63 = vld [vmem:[%s3337_s6 + $0x10] sm:$0xff]  ;;  %v2016_v1 = vadd.f32 -1.0, %v1143_v62 }
 0x133   : > { %1220 = vmatpush.bf16.msra.mxu2 %v2219_v63  ;;  %v2226_v62 = vld [vmem:[#allocation10 + $0x48] sm:$0xff] }
 0x134   : > { %v987_v7 = vadd.f32 %v2377_v4, %v982_v3  ;;  %v1145_v3 = vmul.f32 %v2016_v1, %v1138_v37  ;;  %v2244_v37 = vld [vmem:[#allocation10 + $0x98] sm:$0xff]  ;;  %v2234_v1 = vld [vmem:[#allocation10 + $0x8] sm:$0xff] }
 0x139   : > { %v979_v5 = vpop.f32.mrf.mxu2 }
 0x13a   : > { %v983_v6 = vadd.f32 %v979_v5, %v889_v2  ;;  %v2218_v2 = vld [vmem:[%s3337_s6 + $0x8] sm:$0xff]  ;;  %v2217_v5 = vld [vmem:[%s3337_s6] sm:$0xff] }
 0x13b   : > { %1221 = vmatpush.bf16.msra.mxu2 %v2218_v2  ;;  %v2242_v2 = vld [vmem:[#allocation10 + $0x88] sm:$0xff] }
 0x13c   : > { %v988_v8 = vadd.f32 %v2377_v4, %v983_v6  ;;  %v2385_v4 = vpop.eup %2384 }
 0x13d   : > { %v1148_v6 = vmul.f32 %v2385_v4, %v1145_v3  ;;  %v2378_v4 = vld [vmem:[%s3390_s11] ss:$0 sm:$0xff]  ;;  %s2257_s11 = sshll.u32 %s2856_s28, 4 }
 0x13e   : > { %v991_v9 = vadd.f32 %v988_v8, %v987_v7  ;;  %s1736_s15 = scalar_lea.hbm %s3393_s5, %s2257_s11 }
 0x13f   : > { %1222 = vmatpush.bf16.msra.mxu2 %v2217_v5  ;;  %v2225_v5 = vld [vmem:[#allocation10 + $0x40] sm:$0xff]  ;;  %s1739_s28 = sshll.u32 %s1736_s15, 4  ;;  %s1740_s28 = int_to_ptr.hbm [resolvable:$true] %s1739_s28 }
 0x140   : > { %v992_v10 = vrot.slane %v991_v9, 4  ;;  %s2660_s0 = sshra.s32 %s1740_s28, 4  ;;  %s2661_s0 = int_to_ptr.hbm [resolvable:$true] %s2660_s0 }
 0x141   : > { %s2662_s29 = scalar_lea.hbm %s2661_s0, 16  ;;  %p2667_p7 = scmp.lt.s32.totalorder %s2661_s0, %s3393_s5 }
 0x142   : > { %v993_v11 = vadd.f32 %v992_v10, %v991_v9  ;;  %v2232_v10 = vld [vmem:[#allocation10 + $0x78] sm:$0xff]  ;;  %p2663_p1 = scmp.ne.s32.totalorder %s2661_s0, %s2662_s29  ;;  %p2668_p9 = scmp.lt.s32.totalorder %s2666_s19, %s2662_s29 }
 0x143   : > { %1383 = vmatpush.bf16.msra.mxu1 %v2232_v10 }
 0x144   : > { %v994_v12 = vrot.slane %v993_v11, 2  ;;  %p2664_p3 = pnand %p2663_p1, %p2931_p4  ;;  %p2669_p5 = por %p2668_p9, %p2667_p7 }
 0x146   : > { %v995_v13 = vadd.f32 %v994_v12, %v993_v11  ;;  %v2240_v11 = vld [vmem:[#allocation10 + $0x38] sm:$0xff]  ;;  %p2665_p12 = pneg %p2664_p3 }
 0x147   : > { %v2248_v12 = vld [vmem:[#allocation10 + $0xb8] sm:$0xff]  ;;  %1321 = vmatpush.bf16.msrb.mxu3 %v2240_v11 }
 0x148   : > { %v996_v14 = vrot.slane %v995_v13, 1  ;;  %p2670_p8 = pnand %p2669_p5, %p2665_p12 }
 0x14a   : > { %v997_v16 = vadd.f32 %v996_v14, %v995_v13  ;;  %v2231_v13 = vld [vmem:[#allocation10 + $0x70] sm:$0xff] }
 0x14b   : > { %v2239_v14 = vld [vmem:[#allocation10 + $0x30] sm:$0xff]  ;;  %1384 = vmatpush.bf16.msra.mxu1 %v2231_v13 }
 0x14c   : > { %1014 = vmatmul.f32.vlgmr.msra.gmra.mxu3 %v997_v16  ;;  %v2247_v16 = vld [vmem:[#allocation10 + $0xb0] sm:$0xff] }
 0x14d   : > { %1322 = vmatpush.bf16.msrb.mxu3 %v2239_v14 }
 0x1cf   : > { %v1015_v18 = vpop.f32.mrf.mxu3 }
 0x1d0   : > { %v1018_v19 = vmul.f32 0.03125, %v1015_v18  ;;  %v2230_v18 = vld [vmem:[#allocation10 + $0x68] sm:$0xff] }
 0x1d1   : > { %1385 = vmatpush.bf16.msra.mxu1 %v2230_v18  ;;  %v1166_v18 = vld [vmem:[#allocation8] sm:$0x1] }
 0x1d2   : > { %2012 = vmatmul.msk.f32.vlgmr.msra.gmra.mxu0 %vm1019_vm7, %v1018_v19  ;;  %v2238_v19 = vld [vmem:[#allocation10 + $0x28] sm:$0xff] }
 0x1d3   : > { %1469 = vmatpush.bf16.msra.mxu0 %v2248_v12  ;;  %1323 = vmatpush.bf16.msrb.mxu3 %v2238_v19 }
 0x1d7   : > { %1470 = vmatpush.bf16.msra.mxu0 %v2247_v16 }
 0x24f   : > { %v1040_v20 = vpop.f32.mrf.mxu0 }
 0x250   : > { %v1043_v21 = vperm.slane %v1040_v20, 0  ;;  %v2246_v20 = vld [vmem:[#allocation10 + $0xa8] sm:$0xff] }
 0x251   : > { %1471 = vmatpush.bf16.msra.mxu0 %v2246_v20 }
 0x252   : > { %v3174_v22 = vsub.f32 %v987_v7, %v1043_v21  ;;  %v3176_v23 = vsub.f32 %v988_v8, %v1043_v21  ;;  %v1149_v8 = vpack.c.bf16 %v1148_v6, %v1148_v6 }
 0x254   : > { %v1046_v24 = vmul.f32 %v3174_v22, %v3174_v22  ;;  %v1047_v25 = vmul.f32 %v3176_v23, %v3176_v23  ;;  %1223 = vmatmul.bf16.vlgmr.msra.gmra.mxu2 %v1149_v8  ;;  %v2233_v8 = vld [vmem:[#allocation10] sm:$0xff] }
 0x256   : > { %v1048_v26 = vadd.f32 %v1047_v25, %v1046_v24  ;;  %v2229_v25 = vld [vmem:[#allocation10 + $0x60] sm:$0xff] }
 0x257   : > { %1386 = vmatpush.bf16.msra.mxu1 %v2229_v25 }
 0x258   : > { %v1049_v29 = vrot.slane %v1048_v26, 4 }
 0x25a   : > { %v1050_v30 = vadd.f32 %v1049_v29, %v1048_v26 }
 0x25c   : > { %v1051_v31 = vrot.slane %v1050_v30, 2 }
 0x25e   : > { %v1052_v32 = vadd.f32 %v1051_v31, %v1050_v30  ;;  %v2237_v30 = vld [vmem:[#allocation10 + $0x20] sm:$0xff] }
 0x25f   : > { %v2245_v31 = vld [vmem:[#allocation10 + $0xa0] sm:$0xff]  ;;  %1324 = vmatpush.bf16.msrb.mxu3 %v2237_v30 }
 0x260   : > { %v1053_v33 = vrot.slane %v1052_v32, 1  ;;  %1472 = vmatpush.bf16.msra.mxu0 %v2245_v31 }
 0x262   : > { %v1054_v34 = vadd.f32 %v1053_v33, %v1052_v32  ;;  %v2228_v33 = vld [vmem:[#allocation10 + $0x58] sm:$0xff] }
 0x263   : > { %1387 = vmatpush.bf16.msra.mxu1 %v2228_v33  ;;  %1325 = vmatpush.bf16.msrb.mxu3 %v2236_v36 }
 0x264   : > { %1071 = vmatmul.f32.vlgmr.msrb.gmra.mxu0 %v1054_v34 }
 0x265   : > { %1473 = vmatpush.bf16.msra.mxu0 %v2244_v37 }
 0x267   : > { %1388 = vmatpush.bf16.msra.mxu1 %v2227_v38  ;;  %1326 = vmatpush.bf16.msrb.mxu3 %v2235_v42 }
 0x269   : > { %1474 = vmatpush.bf16.msra.mxu0 %v2243_v54  ;;  %v2379_v54 = vld [vmem:[#allocation11] ss:$0 sm:$0xff] }
 0x26b   : > { %1389 = vmatpush.bf16.msra.mxu1 %v2226_v62  ;;  %1327 = vmatpush.bf16.msrb.mxu3 %v2234_v1 }
 0x26d   : > { %1475 = vmatpush.bf16.msra.mxu0 %v2242_v2 }
 0x26f   : > { %1390 = vmatpush.bf16.msra.mxu1 %v2225_v5  ;;  %1328 = vmatpush.bf16.msrb.mxu3 %v2233_v8 }
 0x273   : > { %1499 = vmatpush.msra.mxu3 %v3054_v44 }
 0x275   : > { %1500 = vmatpush.msra.mxu3 %v3059_v45 }
 0x277   : > { %1501 = vmatpush.msra.mxu3 %v3066_v46 }
 0x279   : > { %1502 = vmatpush.msra.mxu3 %v3072_v47 }
 0x27b   : > { %1503 = vmatpush.msra.mxu3 %v3078_v48 }
 0x27d   : > { %1504 = vmatpush.msra.mxu3 %v3083_v49 }
 0x27f   : > { %1505 = vmatpush.msra.mxu3 %v3090_v50 }
 0x281   : > { %1506 = vmatpush.msra.mxu3 %v3096_v51 }
 0x283   : > { %1507 = vmatpush.msra.mxu3 %v3102_v52 }
 0x285   : > { %1508 = vmatpush.msra.mxu3 %v3108_v53 }
 0x287   : > { %1509 = vmatpush.msra.mxu3 %v3114_v55 }
 0x289   : > { %1510 = vmatpush.msra.mxu3 %v3119_v56 }
 0x28b   : > { %1511 = vmatpush.msra.mxu3 %v3125_v57 }
 0x28d   : > { %1512 = vmatpush.msra.mxu3 %v3131_v58 }
 0x28f   : > { %1513 = vmatpush.msra.mxu3 %v3137_v59 }
 0x291   : > { %1514 = vmatpush.msra.mxu3 %v3143_v60 }
 0x2d7   : > { %v3209_v32 = vpop.f32.mrf.mxu2 }
 0x2df   : > { %v1226_v61 = vpop.f32.mrf.mxu2 }
 0x2e1   : > { %v1072_v7 = vpop.f32.mrf.mxu0 }
 0x2e2   : > { %v1075_v9 = vmul.f32 0.03125, %v1072_v7 }
 0x2e4   : > { %2013 = vmatmul.msk.f32.vlgmr.msrb.gmra.mxu1 %vm1019_vm7, %v1075_v9  ;;  %v2241_v9 = vld [vmem:[#allocation10 + $0x80] sm:$0xff] }
 0x2e5   : > { %1555 = vmatpush.msrb.mxu1 %v3054_v44  ;;  %1476 = vmatpush.bf16.msra.mxu0 %v2241_v9 }
 0x2e7   : > { %1556 = vmatpush.msrb.mxu1 %v3059_v45 }
 0x2e9   : > { %1557 = vmatpush.msrb.mxu1 %v3066_v46 }
 0x2eb   : > { %1558 = vmatpush.msrb.mxu1 %v3072_v47 }
 0x2ed   : > { %1559 = vmatpush.msrb.mxu1 %v3078_v48 }
 0x2ef   : > { %1560 = vmatpush.msrb.mxu1 %v3083_v49 }
 0x2f1   : > { %1561 = vmatpush.msrb.mxu1 %v3090_v50  ;;  %v1225_v50 = vadd.f32 %v3209_v32, %v1166_v18  ;;  %v2253_v18 = vld [vmem:[%s3391_s30 + $0x20] sm:$0xff] }
 0x2f3   : > { %1562 = vmatpush.msrb.mxu1 %v3096_v51 }
 0x2f5   : > { %1563 = vmatpush.msrb.mxu1 %v3102_v52 }
 0x2f7   : > { %1564 = vmatpush.msrb.mxu1 %v3108_v53 }
 0x2f9   : > { %1565 = vmatpush.msrb.mxu1 %v3114_v55 }
 0x2fb   : > { %1566 = vmatpush.msrb.mxu1 %v3119_v56 }
 0x2fd   : > { %1567 = vmatpush.msrb.mxu1 %v3125_v57 }
 0x2ff   : > { %1568 = vmatpush.msrb.mxu1 %v3131_v58 }
 0x301   : > { %1569 = vmatpush.msrb.mxu1 %v3137_v59 }
 0x303   : > { %1570 = vmatpush.msrb.mxu1 %v3143_v60 }
 0x361   : > { %v1096_v21 = vpop.f32.mrf.mxu1 }
 0x362   : > { %v1097_v24 = vadd.f32 1e-05, %v1096_v21  ;;  %v1228_v21 = vperm.slane %v1225_v50, 0  ;;  %v2250_v50 = vld [vmem:[%s3391_s30 + $0x8] sm:$0xff] }
 0x364   : > { %2386 = vrsqrt.f32 %v1097_v24  ;;  %vm1105_vm9 = vweird.f32 %v1097_v24 }
 0x36a   : > { %v2387_v26 = vpop.eup %2386 }
 0x36b   : > { %v1100_v29 = vmul.f32 %v2387_v26, %v1097_v24  ;;  %vm1106_vm8 = vweird.f32 %v2387_v26 }
 0x36c   : > { %vm1107_vm10 = vmor %vm1105_vm9, %vm1106_vm8 }
 0x36d   : > { %v1101_v34 = vmul.f32 %v2387_v26, %v1100_v29 }
 0x36f   : > { %v1102_v35 = vmul.f32 0.5, %v1101_v34 }
 0x371   : > { %v1103_v39 = vsub.f32 1.5, %v1102_v35 }
 0x373   : > { %v1104_v41 = vmul.f32 %v2387_v26, %v1103_v39 }
 0x375   : > { %v1108_v63 = vsel %vm1107_vm10, %v2387_v26, %v1104_v41 }
 0x376   : > { %v1109_v0 = vmul.f32 %v1108_v63, %v989_v40 }
 0x378   : > { %v1110_v3 = vperm.slane %v1109_v0, 0 }
 0x37a   : > { %v1111_v6 = vmul.f32 %v1110_v3, %v3174_v22  ;;  %v1112_v7 = vmul.f32 %v1110_v3, %v3176_v23 }
 0x37c   : > { %v1116_v10 = vadd.f32 %v2378_v4, %v1111_v6  ;;  %v1117_v11 = vadd.f32 %v2378_v4, %v1112_v7 }
 0x37e   : > { %v1118_v12 = vmin.f32 %v1116_v10, 20.0  ;;  %v1119_v13 = vmin.f32 %v1117_v11, 20.0 }
 0x380   : > { %v1120_v14 = vmul.f32 1.442695, %v1118_v12  ;;  %v1122_v16 = vmul.f32 1.442695, %v1119_v13 }
 0x382   : > { %2388 = vpow2.f32 %v1120_v14 }
 0x383   : > { %2390 = vpow2.f32 %v1122_v16 }
 0x388   : > { %v2389_v44 = vpop.eup %2388 }
 0x389   : > { %v2391_v45 = vpop.eup %2390  ;;  %v1124_v22 = vadd.f32 1.0, %v2389_v44 }
 0x38a   : > { %v1125_v23 = vadd.f32 1.0, %v2391_v45 }
 0x38b   : > { %v1126_v46 = vmul.f32 %v1124_v22, %v1124_v22 }
 0x38c   : > { %v1127_v47 = vmul.f32 %v1125_v23, %v1125_v23 }
 0x38d   : > { %v1132_v48 = vadd.f32 1.0, %v1126_v46  ;;  %v2014_v49 = vadd.f32 -1.0, %v1126_v46 }
 0x38e   : > { %v1133_v19 = vadd.f32 1.0, %v1127_v47  ;;  %v2015_v20 = vadd.f32 -1.0, %v1127_v47  ;;  %v2255_v47 = vld [vmem:[%s3391_s30 + $0x30] sm:$0xff] }
 0x38f   : > { %2392 = vrcp.f32 %v1132_v48  ;;  %v1130_v51 = vmul.f32 %v2014_v49, %v1116_v10  ;;  %v2254_v48 = vld [vmem:[%s3391_s30 + $0x28] sm:$0xff]  ;;  %v2251_v49 = vld [vmem:[%s3391_s30 + $0x10] sm:$0xff] }
 0x390   : > { %2394 = vrcp.f32 %v1133_v19  ;;  %v1131_v24 = vmul.f32 %v2015_v20, %v1117_v11  ;;  %v2252_v19 = vld [vmem:[%s3391_s30 + $0x18] sm:$0xff]  ;;  %v2249_v20 = vld [vmem:[%s3391_s30] sm:$0xff] }
 0x395   : > { %v2393_v52 = vpop.eup %2392 }
 0x396   : > { %v2395_v25 = vpop.eup %2394  ;;  %v1136_v26 = vmul.f32 %v2393_v52, %v1130_v51 }
 0x397   : > { %v1137_v53 = vmul.f32 %v2395_v25, %v1131_v24 }
 0x398   : > { %v1229_v29 = vadd.f32 %v1228_v21, %v1136_v26 }
 0x399   : > { %v1230_v55 = vadd.f32 %v1228_v21, %v1137_v53 }
 0x39a   : > { %v1250_v30 = vrot.slane %v1229_v29, 7  ;;  %v1397_v31 = vrot.slane %v1229_v29, 1 }
 0x39b   : > { %v1251_v56 = vrot.slane %v1230_v55, 7  ;;  %v1398_v32 = vrot.slane %v1230_v55, 1  ;;  %v1232_v33 = vpack.c.bf16 %v1230_v55, %v1229_v29 }
 0x39d   : > { %v1399_v57 = vsel %vm893_vm4, %v1397_v31, %v1398_v32  ;;  %v1400_v58 = vsel %vm893_vm4, %v1398_v32, %v1397_v31  ;;  %1391 = vmatmul.bf16.vlgmr.msra.gmra.mxu1 %v1232_v33  ;;  %v1252_v34 = vsel %vm741_vm0, %v1250_v30, %v1251_v56  ;;  %v1253_v59 = vsel %vm741_vm0, %v1251_v56, %v1250_v30  ;;  %v1490_v30 = vld [vmem:[#allocation13] sm:$0x1] }
 0x39e   : > { %v2082_v35 = vpack.c.bf16 %v1252_v34, %v1253_v59  ;;  %v2149_v36 = vpack.c.bf16 %v1400_v58, %v1399_v57  ;;  %v2380_v57 = vld [vmem:[#allocation14] ss:$0 sm:$0xff] }
 0x3a0   : > { %2083 = vmatmul.msk.bf16.vlgmr.msrb.gmra.mxu3 %vm3029_vm3, %v2082_v35  ;;  %2150 = vmatmul.msk.bf16.vlgmr.msra.gmra.mxu0 %vm3045_vm6, %v2149_v36 }
 0x3a1   : > { %1538 = vmatpush.msrb.mxu3 %v3153_v17 }
 0x41a   : > { %v1392_v60 = vpop.f32.mrf.mxu1 }
 0x41d   : > { %v1478_v37 = vpop.f32.mrf.mxu0 }
 0x422   : > { %v1394_v40 = vpop.f32.mrf.mxu1 }
 0x423   : > { %v1330_v38 = vpop.f32.mrf.mxu3 }
 0x424   : > { %v1393_v39 = vadd.f32 %v1392_v60, %v1330_v38 }
 0x425   : > { %v1480_v61 = vpop.f32.mrf.mxu0 }
 0x426   : > { %v1483_v42 = vadd.f32 %v1478_v37, %v1393_v39 }
 0x428   : > { %v1488_v63 = vadd.f32 %v2379_v54, %v1483_v42 }
 0x42b   : > { %v1332_v41 = vpop.f32.mrf.mxu3 }
 0x42c   : > { %v1395_v15 = vadd.f32 %v1394_v40, %v1332_v41 }
 0x42e   : > { %v1484_v62 = vadd.f32 %v1480_v61, %v1395_v15 }
 0x430   : > { %v1489_v0 = vadd.f32 %v2379_v54, %v1484_v62 }
 0x432   : > { %v1492_v27 = vadd.f32 %v1489_v0, %v1488_v63 }
 0x434   : > { %v1493_v1 = vrot.slane %v1492_v27, 4 }
 0x436   : > { %v1494_v2 = vadd.f32 %v1493_v1, %v1492_v27  ;;  %v2381_v27 = vld [vmem:[%s3392_s10] ss:$0 sm:$0xff] }
 0x438   : > { %v1495_v43 = vrot.slane %v1494_v2, 2 }
 0x43a   : > { %v1496_v3 = vadd.f32 %v1495_v43, %v1494_v2 }
 0x43c   : > { %v1497_v4 = vrot.slane %v1496_v3, 1 }
 0x43e   : > { %v1498_v5 = vadd.f32 %v1497_v4, %v1496_v3 }
 0x440   : > { %1515 = vmatmul.f32.vlgmr.msra.gmra.mxu3 %v1498_v5 }
 0x441   : > { %1594 = vmatpush.msra.mxu3 %v3153_v17  ;;  %v2256_v17 = vld [vmem:[%s3391_s30 + $0x38] sm:$0xff] }
 0x442   : > { %1706 = vmatpush.bf16.msrb.mxu0 %v2256_v17 }
 0x446   : > { %1707 = vmatpush.bf16.msrb.mxu0 %v2255_v47 }
 0x44a   : > { %1708 = vmatpush.bf16.msrb.mxu0 %v2254_v48 }
 0x44e   : > { %1709 = vmatpush.bf16.msrb.mxu0 %v2253_v18 }
 0x452   : > { %1710 = vmatpush.bf16.msrb.mxu0 %v2252_v19 }
 0x456   : > { %1711 = vmatpush.bf16.msrb.mxu0 %v2251_v49 }
 0x45a   : > { %1712 = vmatpush.bf16.msrb.mxu0 %v2250_v50 }
 0x45e   : > { %1713 = vmatpush.bf16.msrb.mxu0 %v2249_v20 }
 0x461   : > { %1714 = vmatmul.bf16.vlgmr.msrb.gmra.mxu0 %v3033_v28 }
 0x4c3   : > { %v1516_v6 = vpop.f32.mrf.mxu3 }
 0x4c4   : > { %v1519_v7 = vmul.f32 0.03125, %v1516_v6 }
 0x4c6   : > { %2151 = vmatmul.msk.f32.vlgmr.msrb.gmra.mxu3 %vm1019_vm7, %v1519_v7 }
 0x4de   : > { %v1715_v41 = vpop.f32.mrf.mxu0 }
 0x4df   : > { %v1716_v6 = vadd.f32 %v2381_v27, %v1715_v41 }
 0x4e6   : > { %v1717_v2 = vpop.f32.mrf.mxu0 }
 0x549   : > { %v1540_v8 = vpop.f32.mrf.mxu3 }
 0x54a   : > { %v1543_v9 = vperm.slane %v1540_v8, 0  ;;  %v1718_v8 = vadd.f32 %v2381_v27, %v1717_v2 }
 0x54c   : > { %v1544_v10 = vsub.f32 %v1488_v63, %v1543_v9  ;;  %v1545_v11 = vsub.f32 %v1489_v0, %v1543_v9 }
 0x54e   : > { %v1546_v12 = vmul.f32 %v1544_v10, %v1544_v10  ;;  %v1547_v13 = vmul.f32 %v1545_v11, %v1545_v11 }
 0x550   : > { %v1548_v14 = vadd.f32 %v1547_v13, %v1546_v12 }
 0x552   : > { %v1549_v16 = vrot.slane %v1548_v14, 4 }
 0x554   : > { %v1550_v44 = vadd.f32 %v1549_v16, %v1548_v14 }
 0x556   : > { %v1551_v45 = vrot.slane %v1550_v44, 2 }
 0x558   : > { %v1552_v22 = vadd.f32 %v1551_v45, %v1550_v44 }
 0x55a   : > { %v1553_v23 = vrot.slane %v1552_v22, 1 }
 0x55c   : > { %v1554_v46 = vadd.f32 %v1553_v23, %v1552_v22 }
 0x55e   : > { %1571 = vmatmul.f32.vlgmr.msrb.gmra.mxu1 %v1554_v46 }
 0x5db   : > { %v1572_v51 = vpop.f32.mrf.mxu1 }
 0x5dc   : > { %v1575_v21 = vmul.f32 0.03125, %v1572_v51 }
 0x5de   : > { %2152 = vmatmul.msk.f32.vlgmr.msra.gmra.mxu3 %vm1019_vm7, %v1575_v21 }
 0x661   : > { %v1596_v52 = vpop.f32.mrf.mxu3 }
 0x662   : > { %v1597_v24 = vadd.f32 1e-05, %v1596_v52 }
 0x664   : > { %2396 = vrsqrt.f32 %v1597_v24  ;;  %vm1605_vm12 = vweird.f32 %v1597_v24 }
 0x66a   : > { %v2397_v25 = vpop.eup %2396 }
 0x66b   : > { %v1600_v26 = vmul.f32 %v2397_v25, %v1597_v24  ;;  %vm1606_vm11 = vweird.f32 %v2397_v25 }
 0x66c   : > { %vm1607_vm13 = vmor %vm1605_vm12, %vm1606_vm11 }
 0x66d   : > { %v1601_v53 = vmul.f32 %v2397_v25, %v1600_v26 }
 0x66f   : > { %v1602_v29 = vmul.f32 0.5, %v1601_v53 }
 0x671   : > { %v1603_v55 = vsub.f32 1.5, %v1602_v29 }
 0x673   : > { %v1604_v31 = vmul.f32 %v2397_v25, %v1603_v55 }
 0x675   : > { %v1608_v56 = vsel %vm1607_vm13, %v2397_v25, %v1604_v31 }
 0x676   : > { %v1609_v32 = vmul.f32 %v1608_v56, %v1490_v30 }
 0x678   : > { %v1610_v33 = vperm.slane %v1609_v32, 0 }
 0x67a   : > { %v1611_v58 = vmul.f32 %v1610_v33, %v1544_v10  ;;  %v1612_v34 = vmul.f32 %v1610_v33, %v1545_v11 }
 0x67c   : > { %v1616_v28 = vadd.f32 %v2380_v57, %v1611_v58  ;;  %v1617_v59 = vadd.f32 %v2380_v57, %v1612_v34 }
 0x67e   : > { %v1618_v35 = vmin.f32 %v1616_v28, 20.0  ;;  %v1619_v36 = vmin.f32 %v1617_v59, 20.0 }
 0x680   : > { %v1620_v60 = vmul.f32 1.442695, %v1618_v35  ;;  %v1622_v37 = vmul.f32 1.442695, %v1619_v36 }
 0x682   : > { %2398 = vpow2.f32 %v1620_v60 }
 0x683   : > { %2400 = vpow2.f32 %v1622_v37 }
 0x688   : > { %v2399_v38 = vpop.eup %2398 }
 0x689   : > { %v2401_v39 = vpop.eup %2400  ;;  %v1624_v40 = vadd.f32 1.0, %v2399_v38 }
 0x68a   : > { %v1625_v42 = vadd.f32 1.0, %v2401_v39 }
 0x68b   : > { %v1626_v54 = vmul.f32 %v1624_v40, %v1624_v40 }
 0x68c   : > { %v1627_v15 = vmul.f32 %v1625_v42, %v1625_v42 }
 0x68d   : > { %v1632_v61 = vadd.f32 1.0, %v1626_v54  ;;  %v2153_v63 = vadd.f32 -1.0, %v1626_v54 }
 0x68e   : > { %v1633_v62 = vadd.f32 1.0, %v1627_v15  ;;  %v2154_v0 = vadd.f32 -1.0, %v1627_v15 }
 0x68f   : > { %2402 = vrcp.f32 %v1632_v61  ;;  %v1630_v1 = vmul.f32 %v2153_v63, %v1616_v28 }
 0x690   : > { %2404 = vrcp.f32 %v1633_v62  ;;  %v1631_v3 = vmul.f32 %v2154_v0, %v1617_v59 }
 0x695   : > { %v2403_v43 = vpop.eup %2402 }
 0x696   : > { %v2405_v4 = vpop.eup %2404  ;;  %v1636_v5 = vmul.f32 %v2403_v43, %v1630_v1 }
 0x697   : > { %v1637_v7 = vmul.f32 %v2405_v4, %v1631_v3 }
 0x698   : > { %v1720_v9 = vadd.f32 %v1716_v6, %v1636_v5 }
 0x699   : > { %v1721_v10 = vadd.f32 %v1718_v8, %v1637_v7 }
 0x69a   : > { %1722 = vst [vmem:[%s667_s2] sm:$0xff] %v1720_v9 }
 0x69b   : > { %1723 = vst [vmem:[%s667_s2 + $0x8] sm:$0xff] %v1721_v10 }
 0x69c   : > { %2673 = shalt.err (!%p2670_p8)
}
 0x69d   : > { %s2745_s9 = smov 128   ;;  %s2746_s11 = smov 8  }
 0x69e   : > { %2286 = dma.vmem_to_hbm [thread:$0]  (%p2931_p4), %s1738_s7, 256, %s1740_s28, %s1725_s8, %s2745_s9, %s2745_s9, %s2746_s11  }
 0x69f PF: > { %s1754_s4 = sand.u32 1, %s2720_s21   ;;  %p3395_p10 = scmp.ge.s32.totalorder %s2732_s24, 2 }
 0x6a0   : > { %s1755_s10 = scalar_lea.sflag [#allocation4], %s1754_s4 }
 0x6a1   : > { %p2315_p13 = pnand %p3395_p10, %p2935_p6 }
 0x6a3   : > { %p2316_p11 = pneg %p2315_p13 }
 0x6a5   : > { %2715 = dma.done.wait (%p2316_p11), %s1755_s10, 256  }
 0x6a6   : > { %2717 = vsyncadd (%p2316_p11), %s1755_s10, 4294967040  ;;  %s3396_s24 = sld [smem:[#allocation25_spill]]  ;;  %s3399_s21 = smov %s2724_s22 }
 0x6a7   : > { %s3397_s18 = sld [smem:[#allocation24_spill]] }
 0x6a8   : > { %s3398_s23 = sld [smem:[#allocation26_spill]] }
 0x6ac   : > { %p35_p0 = scmp.ge.s32.totalorder %s3396_s24, 4  }
 0x6ad   : > { %s3400_s22 = smov %s3397_s18 }
 0x6ae   :  { %37 = sbr.rel (!%p35_p0) target bundleno = 23 (0x17), region = 170 }
 0x6b3   :  { %1761 = vsyncpa [#allocation3], 1 }
 0x6b4   :  { %1763 = vsyncpa [#allocation3 + $0x1], 1 }
 0x6b5   :  { %1764 = vsyncpa [#allocation6], 1 }
 0x6b6   :  { %1766 = vsyncpa [#allocation6 + $0x1], 1 }
 0x6b7   :  { %1767 = vsyncpa [#allocation9], 1 }
 0x6b8   :  { %1768 = vsyncpa [#allocation12], 1 }
 0x6b9   :  { %1769 = vsyncpa [#allocation15], 1 }
 0x6ba   :  { %1770 = vsyncpa [#allocation4], 1 }
 0x6bb   :  { %1772 = vsyncpa [#allocation4 + $0x1], 1 }

</bundles_post_ra>
